<compile_context>
chip_gen: v5e
topology: v5e:2x2
jax: 0.10.0
libtpu: 0.0.40
codegen_flags: <defaults>
</compile_context>

<pallas_src>
import jax
import jax.numpy as jnp
import numpy as np
from jax.experimental import pallas as pl
from jax.experimental.pallas import tpu as pltpu


# ---------------------------------------------------------------------------
# Constant selection matrices: fold (nearest 2x upsample + pad 1 + 3x3 im2col)
# into 0/1 matrices applied on the MXU.
#   A[t, p_in, p_out] = 1  iff conv tap t of output pixel p_out reads base
#   pixel p_in of the (hbase x hbase) pre-upsample map (pad rows/cols -> all 0).
# ---------------------------------------------------------------------------
def _upsample_conv_select(hbase):
    hout = 2 * hbase
    A = np.zeros((9, hbase * hbase, hout * hout), np.float32)
    for dy in range(3):
        for dx in range(3):
            t = dy * 3 + dx
            for y in range(hout):
                for x in range(hout):
                    py, px = y + dy, x + dx            # coords in padded map
                    if 1 <= py <= hout and 1 <= px <= hout:
                        p_in = ((py - 1) // 2) * hbase + ((px - 1) // 2)
                        A[t, p_in, y * hout + x] = 1.0
    return jnp.asarray(A)


# ---------------------------------------------------------------------------
# Fused kernel: FC+ReLU -> upBlock1 -> upBlock2 -> NCHW output, all in VMEM.
# ---------------------------------------------------------------------------
def _upsample_net_kernel(xt_ref, wfc_ref, bfc_ref, a1_ref, w1_ref, b1_ref,
                         a2_ref, w2_ref, b2_ref, o_ref):
    B = xt_ref.shape[1]
    P0 = a1_ref.shape[1]                 # 16  (4x4 base grid)
    ngf = wfc_ref.shape[0] // P0         # base channels

    # ---- FC + ReLU, "position-major" rows: e[p*ngf + c, b] -----------------
    e = jnp.dot(wfc_ref[...], xt_ref[...], preferred_element_type=jnp.float32)
    e = jnp.maximum(e + bfc_ref[...], 0.0)                      # (P0*ngf, B)

    col = jax.lax.broadcasted_iota(jnp.int32, (ngf, P0), 1)

    for b in range(B):                   # B is tiny & static -> unrolled
        # Base 4x4 map, channels-first: f0[c, p] = e[p*ngf + c, b]
        f0 = jnp.zeros((ngf, P0), jnp.float32)
        for p in range(P0):
            mask_p = (col == p).astype(jnp.float32)             # (ngf, P0)
            f0 = f0 + mask_p * e[p * ngf:(p + 1) * ngf, b:b + 1]

        # ---- upBlock 1: 4x4 -> 8x8, ngf -> ngf//2 --------------------------
        # channels-first im2col: rows = t*ngf + ci, cols = 64 output pixels
        g1 = jnp.concatenate(
            [jnp.dot(f0, a1_ref[t], preferred_element_type=jnp.float32)
             for t in range(9)], axis=0)                        # (9*ngf, 64)
        h1 = jnp.maximum(
            jnp.dot(w1_ref[...], g1, preferred_element_type=jnp.float32)
            + b1_ref[...], 0.0)                                 # (ngf//2, 64)

        # ---- upBlock 2: 8x8 -> 16x16, ngf//2 -> ngf//4 ---------------------
        g2 = jnp.concatenate(
            [jnp.dot(h1, a2_ref[t], preferred_element_type=jnp.float32)
             for t in range(9)], axis=0)                        # (9*ngf//2, 256)
        out_b = jnp.maximum(
            jnp.dot(w2_ref[...], g2, preferred_element_type=jnp.float32)
            + b2_ref[...], 0.0)                                 # (ngf//4, 256)

        # (C, 256) is exactly this batch's NCHW (C, H*W) slab: lane-dense store.
        o_ref[b, :, :] = out_b


class UpsampleNetworkPallas:
    """Deterministically initialized synthetic weights (no checkpoint load)."""

    def __init__(self, arguments, noise_dim=16, seed=0):
        self.ngf = arguments["ngf"]
        self.input_dim = arguments["up_sample_input_dim"]
        self.noise_dim = noise_dim
        ngf = self.ngf
        in_dim = self.input_dim + self.noise_dim
        self.in_dim = in_dim

        key = jax.random.PRNGKey(seed)
        k = jax.random.split(key, 6)
        s = 0.05
        # Raw ("PyTorch-layout") weights, kept for the pure-JAX reference check.
        self.fc_w = s * jax.random.normal(k[0], (in_dim, ngf * 16), jnp.float32)
        self.fc_b = s * jax.random.normal(k[1], (ngf * 16,), jnp.float32)
        self.w1 = s * jax.random.normal(k[2], (3, 3, ngf, ngf // 2), jnp.float32)
        self.b1 = s * jax.random.normal(k[3], (ngf // 2,), jnp.float32)
        self.w2 = s * jax.random.normal(k[4], (3, 3, ngf // 2, ngf // 4), jnp.float32)
        self.b2 = s * jax.random.normal(k[5], (ngf // 4,), jnp.float32)

        # ---- Pre-packed kernel operands (all layout work done once, offline) ----
        # FC columns are natively ordered c*16 + p (NCHW flatten). Re-pack so the
        # kernel's FC output rows are p*ngf + c: no in-kernel reshape/transpose.
        self.wfc_p = (self.fc_w.T.reshape(ngf, 16, in_dim)
                      .transpose(1, 0, 2).reshape(16 * ngf, in_dim))
        self.bfc_p = self.fc_b.reshape(ngf, 16).T.reshape(16 * ngf, 1)
        # Conv weights flattened for the channels-first im2col matmul:
        # row = Cout, col = (dy*3+dx)*Cin + ci.
        self.w1_t = self.w1.transpose(3, 0, 1, 2).reshape(ngf // 2, 9 * ngf)
        self.b1_c = self.b1.reshape(ngf // 2, 1)
        self.w2_t = self.w2.transpose(3, 0, 1, 2).reshape(ngf // 4, 9 * (ngf // 2))
        self.b2_c = self.b2.reshape(ngf // 4, 1)
        # Constant matrices folding upsample-2x + pad-1 + 3x3 window extraction.
        self.a1 = _upsample_conv_select(4)   # (9, 16, 64)
        self.a2 = _upsample_conv_select(8)   # (9, 64, 256)

    def __call__(self, sentence_embedding, noise=None):
        B = sentence_embedding.shape[0]
        if noise is None:
            noise = jnp.zeros((B, self.noise_dim), jnp.float32)
        # Tiny (B x in_dim, a few hundred bytes) input prep stays in XLA.
        xt = jnp.concatenate(
            [sentence_embedding.astype(jnp.float32), noise.astype(jnp.float32)],
            axis=1).T                                            # (in_dim, B)

        ngf, in_dim = self.ngf, self.in_dim
        c1, c2 = ngf // 2, ngf // 4
        out = pl.pallas_call(
            _upsample_net_kernel,
            out_shape=jax.ShapeDtypeStruct((B, c2, 256), jnp.float32),
            grid=(1,),
            in_specs=[
                pl.BlockSpec((in_dim, B), lambda i: (0, 0)),
                pl.BlockSpec((16 * ngf, in_dim), lambda i: (0, 0)),
                pl.BlockSpec((16 * ngf, 1), lambda i: (0, 0)),
                pl.BlockSpec((9, 16, 64), lambda i: (0, 0, 0)),
                pl.BlockSpec((c1, 9 * ngf), lambda i: (0, 0)),
                pl.BlockSpec((c1, 1), lambda i: (0, 0)),
                pl.BlockSpec((9, 64, 256), lambda i: (0, 0, 0)),
                pl.BlockSpec((c2, 9 * c1), lambda i: (0, 0)),
                pl.BlockSpec((c2, 1), lambda i: (0, 0)),
            ],
            out_specs=pl.BlockSpec((B, c2, 256), lambda i: (0, 0, 0)),
            compiler_params=pltpu.CompilerParams(
                dimension_semantics=("arbitrary",)),
        )(xt, self.wfc_p, self.bfc_p, self.a1, self.w1_t, self.b1_c,
          self.a2, self.w2_t, self.b2_c)

        # (B, C, 256) -> (B, C, 16, 16): layout-preserving (free) reshape.
        return out.reshape(B, c2, 16, 16)


# ---------------------------------------------------------------------------
# Pure-JAX reference (same synthetic weights) for a correctness check.
# ---------------------------------------------------------------------------
def _reference_forward(x, fc_w, fc_b, w1, b1, w2, b2, ngf):
    hp = jax.lax.Precision.HIGHEST
    h = jnp.maximum(jnp.dot(x, fc_w, precision=hp) + fc_b, 0.0)
    h = h.reshape(-1, ngf, 4, 4).transpose(0, 2, 3, 1)           # NHWC

    def up_block(h, w, b):
        h = jnp.repeat(jnp.repeat(h, 2, axis=1), 2, axis=2)
        h = jnp.pad(h, ((0, 0), (1, 1), (1, 1), (0, 0)))
        H, W = h.shape[1] - 2, h.shape[2] - 2
        acc = 0.0
        for dy in range(3):
            for dx in range(3):
                acc = acc + jnp.einsum(
                    "bhwc,co->bhwo", h[:, dy:dy + H, dx:dx + W, :], w[dy, dx],
                    precision=hp)
        return jnp.maximum(acc + b, 0.0)

    h = up_block(h, w1, b1)
    h = up_block(h, w2, b2)
    return h.transpose(0, 3, 1, 2)                               # NCHW


if __name__ == "__main__":
    arguments = {"ngf": 32, "up_sample_input_dim": 32}
    net = UpsampleNetworkPallas(arguments, noise_dim=16, seed=0)

    key = jax.random.PRNGKey(0)
    k_emb, k_noise = jax.random.split(key)
    sentence_embedding = jax.random.normal(
        k_emb, (2, arguments["up_sample_input_dim"]), jnp.float32)
    noise = jax.random.normal(k_noise, (2, 16), jnp.float32)

    out = net(sentence_embedding, noise)
    out = jax.block_until_ready(out)
    assert out.shape == (2, arguments["ngf"] // 4, 16, 16), out.shape
    assert bool(jnp.all(jnp.isfinite(out)))

    x = jnp.concatenate([sentence_embedding, noise], axis=1)
    ref = _reference_forward(x, net.fc_w, net.fc_b, net.w1, net.b1,
                             net.w2, net.b2, arguments["ngf"])
    assert bool(jnp.allclose(out, ref, rtol=5e-2, atol=5e-3)), \
        float(jnp.max(jnp.abs(out - ref)))

    print("KERNEL_OK")
</pallas_src>

<mosaic_0001>
module attributes {stable_mosaic.version = 11 : i64} {
  func.func @_upsample_net_kernel(%arg0: i32, %arg1: memref<48x2xf32, #tpu.memory_space<vmem>>, %arg2: memref<512x48xf32, #tpu.memory_space<vmem>>, %arg3: memref<512x1xf32, #tpu.memory_space<vmem>>, %arg4: memref<9x16x64xf32, #tpu.memory_space<vmem>>, %arg5: memref<16x288xf32, #tpu.memory_space<vmem>>, %arg6: memref<16x1xf32, #tpu.memory_space<vmem>>, %arg7: memref<9x64x256xf32, #tpu.memory_space<vmem>>, %arg8: memref<8x144xf32, #tpu.memory_space<vmem>>, %arg9: memref<8x1xf32, #tpu.memory_space<vmem>>, %arg10: memref<2x8x256xf32, #tpu.memory_space<vmem>>) attributes {dimension_semantics = [#tpu.dimension_semantics<arbitrary>], iteration_bounds = array<i64: 1>, scalar_prefetch = 0 : i64, scratch_operands = 0 : i64, tpu.core_type = #tpu.core_type<tc>, window_params = [{pipeline_mode = #tpu.pipeline_mode<synchronous>, transform_indices = @transform_0, window_bounds = array<i64: 48, 2>}, {pipeline_mode = #tpu.pipeline_mode<synchronous>, transform_indices = @transform_1, window_bounds = array<i64: 512, 48>}, {pipeline_mode = #tpu.pipeline_mode<synchronous>, transform_indices = @transform_2, window_bounds = array<i64: 512, 1>}, {pipeline_mode = #tpu.pipeline_mode<synchronous>, transform_indices = @transform_3, window_bounds = array<i64: 9, 16, 64>}, {pipeline_mode = #tpu.pipeline_mode<synchronous>, transform_indices = @transform_4, window_bounds = array<i64: 16, 288>}, {pipeline_mode = #tpu.pipeline_mode<synchronous>, transform_indices = @transform_5, window_bounds = array<i64: 16, 1>}, {pipeline_mode = #tpu.pipeline_mode<synchronous>, transform_indices = @transform_6, window_bounds = array<i64: 9, 64, 256>}, {pipeline_mode = #tpu.pipeline_mode<synchronous>, transform_indices = @transform_7, window_bounds = array<i64: 8, 144>}, {pipeline_mode = #tpu.pipeline_mode<synchronous>, transform_indices = @transform_8, window_bounds = array<i64: 8, 1>}, {pipeline_mode = #tpu.pipeline_mode<synchronous>, transform_indices = @transform_9, window_bounds = array<i64: 2, 8, 256>}]} {
    %c0 = arith.constant 0 : index
    %c0_0 = arith.constant 0 : index
    %0 = vector.load %arg2[%c0, %c0_0] : memref<512x48xf32, #tpu.memory_space<vmem>>, vector<512x48xf32>
    %c0_1 = arith.constant 0 : index
    %c0_2 = arith.constant 0 : index
    %1 = vector.load %arg1[%c0_1, %c0_2] : memref<48x2xf32, #tpu.memory_space<vmem>>, vector<48x2xf32>
    %cst = arith.constant dense<0.000000e+00> : vector<512x2xf32>
    %2 = tpu.matmul %0, %1, %cst {dimension_numbers = #tpu.dot_dimension_numbers<[1], [0], [0], [1], [0, 0, 1, 1], [], []>} : vector<512x48xf32>, vector<48x2xf32>, vector<512x2xf32> -> vector<512x2xf32>
    %c0_3 = arith.constant 0 : index
    %c0_4 = arith.constant 0 : index
    %3 = vector.load %arg3[%c0_3, %c0_4] : memref<512x1xf32, #tpu.memory_space<vmem>>, vector<512x1xf32>
    %4 = vector.broadcast %3 : vector<512x1xf32> to vector<512x2xf32>
    %5 = arith.addf %2, %4 : vector<512x2xf32>
    %cst_5 = arith.constant 0.000000e+00 : f32
    %6 = vector.broadcast %cst_5 : f32 to vector<512x2xf32>
    %7 = arith.maximumf %5, %6 : vector<512x2xf32>
    %8 = tpu.iota {dimensions = array<i32: 1>} : vector<32x16xi32>
    %cst_6 = arith.constant 0.000000e+00 : f32
    %9 = vector.broadcast %cst_6 : f32 to vector<32x16xf32>
    %c0_i32 = arith.constant 0 : i32
    %10 = vector.broadcast %c0_i32 : i32 to vector<32x16xi32>
    %11 = arith.cmpi eq, %8, %10 : vector<32x16xi32>
    %12 = arith.extui %11 : vector<32x16xi1> to vector<32x16xi32>
    %13 = arith.sitofp %12 : vector<32x16xi32> to vector<32x16xf32>
    %14 = vector.extract_strided_slice %7 {offsets = [0, 0], sizes = [32, 1], strides = [1, 1]} : vector<512x2xf32> to vector<32x1xf32>
    %15 = vector.broadcast %14 : vector<32x1xf32> to vector<32x16xf32>
    %16 = arith.mulf %13, %15 : vector<32x16xf32>
    %17 = arith.addf %9, %16 : vector<32x16xf32>
    %c1_i32 = arith.constant 1 : i32
    %18 = vector.broadcast %c1_i32 : i32 to vector<32x16xi32>
    %19 = arith.cmpi eq, %8, %18 : vector<32x16xi32>
    %20 = arith.extui %19 : vector<32x16xi1> to vector<32x16xi32>
    %21 = arith.sitofp %20 : vector<32x16xi32> to vector<32x16xf32>
    %22 = vector.extract_strided_slice %7 {offsets = [32, 0], sizes = [32, 1], strides = [1, 1]} : vector<512x2xf32> to vector<32x1xf32>
    %23 = vector.broadcast %22 : vector<32x1xf32> to vector<32x16xf32>
    %24 = arith.mulf %21, %23 : vector<32x16xf32>
    %25 = arith.addf %17, %24 : vector<32x16xf32>
    %c2_i32 = arith.constant 2 : i32
    %26 = vector.broadcast %c2_i32 : i32 to vector<32x16xi32>
    %27 = arith.cmpi eq, %8, %26 : vector<32x16xi32>
    %28 = arith.extui %27 : vector<32x16xi1> to vector<32x16xi32>
    %29 = arith.sitofp %28 : vector<32x16xi32> to vector<32x16xf32>
    %30 = vector.extract_strided_slice %7 {offsets = [64, 0], sizes = [32, 1], strides = [1, 1]} : vector<512x2xf32> to vector<32x1xf32>
    %31 = vector.broadcast %30 : vector<32x1xf32> to vector<32x16xf32>
    %32 = arith.mulf %29, %31 : vector<32x16xf32>
    %33 = arith.addf %25, %32 : vector<32x16xf32>
    %c3_i32 = arith.constant 3 : i32
    %34 = vector.broadcast %c3_i32 : i32 to vector<32x16xi32>
    %35 = arith.cmpi eq, %8, %34 : vector<32x16xi32>
    %36 = arith.extui %35 : vector<32x16xi1> to vector<32x16xi32>
    %37 = arith.sitofp %36 : vector<32x16xi32> to vector<32x16xf32>
    %38 = vector.extract_strided_slice %7 {offsets = [96, 0], sizes = [32, 1], strides = [1, 1]} : vector<512x2xf32> to vector<32x1xf32>
    %39 = vector.broadcast %38 : vector<32x1xf32> to vector<32x16xf32>
    %40 = arith.mulf %37, %39 : vector<32x16xf32>
    %41 = arith.addf %33, %40 : vector<32x16xf32>
    %c4_i32 = arith.constant 4 : i32
    %42 = vector.broadcast %c4_i32 : i32 to vector<32x16xi32>
    %43 = arith.cmpi eq, %8, %42 : vector<32x16xi32>
    %44 = arith.extui %43 : vector<32x16xi1> to vector<32x16xi32>
    %45 = arith.sitofp %44 : vector<32x16xi32> to vector<32x16xf32>
    %46 = vector.extract_strided_slice %7 {offsets = [128, 0], sizes = [32, 1], strides = [1, 1]} : vector<512x2xf32> to vector<32x1xf32>
    %47 = vector.broadcast %46 : vector<32x1xf32> to vector<32x16xf32>
    %48 = arith.mulf %45, %47 : vector<32x16xf32>
    %49 = arith.addf %41, %48 : vector<32x16xf32>
    %c5_i32 = arith.constant 5 : i32
    %50 = vector.broadcast %c5_i32 : i32 to vector<32x16xi32>
    %51 = arith.cmpi eq, %8, %50 : vector<32x16xi32>
    %52 = arith.extui %51 : vector<32x16xi1> to vector<32x16xi32>
    %53 = arith.sitofp %52 : vector<32x16xi32> to vector<32x16xf32>
    %54 = vector.extract_strided_slice %7 {offsets = [160, 0], sizes = [32, 1], strides = [1, 1]} : vector<512x2xf32> to vector<32x1xf32>
    %55 = vector.broadcast %54 : vector<32x1xf32> to vector<32x16xf32>
    %56 = arith.mulf %53, %55 : vector<32x16xf32>
    %57 = arith.addf %49, %56 : vector<32x16xf32>
    %c6_i32 = arith.constant 6 : i32
    %58 = vector.broadcast %c6_i32 : i32 to vector<32x16xi32>
    %59 = arith.cmpi eq, %8, %58 : vector<32x16xi32>
    %60 = arith.extui %59 : vector<32x16xi1> to vector<32x16xi32>
    %61 = arith.sitofp %60 : vector<32x16xi32> to vector<32x16xf32>
    %62 = vector.extract_strided_slice %7 {offsets = [192, 0], sizes = [32, 1], strides = [1, 1]} : vector<512x2xf32> to vector<32x1xf32>
    %63 = vector.broadcast %62 : vector<32x1xf32> to vector<32x16xf32>
    %64 = arith.mulf %61, %63 : vector<32x16xf32>
    %65 = arith.addf %57, %64 : vector<32x16xf32>
    %c7_i32 = arith.constant 7 : i32
    %66 = vector.broadcast %c7_i32 : i32 to vector<32x16xi32>
    %67 = arith.cmpi eq, %8, %66 : vector<32x16xi32>
    %68 = arith.extui %67 : vector<32x16xi1> to vector<32x16xi32>
    %69 = arith.sitofp %68 : vector<32x16xi32> to vector<32x16xf32>
    %70 = vector.extract_strided_slice %7 {offsets = [224, 0], sizes = [32, 1], strides = [1, 1]} : vector<512x2xf32> to vector<32x1xf32>
    %71 = vector.broadcast %70 : vector<32x1xf32> to vector<32x16xf32>
    %72 = arith.mulf %69, %71 : vector<32x16xf32>
    %73 = arith.addf %65, %72 : vector<32x16xf32>
    %c8_i32 = arith.constant 8 : i32
    %74 = vector.broadcast %c8_i32 : i32 to vector<32x16xi32>
    %75 = arith.cmpi eq, %8, %74 : vector<32x16xi32>
    %76 = arith.extui %75 : vector<32x16xi1> to vector<32x16xi32>
    %77 = arith.sitofp %76 : vector<32x16xi32> to vector<32x16xf32>
    %78 = vector.extract_strided_slice %7 {offsets = [256, 0], sizes = [32, 1], strides = [1, 1]} : vector<512x2xf32> to vector<32x1xf32>
    %79 = vector.broadcast %78 : vector<32x1xf32> to vector<32x16xf32>
    %80 = arith.mulf %77, %79 : vector<32x16xf32>
    %81 = arith.addf %73, %80 : vector<32x16xf32>
    %c9_i32 = arith.constant 9 : i32
    %82 = vector.broadcast %c9_i32 : i32 to vector<32x16xi32>
    %83 = arith.cmpi eq, %8, %82 : vector<32x16xi32>
    %84 = arith.extui %83 : vector<32x16xi1> to vector<32x16xi32>
    %85 = arith.sitofp %84 : vector<32x16xi32> to vector<32x16xf32>
    %86 = vector.extract_strided_slice %7 {offsets = [288, 0], sizes = [32, 1], strides = [1, 1]} : vector<512x2xf32> to vector<32x1xf32>
    %87 = vector.broadcast %86 : vector<32x1xf32> to vector<32x16xf32>
    %88 = arith.mulf %85, %87 : vector<32x16xf32>
    %89 = arith.addf %81, %88 : vector<32x16xf32>
    %c10_i32 = arith.constant 10 : i32
    %90 = vector.broadcast %c10_i32 : i32 to vector<32x16xi32>
    %91 = arith.cmpi eq, %8, %90 : vector<32x16xi32>
    %92 = arith.extui %91 : vector<32x16xi1> to vector<32x16xi32>
    %93 = arith.sitofp %92 : vector<32x16xi32> to vector<32x16xf32>
    %94 = vector.extract_strided_slice %7 {offsets = [320, 0], sizes = [32, 1], strides = [1, 1]} : vector<512x2xf32> to vector<32x1xf32>
    %95 = vector.broadcast %94 : vector<32x1xf32> to vector<32x16xf32>
    %96 = arith.mulf %93, %95 : vector<32x16xf32>
    %97 = arith.addf %89, %96 : vector<32x16xf32>
    %c11_i32 = arith.constant 11 : i32
    %98 = vector.broadcast %c11_i32 : i32 to vector<32x16xi32>
    %99 = arith.cmpi eq, %8, %98 : vector<32x16xi32>
    %100 = arith.extui %99 : vector<32x16xi1> to vector<32x16xi32>
    %101 = arith.sitofp %100 : vector<32x16xi32> to vector<32x16xf32>
    %102 = vector.extract_strided_slice %7 {offsets = [352, 0], sizes = [32, 1], strides = [1, 1]} : vector<512x2xf32> to vector<32x1xf32>
    %103 = vector.broadcast %102 : vector<32x1xf32> to vector<32x16xf32>
    %104 = arith.mulf %101, %103 : vector<32x16xf32>
    %105 = arith.addf %97, %104 : vector<32x16xf32>
    %c12_i32 = arith.constant 12 : i32
    %106 = vector.broadcast %c12_i32 : i32 to vector<32x16xi32>
    %107 = arith.cmpi eq, %8, %106 : vector<32x16xi32>
    %108 = arith.extui %107 : vector<32x16xi1> to vector<32x16xi32>
    %109 = arith.sitofp %108 : vector<32x16xi32> to vector<32x16xf32>
    %110 = vector.extract_strided_slice %7 {offsets = [384, 0], sizes = [32, 1], strides = [1, 1]} : vector<512x2xf32> to vector<32x1xf32>
    %111 = vector.broadcast %110 : vector<32x1xf32> to vector<32x16xf32>
    %112 = arith.mulf %109, %111 : vector<32x16xf32>
    %113 = arith.addf %105, %112 : vector<32x16xf32>
    %c13_i32 = arith.constant 13 : i32
    %114 = vector.broadcast %c13_i32 : i32 to vector<32x16xi32>
    %115 = arith.cmpi eq, %8, %114 : vector<32x16xi32>
    %116 = arith.extui %115 : vector<32x16xi1> to vector<32x16xi32>
    %117 = arith.sitofp %116 : vector<32x16xi32> to vector<32x16xf32>
    %118 = vector.extract_strided_slice %7 {offsets = [416, 0], sizes = [32, 1], strides = [1, 1]} : vector<512x2xf32> to vector<32x1xf32>
    %119 = vector.broadcast %118 : vector<32x1xf32> to vector<32x16xf32>
    %120 = arith.mulf %117, %119 : vector<32x16xf32>
    %121 = arith.addf %113, %120 : vector<32x16xf32>
    %c14_i32 = arith.constant 14 : i32
    %122 = vector.broadcast %c14_i32 : i32 to vector<32x16xi32>
    %123 = arith.cmpi eq, %8, %122 : vector<32x16xi32>
    %124 = arith.extui %123 : vector<32x16xi1> to vector<32x16xi32>
    %125 = arith.sitofp %124 : vector<32x16xi32> to vector<32x16xf32>
    %126 = vector.extract_strided_slice %7 {offsets = [448, 0], sizes = [32, 1], strides = [1, 1]} : vector<512x2xf32> to vector<32x1xf32>
    %127 = vector.broadcast %126 : vector<32x1xf32> to vector<32x16xf32>
    %128 = arith.mulf %125, %127 : vector<32x16xf32>
    %129 = arith.addf %121, %128 : vector<32x16xf32>
    %c15_i32 = arith.constant 15 : i32
    %130 = vector.broadcast %c15_i32 : i32 to vector<32x16xi32>
    %131 = arith.cmpi eq, %8, %130 : vector<32x16xi32>
    %132 = arith.extui %131 : vector<32x16xi1> to vector<32x16xi32>
    %133 = arith.sitofp %132 : vector<32x16xi32> to vector<32x16xf32>
    %134 = vector.extract_strided_slice %7 {offsets = [480, 0], sizes = [32, 1], strides = [1, 1]} : vector<512x2xf32> to vector<32x1xf32>
    %135 = vector.broadcast %134 : vector<32x1xf32> to vector<32x16xf32>
    %136 = arith.mulf %133, %135 : vector<32x16xf32>
    %137 = arith.addf %129, %136 : vector<32x16xf32>
    %c0_7 = arith.constant 0 : index
    %c0_8 = arith.constant 0 : index
    %c0_9 = arith.constant 0 : index
    %138 = vector.load %arg4[%c0_7, %c0_8, %c0_9] : memref<9x16x64xf32, #tpu.memory_space<vmem>>, vector<1x16x64xf32>
    %139 = vector.shape_cast %138 : vector<1x16x64xf32> to vector<16x64xf32>
    %cst_10 = arith.constant dense<0.000000e+00> : vector<32x64xf32>
    %140 = tpu.matmul %137, %139, %cst_10 {dimension_numbers = #tpu.dot_dimension_numbers<[1], [0], [0], [1], [0, 0, 1, 1], [], []>} : vector<32x16xf32>, vector<16x64xf32>, vector<32x64xf32> -> vector<32x64xf32>
    %c1 = arith.constant 1 : index
    %c0_11 = arith.constant 0 : index
    %c0_12 = arith.constant 0 : index
    %141 = vector.load %arg4[%c1, %c0_11, %c0_12] : memref<9x16x64xf32, #tpu.memory_space<vmem>>, vector<1x16x64xf32>
    %142 = vector.shape_cast %141 : vector<1x16x64xf32> to vector<16x64xf32>
    %cst_13 = arith.constant dense<0.000000e+00> : vector<32x64xf32>
    %143 = tpu.matmul %137, %142, %cst_13 {dimension_numbers = #tpu.dot_dimension_numbers<[1], [0], [0], [1], [0, 0, 1, 1], [], []>} : vector<32x16xf32>, vector<16x64xf32>, vector<32x64xf32> -> vector<32x64xf32>
    %c2 = arith.constant 2 : index
    %c0_14 = arith.constant 0 : index
    %c0_15 = arith.constant 0 : index
    %144 = vector.load %arg4[%c2, %c0_14, %c0_15] : memref<9x16x64xf32, #tpu.memory_space<vmem>>, vector<1x16x64xf32>
    %145 = vector.shape_cast %144 : vector<1x16x64xf32> to vector<16x64xf32>
    %cst_16 = arith.constant dense<0.000000e+00> : vector<32x64xf32>
    %146 = tpu.matmul %137, %145, %cst_16 {dimension_numbers = #tpu.dot_dimension_numbers<[1], [0], [0], [1], [0, 0, 1, 1], [], []>} : vector<32x16xf32>, vector<16x64xf32>, vector<32x64xf32> -> vector<32x64xf32>
    %c3 = arith.constant 3 : index
    %c0_17 = arith.constant 0 : index
    %c0_18 = arith.constant 0 : index
    %147 = vector.load %arg4[%c3, %c0_17, %c0_18] : memref<9x16x64xf32, #tpu.memory_space<vmem>>, vector<1x16x64xf32>
    %148 = vector.shape_cast %147 : vector<1x16x64xf32> to vector<16x64xf32>
    %cst_19 = arith.constant dense<0.000000e+00> : vector<32x64xf32>
    %149 = tpu.matmul %137, %148, %cst_19 {dimension_numbers = #tpu.dot_dimension_numbers<[1], [0], [0], [1], [0, 0, 1, 1], [], []>} : vector<32x16xf32>, vector<16x64xf32>, vector<32x64xf32> -> vector<32x64xf32>
    %c4 = arith.constant 4 : index
    %c0_20 = arith.constant 0 : index
    %c0_21 = arith.constant 0 : index
    %150 = vector.load %arg4[%c4, %c0_20, %c0_21] : memref<9x16x64xf32, #tpu.memory_space<vmem>>, vector<1x16x64xf32>
    %151 = vector.shape_cast %150 : vector<1x16x64xf32> to vector<16x64xf32>
    %cst_22 = arith.constant dense<0.000000e+00> : vector<32x64xf32>
    %152 = tpu.matmul %137, %151, %cst_22 {dimension_numbers = #tpu.dot_dimension_numbers<[1], [0], [0], [1], [0, 0, 1, 1], [], []>} : vector<32x16xf32>, vector<16x64xf32>, vector<32x64xf32> -> vector<32x64xf32>
    %c5 = arith.constant 5 : index
    %c0_23 = arith.constant 0 : index
    %c0_24 = arith.constant 0 : index
    %153 = vector.load %arg4[%c5, %c0_23, %c0_24] : memref<9x16x64xf32, #tpu.memory_space<vmem>>, vector<1x16x64xf32>
    %154 = vector.shape_cast %153 : vector<1x16x64xf32> to vector<16x64xf32>
    %cst_25 = arith.constant dense<0.000000e+00> : vector<32x64xf32>
    %155 = tpu.matmul %137, %154, %cst_25 {dimension_numbers = #tpu.dot_dimension_numbers<[1], [0], [0], [1], [0, 0, 1, 1], [], []>} : vector<32x16xf32>, vector<16x64xf32>, vector<32x64xf32> -> vector<32x64xf32>
    %c6 = arith.constant 6 : index
    %c0_26 = arith.constant 0 : index
    %c0_27 = arith.constant 0 : index
    %156 = vector.load %arg4[%c6, %c0_26, %c0_27] : memref<9x16x64xf32, #tpu.memory_space<vmem>>, vector<1x16x64xf32>
    %157 = vector.shape_cast %156 : vector<1x16x64xf32> to vector<16x64xf32>
    %cst_28 = arith.constant dense<0.000000e+00> : vector<32x64xf32>
    %158 = tpu.matmul %137, %157, %cst_28 {dimension_numbers = #tpu.dot_dimension_numbers<[1], [0], [0], [1], [0, 0, 1, 1], [], []>} : vector<32x16xf32>, vector<16x64xf32>, vector<32x64xf32> -> vector<32x64xf32>
    %c7 = arith.constant 7 : index
    %c0_29 = arith.constant 0 : index
    %c0_30 = arith.constant 0 : index
    %159 = vector.load %arg4[%c7, %c0_29, %c0_30] : memref<9x16x64xf32, #tpu.memory_space<vmem>>, vector<1x16x64xf32>
    %160 = vector.shape_cast %159 : vector<1x16x64xf32> to vector<16x64xf32>
    %cst_31 = arith.constant dense<0.000000e+00> : vector<32x64xf32>
    %161 = tpu.matmul %137, %160, %cst_31 {dimension_numbers = #tpu.dot_dimension_numbers<[1], [0], [0], [1], [0, 0, 1, 1], [], []>} : vector<32x16xf32>, vector<16x64xf32>, vector<32x64xf32> -> vector<32x64xf32>
    %c8 = arith.constant 8 : index
    %c0_32 = arith.constant 0 : index
    %c0_33 = arith.constant 0 : index
    %162 = vector.load %arg4[%c8, %c0_32, %c0_33] : memref<9x16x64xf32, #tpu.memory_space<vmem>>, vector<1x16x64xf32>
    %163 = vector.shape_cast %162 : vector<1x16x64xf32> to vector<16x64xf32>
    %cst_34 = arith.constant dense<0.000000e+00> : vector<32x64xf32>
    %164 = tpu.matmul %137, %163, %cst_34 {dimension_numbers = #tpu.dot_dimension_numbers<[1], [0], [0], [1], [0, 0, 1, 1], [], []>} : vector<32x16xf32>, vector<16x64xf32>, vector<32x64xf32> -> vector<32x64xf32>
    %165 = tpu.concatenate %140, %143, %146, %149, %152, %155, %158, %161, %164 in 0 : vector<32x64xf32>, vector<32x64xf32>, vector<32x64xf32>, vector<32x64xf32>, vector<32x64xf32>, vector<32x64xf32>, vector<32x64xf32>, vector<32x64xf32>, vector<32x64xf32> -> vector<288x64xf32>
    %c0_35 = arith.constant 0 : index
    %c0_36 = arith.constant 0 : index
    %166 = vector.load %arg5[%c0_35, %c0_36] : memref<16x288xf32, #tpu.memory_space<vmem>>, vector<16x288xf32>
    %cst_37 = arith.constant dense<0.000000e+00> : vector<16x64xf32>
    %167 = tpu.matmul %166, %165, %cst_37 {dimension_numbers = #tpu.dot_dimension_numbers<[1], [0], [0], [1], [0, 0, 1, 1], [], []>} : vector<16x288xf32>, vector<288x64xf32>, vector<16x64xf32> -> vector<16x64xf32>
    %c0_38 = arith.constant 0 : index
    %c0_39 = arith.constant 0 : index
    %168 = vector.load %arg6[%c0_38, %c0_39] : memref<16x1xf32, #tpu.memory_space<vmem>>, vector<16x1xf32>
    %169 = vector.broadcast %168 : vector<16x1xf32> to vector<16x64xf32>
    %170 = arith.addf %167, %169 : vector<16x64xf32>
    %cst_40 = arith.constant 0.000000e+00 : f32
    %171 = vector.broadcast %cst_40 : f32 to vector<16x64xf32>
    %172 = arith.maximumf %170, %171 : vector<16x64xf32>
    %c0_41 = arith.constant 0 : index
    %c0_42 = arith.constant 0 : index
    %c0_43 = arith.constant 0 : index
    %173 = vector.load %arg7[%c0_41, %c0_42, %c0_43] : memref<9x64x256xf32, #tpu.memory_space<vmem>>, vector<1x64x256xf32>
    %174 = vector.shape_cast %173 : vector<1x64x256xf32> to vector<64x256xf32>
    %cst_44 = arith.constant dense<0.000000e+00> : vector<16x256xf32>
    %175 = tpu.matmul %172, %174, %cst_44 {dimension_numbers = #tpu.dot_dimension_numbers<[1], [0], [0], [1], [0, 0, 1, 1], [], []>} : vector<16x64xf32>, vector<64x256xf32>, vector<16x256xf32> -> vector<16x256xf32>
    %c1_45 = arith.constant 1 : index
    %c0_46 = arith.constant 0 : index
    %c0_47 = arith.constant 0 : index
    %176 = vector.load %arg7[%c1_45, %c0_46, %c0_47] : memref<9x64x256xf32, #tpu.memory_space<vmem>>, vector<1x64x256xf32>
    %177 = vector.shape_cast %176 : vector<1x64x256xf32> to vector<64x256xf32>
    %cst_48 = arith.constant dense<0.000000e+00> : vector<16x256xf32>
    %178 = tpu.matmul %172, %177, %cst_48 {dimension_numbers = #tpu.dot_dimension_numbers<[1], [0], [0], [1], [0, 0, 1, 1], [], []>} : vector<16x64xf32>, vector<64x256xf32>, vector<16x256xf32> -> vector<16x256xf32>
    %c2_49 = arith.constant 2 : index
    %c0_50 = arith.constant 0 : index
    %c0_51 = arith.constant 0 : index
    %179 = vector.load %arg7[%c2_49, %c0_50, %c0_51] : memref<9x64x256xf32, #tpu.memory_space<vmem>>, vector<1x64x256xf32>
    %180 = vector.shape_cast %179 : vector<1x64x256xf32> to vector<64x256xf32>
    %cst_52 = arith.constant dense<0.000000e+00> : vector<16x256xf32>
    %181 = tpu.matmul %172, %180, %cst_52 {dimension_numbers = #tpu.dot_dimension_numbers<[1], [0], [0], [1], [0, 0, 1, 1], [], []>} : vector<16x64xf32>, vector<64x256xf32>, vector<16x256xf32> -> vector<16x256xf32>
    %c3_53 = arith.constant 3 : index
    %c0_54 = arith.constant 0 : index
    %c0_55 = arith.constant 0 : index
    %182 = vector.load %arg7[%c3_53, %c0_54, %c0_55] : memref<9x64x256xf32, #tpu.memory_space<vmem>>, vector<1x64x256xf32>
    %183 = vector.shape_cast %182 : vector<1x64x256xf32> to vector<64x256xf32>
    %cst_56 = arith.constant dense<0.000000e+00> : vector<16x256xf32>
    %184 = tpu.matmul %172, %183, %cst_56 {dimension_numbers = #tpu.dot_dimension_numbers<[1], [0], [0], [1], [0, 0, 1, 1], [], []>} : vector<16x64xf32>, vector<64x256xf32>, vector<16x256xf32> -> vector<16x256xf32>
    %c4_57 = arith.constant 4 : index
    %c0_58 = arith.constant 0 : index
    %c0_59 = arith.constant 0 : index
    %185 = vector.load %arg7[%c4_57, %c0_58, %c0_59] : memref<9x64x256xf32, #tpu.memory_space<vmem>>, vector<1x64x256xf32>
    %186 = vector.shape_cast %185 : vector<1x64x256xf32> to vector<64x256xf32>
    %cst_60 = arith.constant dense<0.000000e+00> : vector<16x256xf32>
    %187 = tpu.matmul %172, %186, %cst_60 {dimension_numbers = #tpu.dot_dimension_numbers<[1], [0], [0], [1], [0, 0, 1, 1], [], []>} : vector<16x64xf32>, vector<64x256xf32>, vector<16x256xf32> -> vector<16x256xf32>
    %c5_61 = arith.constant 5 : index
    %c0_62 = arith.constant 0 : index
    %c0_63 = arith.constant 0 : index
    %188 = vector.load %arg7[%c5_61, %c0_62, %c0_63] : memref<9x64x256xf32, #tpu.memory_space<vmem>>, vector<1x64x256xf32>
    %189 = vector.shape_cast %188 : vector<1x64x256xf32> to vector<64x256xf32>
    %cst_64 = arith.constant dense<0.000000e+00> : vector<16x256xf32>
    %190 = tpu.matmul %172, %189, %cst_64 {dimension_numbers = #tpu.dot_dimension_numbers<[1], [0], [0], [1], [0, 0, 1, 1], [], []>} : vector<16x64xf32>, vector<64x256xf32>, vector<16x256xf32> -> vector<16x256xf32>
    %c6_65 = arith.constant 6 : index
    %c0_66 = arith.constant 0 : index
    %c0_67 = arith.constant 0 : index
    %191 = vector.load %arg7[%c6_65, %c0_66, %c0_67] : memref<9x64x256xf32, #tpu.memory_space<vmem>>, vector<1x64x256xf32>
    %192 = vector.shape_cast %191 : vector<1x64x256xf32> to vector<64x256xf32>
    %cst_68 = arith.constant dense<0.000000e+00> : vector<16x256xf32>
    %193 = tpu.matmul %172, %192, %cst_68 {dimension_numbers = #tpu.dot_dimension_numbers<[1], [0], [0], [1], [0, 0, 1, 1], [], []>} : vector<16x64xf32>, vector<64x256xf32>, vector<16x256xf32> -> vector<16x256xf32>
    %c7_69 = arith.constant 7 : index
    %c0_70 = arith.constant 0 : index
    %c0_71 = arith.constant 0 : index
    %194 = vector.load %arg7[%c7_69, %c0_70, %c0_71] : memref<9x64x256xf32, #tpu.memory_space<vmem>>, vector<1x64x256xf32>
    %195 = vector.shape_cast %194 : vector<1x64x256xf32> to vector<64x256xf32>
    %cst_72 = arith.constant dense<0.000000e+00> : vector<16x256xf32>
    %196 = tpu.matmul %172, %195, %cst_72 {dimension_numbers = #tpu.dot_dimension_numbers<[1], [0], [0], [1], [0, 0, 1, 1], [], []>} : vector<16x64xf32>, vector<64x256xf32>, vector<16x256xf32> -> vector<16x256xf32>
    %c8_73 = arith.constant 8 : index
    %c0_74 = arith.constant 0 : index
    %c0_75 = arith.constant 0 : index
    %197 = vector.load %arg7[%c8_73, %c0_74, %c0_75] : memref<9x64x256xf32, #tpu.memory_space<vmem>>, vector<1x64x256xf32>
    %198 = vector.shape_cast %197 : vector<1x64x256xf32> to vector<64x256xf32>
    %cst_76 = arith.constant dense<0.000000e+00> : vector<16x256xf32>
    %199 = tpu.matmul %172, %198, %cst_76 {dimension_numbers = #tpu.dot_dimension_numbers<[1], [0], [0], [1], [0, 0, 1, 1], [], []>} : vector<16x64xf32>, vector<64x256xf32>, vector<16x256xf32> -> vector<16x256xf32>
    %200 = tpu.concatenate %175, %178, %181, %184, %187, %190, %193, %196, %199 in 0 : vector<16x256xf32>, vector<16x256xf32>, vector<16x256xf32>, vector<16x256xf32>, vector<16x256xf32>, vector<16x256xf32>, vector<16x256xf32>, vector<16x256xf32>, vector<16x256xf32> -> vector<144x256xf32>
    %c0_77 = arith.constant 0 : index
    %c0_78 = arith.constant 0 : index
    %201 = vector.load %arg8[%c0_77, %c0_78] : memref<8x144xf32, #tpu.memory_space<vmem>>, vector<8x144xf32>
    %cst_79 = arith.constant dense<0.000000e+00> : vector<8x256xf32>
    %202 = tpu.matmul %201, %200, %cst_79 {dimension_numbers = #tpu.dot_dimension_numbers<[1], [0], [0], [1], [0, 0, 1, 1], [], []>} : vector<8x144xf32>, vector<144x256xf32>, vector<8x256xf32> -> vector<8x256xf32>
    %c0_80 = arith.constant 0 : index
    %c0_81 = arith.constant 0 : index
    %203 = vector.load %arg9[%c0_80, %c0_81] : memref<8x1xf32, #tpu.memory_space<vmem>>, vector<8x1xf32>
    %204 = vector.broadcast %203 : vector<8x1xf32> to vector<8x256xf32>
    %205 = arith.addf %202, %204 : vector<8x256xf32>
    %cst_82 = arith.constant 0.000000e+00 : f32
    %206 = vector.broadcast %cst_82 : f32 to vector<8x256xf32>
    %207 = arith.maximumf %205, %206 : vector<8x256xf32>
    %c0_83 = arith.constant 0 : index
    %c0_84 = arith.constant 0 : index
    %c0_85 = arith.constant 0 : index
    %208 = vector.load %arg10[%c0_83, %c0_84, %c0_85] : memref<2x8x256xf32, #tpu.memory_space<vmem>>, vector<1x8x256xf32>
    %209 = vector.shape_cast %208 : vector<1x8x256xf32> to vector<8x256xf32>
    %210 = vector.shape_cast %207 : vector<8x256xf32> to vector<1x8x256xf32>
    tpu.vector_store %arg10[%c0_83, %c0_84, %c0_85], %210 {strides = array<i32>} : memref<2x8x256xf32, #tpu.memory_space<vmem>>, vector<1x8x256xf32>,
    %cst_86 = arith.constant 0.000000e+00 : f32
    %211 = vector.broadcast %cst_86 : f32 to vector<32x16xf32>
    %c0_i32_87 = arith.constant 0 : i32
    %212 = vector.broadcast %c0_i32_87 : i32 to vector<32x16xi32>
    %213 = arith.cmpi eq, %8, %212 : vector<32x16xi32>
    %214 = arith.extui %213 : vector<32x16xi1> to vector<32x16xi32>
    %215 = arith.sitofp %214 : vector<32x16xi32> to vector<32x16xf32>
    %216 = vector.extract_strided_slice %7 {offsets = [0, 1], sizes = [32, 1], strides = [1, 1]} : vector<512x2xf32> to vector<32x1xf32>
    %217 = vector.broadcast %216 : vector<32x1xf32> to vector<32x16xf32>
    %218 = arith.mulf %215, %217 : vector<32x16xf32>
    %219 = arith.addf %211, %218 : vector<32x16xf32>
    %c1_i32_88 = arith.constant 1 : i32
    %220 = vector.broadcast %c1_i32_88 : i32 to vector<32x16xi32>
    %221 = arith.cmpi eq, %8, %220 : vector<32x16xi32>
    %222 = arith.extui %221 : vector<32x16xi1> to vector<32x16xi32>
    %223 = arith.sitofp %222 : vector<32x16xi32> to vector<32x16xf32>
    %224 = vector.extract_strided_slice %7 {offsets = [32, 1], sizes = [32, 1], strides = [1, 1]} : vector<512x2xf32> to vector<32x1xf32>
    %225 = vector.broadcast %224 : vector<32x1xf32> to vector<32x16xf32>
    %226 = arith.mulf %223, %225 : vector<32x16xf32>
    %227 = arith.addf %219, %226 : vector<32x16xf32>
    %c2_i32_89 = arith.constant 2 : i32
    %228 = vector.broadcast %c2_i32_89 : i32 to vector<32x16xi32>
    %229 = arith.cmpi eq, %8, %228 : vector<32x16xi32>
    %230 = arith.extui %229 : vector<32x16xi1> to vector<32x16xi32>
    %231 = arith.sitofp %230 : vector<32x16xi32> to vector<32x16xf32>
    %232 = vector.extract_strided_slice %7 {offsets = [64, 1], sizes = [32, 1], strides = [1, 1]} : vector<512x2xf32> to vector<32x1xf32>
    %233 = vector.broadcast %232 : vector<32x1xf32> to vector<32x16xf32>
    %234 = arith.mulf %231, %233 : vector<32x16xf32>
    %235 = arith.addf %227, %234 : vector<32x16xf32>
    %c3_i32_90 = arith.constant 3 : i32
    %236 = vector.broadcast %c3_i32_90 : i32 to vector<32x16xi32>
    %237 = arith.cmpi eq, %8, %236 : vector<32x16xi32>
    %238 = arith.extui %237 : vector<32x16xi1> to vector<32x16xi32>
    %239 = arith.sitofp %238 : vector<32x16xi32> to vector<32x16xf32>
    %240 = vector.extract_strided_slice %7 {offsets = [96, 1], sizes = [32, 1], strides = [1, 1]} : vector<512x2xf32> to vector<32x1xf32>
    %241 = vector.broadcast %240 : vector<32x1xf32> to vector<32x16xf32>
    %242 = arith.mulf %239, %241 : vector<32x16xf32>
    %243 = arith.addf %235, %242 : vector<32x16xf32>
    %c4_i32_91 = arith.constant 4 : i32
    %244 = vector.broadcast %c4_i32_91 : i32 to vector<32x16xi32>
    %245 = arith.cmpi eq, %8, %244 : vector<32x16xi32>
    %246 = arith.extui %245 : vector<32x16xi1> to vector<32x16xi32>
    %247 = arith.sitofp %246 : vector<32x16xi32> to vector<32x16xf32>
    %248 = vector.extract_strided_slice %7 {offsets = [128, 1], sizes = [32, 1], strides = [1, 1]} : vector<512x2xf32> to vector<32x1xf32>
    %249 = vector.broadcast %248 : vector<32x1xf32> to vector<32x16xf32>
    %250 = arith.mulf %247, %249 : vector<32x16xf32>
    %251 = arith.addf %243, %250 : vector<32x16xf32>
    %c5_i32_92 = arith.constant 5 : i32
    %252 = vector.broadcast %c5_i32_92 : i32 to vector<32x16xi32>
    %253 = arith.cmpi eq, %8, %252 : vector<32x16xi32>
    %254 = arith.extui %253 : vector<32x16xi1> to vector<32x16xi32>
    %255 = arith.sitofp %254 : vector<32x16xi32> to vector<32x16xf32>
    %256 = vector.extract_strided_slice %7 {offsets = [160, 1], sizes = [32, 1], strides = [1, 1]} : vector<512x2xf32> to vector<32x1xf32>
    %257 = vector.broadcast %256 : vector<32x1xf32> to vector<32x16xf32>
    %258 = arith.mulf %255, %257 : vector<32x16xf32>
    %259 = arith.addf %251, %258 : vector<32x16xf32>
    %c6_i32_93 = arith.constant 6 : i32
    %260 = vector.broadcast %c6_i32_93 : i32 to vector<32x16xi32>
    %261 = arith.cmpi eq, %8, %260 : vector<32x16xi32>
    %262 = arith.extui %261 : vector<32x16xi1> to vector<32x16xi32>
    %263 = arith.sitofp %262 : vector<32x16xi32> to vector<32x16xf32>
    %264 = vector.extract_strided_slice %7 {offsets = [192, 1], sizes = [32, 1], strides = [1, 1]} : vector<512x2xf32> to vector<32x1xf32>
    %265 = vector.broadcast %264 : vector<32x1xf32> to vector<32x16xf32>
    %266 = arith.mulf %263, %265 : vector<32x16xf32>
    %267 = arith.addf %259, %266 : vector<32x16xf32>
    %c7_i32_94 = arith.constant 7 : i32
    %268 = vector.broadcast %c7_i32_94 : i32 to vector<32x16xi32>
    %269 = arith.cmpi eq, %8, %268 : vector<32x16xi32>
    %270 = arith.extui %269 : vector<32x16xi1> to vector<32x16xi32>
    %271 = arith.sitofp %270 : vector<32x16xi32> to vector<32x16xf32>
    %272 = vector.extract_strided_slice %7 {offsets = [224, 1], sizes = [32, 1], strides = [1, 1]} : vector<512x2xf32> to vector<32x1xf32>
    %273 = vector.broadcast %272 : vector<32x1xf32> to vector<32x16xf32>
    %274 = arith.mulf %271, %273 : vector<32x16xf32>
    %275 = arith.addf %267, %274 : vector<32x16xf32>
    %c8_i32_95 = arith.constant 8 : i32
    %276 = vector.broadcast %c8_i32_95 : i32 to vector<32x16xi32>
    %277 = arith.cmpi eq, %8, %276 : vector<32x16xi32>
    %278 = arith.extui %277 : vector<32x16xi1> to vector<32x16xi32>
    %279 = arith.sitofp %278 : vector<32x16xi32> to vector<32x16xf32>
    %280 = vector.extract_strided_slice %7 {offsets = [256, 1], sizes = [32, 1], strides = [1, 1]} : vector<512x2xf32> to vector<32x1xf32>
    %281 = vector.broadcast %280 : vector<32x1xf32> to vector<32x16xf32>
    %282 = arith.mulf %279, %281 : vector<32x16xf32>
    %283 = arith.addf %275, %282 : vector<32x16xf32>
    %c9_i32_96 = arith.constant 9 : i32
    %284 = vector.broadcast %c9_i32_96 : i32 to vector<32x16xi32>
    %285 = arith.cmpi eq, %8, %284 : vector<32x16xi32>
    %286 = arith.extui %285 : vector<32x16xi1> to vector<32x16xi32>
    %287 = arith.sitofp %286 : vector<32x16xi32> to vector<32x16xf32>
    %288 = vector.extract_strided_slice %7 {offsets = [288, 1], sizes = [32, 1], strides = [1, 1]} : vector<512x2xf32> to vector<32x1xf32>
    %289 = vector.broadcast %288 : vector<32x1xf32> to vector<32x16xf32>
    %290 = arith.mulf %287, %289 : vector<32x16xf32>
    %291 = arith.addf %283, %290 : vector<32x16xf32>
    %c10_i32_97 = arith.constant 10 : i32
    %292 = vector.broadcast %c10_i32_97 : i32 to vector<32x16xi32>
    %293 = arith.cmpi eq, %8, %292 : vector<32x16xi32>
    %294 = arith.extui %293 : vector<32x16xi1> to vector<32x16xi32>
    %295 = arith.sitofp %294 : vector<32x16xi32> to vector<32x16xf32>
    %296 = vector.extract_strided_slice %7 {offsets = [320, 1], sizes = [32, 1], strides = [1, 1]} : vector<512x2xf32> to vector<32x1xf32>
    %297 = vector.broadcast %296 : vector<32x1xf32> to vector<32x16xf32>
    %298 = arith.mulf %295, %297 : vector<32x16xf32>
    %299 = arith.addf %291, %298 : vector<32x16xf32>
    %c11_i32_98 = arith.constant 11 : i32
    %300 = vector.broadcast %c11_i32_98 : i32 to vector<32x16xi32>
    %301 = arith.cmpi eq, %8, %300 : vector<32x16xi32>
    %302 = arith.extui %301 : vector<32x16xi1> to vector<32x16xi32>
    %303 = arith.sitofp %302 : vector<32x16xi32> to vector<32x16xf32>
    %304 = vector.extract_strided_slice %7 {offsets = [352, 1], sizes = [32, 1], strides = [1, 1]} : vector<512x2xf32> to vector<32x1xf32>
    %305 = vector.broadcast %304 : vector<32x1xf32> to vector<32x16xf32>
    %306 = arith.mulf %303, %305 : vector<32x16xf32>
    %307 = arith.addf %299, %306 : vector<32x16xf32>
    %c12_i32_99 = arith.constant 12 : i32
    %308 = vector.broadcast %c12_i32_99 : i32 to vector<32x16xi32>
    %309 = arith.cmpi eq, %8, %308 : vector<32x16xi32>
    %310 = arith.extui %309 : vector<32x16xi1> to vector<32x16xi32>
    %311 = arith.sitofp %310 : vector<32x16xi32> to vector<32x16xf32>
    %312 = vector.extract_strided_slice %7 {offsets = [384, 1], sizes = [32, 1], strides = [1, 1]} : vector<512x2xf32> to vector<32x1xf32>
    %313 = vector.broadcast %312 : vector<32x1xf32> to vector<32x16xf32>
    %314 = arith.mulf %311, %313 : vector<32x16xf32>
    %315 = arith.addf %307, %314 : vector<32x16xf32>
    %c13_i32_100 = arith.constant 13 : i32
    %316 = vector.broadcast %c13_i32_100 : i32 to vector<32x16xi32>
    %317 = arith.cmpi eq, %8, %316 : vector<32x16xi32>
    %318 = arith.extui %317 : vector<32x16xi1> to vector<32x16xi32>
    %319 = arith.sitofp %318 : vector<32x16xi32> to vector<32x16xf32>
    %320 = vector.extract_strided_slice %7 {offsets = [416, 1], sizes = [32, 1], strides = [1, 1]} : vector<512x2xf32> to vector<32x1xf32>
    %321 = vector.broadcast %320 : vector<32x1xf32> to vector<32x16xf32>
    %322 = arith.mulf %319, %321 : vector<32x16xf32>
    %323 = arith.addf %315, %322 : vector<32x16xf32>
    %c14_i32_101 = arith.constant 14 : i32
    %324 = vector.broadcast %c14_i32_101 : i32 to vector<32x16xi32>
    %325 = arith.cmpi eq, %8, %324 : vector<32x16xi32>
    %326 = arith.extui %325 : vector<32x16xi1> to vector<32x16xi32>
    %327 = arith.sitofp %326 : vector<32x16xi32> to vector<32x16xf32>
    %328 = vector.extract_strided_slice %7 {offsets = [448, 1], sizes = [32, 1], strides = [1, 1]} : vector<512x2xf32> to vector<32x1xf32>
    %329 = vector.broadcast %328 : vector<32x1xf32> to vector<32x16xf32>
    %330 = arith.mulf %327, %329 : vector<32x16xf32>
    %331 = arith.addf %323, %330 : vector<32x16xf32>
    %c15_i32_102 = arith.constant 15 : i32
    %332 = vector.broadcast %c15_i32_102 : i32 to vector<32x16xi32>
    %333 = arith.cmpi eq, %8, %332 : vector<32x16xi32>
    %334 = arith.extui %333 : vector<32x16xi1> to vector<32x16xi32>
    %335 = arith.sitofp %334 : vector<32x16xi32> to vector<32x16xf32>
    %336 = vector.extract_strided_slice %7 {offsets = [480, 1], sizes = [32, 1], strides = [1, 1]} : vector<512x2xf32> to vector<32x1xf32>
    %337 = vector.broadcast %336 : vector<32x1xf32> to vector<32x16xf32>
    %338 = arith.mulf %335, %337 : vector<32x16xf32>
    %339 = arith.addf %331, %338 : vector<32x16xf32>
    %c0_103 = arith.constant 0 : index
    %c0_104 = arith.constant 0 : index
    %c0_105 = arith.constant 0 : index
    %340 = vector.load %arg4[%c0_103, %c0_104, %c0_105] : memref<9x16x64xf32, #tpu.memory_space<vmem>>, vector<1x16x64xf32>
    %341 = vector.shape_cast %340 : vector<1x16x64xf32> to vector<16x64xf32>
    %cst_106 = arith.constant dense<0.000000e+00> : vector<32x64xf32>
    %342 = tpu.matmul %339, %341, %cst_106 {dimension_numbers = #tpu.dot_dimension_numbers<[1], [0], [0], [1], [0, 0, 1, 1], [], []>} : vector<32x16xf32>, vector<16x64xf32>, vector<32x64xf32> -> vector<32x64xf32>
    %c1_107 = arith.constant 1 : index
    %c0_108 = arith.constant 0 : index
    %c0_109 = arith.constant 0 : index
    %343 = vector.load %arg4[%c1_107, %c0_108, %c0_109] : memref<9x16x64xf32, #tpu.memory_space<vmem>>, vector<1x16x64xf32>
    %344 = vector.shape_cast %343 : vector<1x16x64xf32> to vector<16x64xf32>
    %cst_110 = arith.constant dense<0.000000e+00> : vector<32x64xf32>
    %345 = tpu.matmul %339, %344, %cst_110 {dimension_numbers = #tpu.dot_dimension_numbers<[1], [0], [0], [1], [0, 0, 1, 1], [], []>} : vector<32x16xf32>, vector<16x64xf32>, vector<32x64xf32> -> vector<32x64xf32>
    %c2_111 = arith.constant 2 : index
    %c0_112 = arith.constant 0 : index
    %c0_113 = arith.constant 0 : index
    %346 = vector.load %arg4[%c2_111, %c0_112, %c0_113] : memref<9x16x64xf32, #tpu.memory_space<vmem>>, vector<1x16x64xf32>
    %347 = vector.shape_cast %346 : vector<1x16x64xf32> to vector<16x64xf32>
    %cst_114 = arith.constant dense<0.000000e+00> : vector<32x64xf32>
    %348 = tpu.matmul %339, %347, %cst_114 {dimension_numbers = #tpu.dot_dimension_numbers<[1], [0], [0], [1], [0, 0, 1, 1], [], []>} : vector<32x16xf32>, vector<16x64xf32>, vector<32x64xf32> -> vector<32x64xf32>
    %c3_115 = arith.constant 3 : index
    %c0_116 = arith.constant 0 : index
    %c0_117 = arith.constant 0 : index
    %349 = vector.load %arg4[%c3_115, %c0_116, %c0_117] : memref<9x16x64xf32, #tpu.memory_space<vmem>>, vector<1x16x64xf32>
    %350 = vector.shape_cast %349 : vector<1x16x64xf32> to vector<16x64xf32>
    %cst_118 = arith.constant dense<0.000000e+00> : vector<32x64xf32>
    %351 = tpu.matmul %339, %350, %cst_118 {dimension_numbers = #tpu.dot_dimension_numbers<[1], [0], [0], [1], [0, 0, 1, 1], [], []>} : vector<32x16xf32>, vector<16x64xf32>, vector<32x64xf32> -> vector<32x64xf32>
    %c4_119 = arith.constant 4 : index
    %c0_120 = arith.constant 0 : index
    %c0_121 = arith.constant 0 : index
    %352 = vector.load %arg4[%c4_119, %c0_120, %c0_121] : memref<9x16x64xf32, #tpu.memory_space<vmem>>, vector<1x16x64xf32>
    %353 = vector.shape_cast %352 : vector<1x16x64xf32> to vector<16x64xf32>
    %cst_122 = arith.constant dense<0.000000e+00> : vector<32x64xf32>
    %354 = tpu.matmul %339, %353, %cst_122 {dimension_numbers = #tpu.dot_dimension_numbers<[1], [0], [0], [1], [0, 0, 1, 1], [], []>} : vector<32x16xf32>, vector<16x64xf32>, vector<32x64xf32> -> vector<32x64xf32>
    %c5_123 = arith.constant 5 : index
    %c0_124 = arith.constant 0 : index
    %c0_125 = arith.constant 0 : index
    %355 = vector.load %arg4[%c5_123, %c0_124, %c0_125] : memref<9x16x64xf32, #tpu.memory_space<vmem>>, vector<1x16x64xf32>
    %356 = vector.shape_cast %355 : vector<1x16x64xf32> to vector<16x64xf32>
    %cst_126 = arith.constant dense<0.000000e+00> : vector<32x64xf32>
    %357 = tpu.matmul %339, %356, %cst_126 {dimension_numbers = #tpu.dot_dimension_numbers<[1], [0], [0], [1], [0, 0, 1, 1], [], []>} : vector<32x16xf32>, vector<16x64xf32>, vector<32x64xf32> -> vector<32x64xf32>
    %c6_127 = arith.constant 6 : index
    %c0_128 = arith.constant 0 : index
    %c0_129 = arith.constant 0 : index
    %358 = vector.load %arg4[%c6_127, %c0_128, %c0_129] : memref<9x16x64xf32, #tpu.memory_space<vmem>>, vector<1x16x64xf32>
    %359 = vector.shape_cast %358 : vector<1x16x64xf32> to vector<16x64xf32>
    %cst_130 = arith.constant dense<0.000000e+00> : vector<32x64xf32>
    %360 = tpu.matmul %339, %359, %cst_130 {dimension_numbers = #tpu.dot_dimension_numbers<[1], [0], [0], [1], [0, 0, 1, 1], [], []>} : vector<32x16xf32>, vector<16x64xf32>, vector<32x64xf32> -> vector<32x64xf32>
    %c7_131 = arith.constant 7 : index
    %c0_132 = arith.constant 0 : index
    %c0_133 = arith.constant 0 : index
    %361 = vector.load %arg4[%c7_131, %c0_132, %c0_133] : memref<9x16x64xf32, #tpu.memory_space<vmem>>, vector<1x16x64xf32>
    %362 = vector.shape_cast %361 : vector<1x16x64xf32> to vector<16x64xf32>
    %cst_134 = arith.constant dense<0.000000e+00> : vector<32x64xf32>
    %363 = tpu.matmul %339, %362, %cst_134 {dimension_numbers = #tpu.dot_dimension_numbers<[1], [0], [0], [1], [0, 0, 1, 1], [], []>} : vector<32x16xf32>, vector<16x64xf32>, vector<32x64xf32> -> vector<32x64xf32>
    %c8_135 = arith.constant 8 : index
    %c0_136 = arith.constant 0 : index
    %c0_137 = arith.constant 0 : index
    %364 = vector.load %arg4[%c8_135, %c0_136, %c0_137] : memref<9x16x64xf32, #tpu.memory_space<vmem>>, vector<1x16x64xf32>
    %365 = vector.shape_cast %364 : vector<1x16x64xf32> to vector<16x64xf32>
    %cst_138 = arith.constant dense<0.000000e+00> : vector<32x64xf32>
    %366 = tpu.matmul %339, %365, %cst_138 {dimension_numbers = #tpu.dot_dimension_numbers<[1], [0], [0], [1], [0, 0, 1, 1], [], []>} : vector<32x16xf32>, vector<16x64xf32>, vector<32x64xf32> -> vector<32x64xf32>
    %367 = tpu.concatenate %342, %345, %348, %351, %354, %357, %360, %363, %366 in 0 : vector<32x64xf32>, vector<32x64xf32>, vector<32x64xf32>, vector<32x64xf32>, vector<32x64xf32>, vector<32x64xf32>, vector<32x64xf32>, vector<32x64xf32>, vector<32x64xf32> -> vector<288x64xf32>
    %c0_139 = arith.constant 0 : index
    %c0_140 = arith.constant 0 : index
    %368 = vector.load %arg5[%c0_139, %c0_140] : memref<16x288xf32, #tpu.memory_space<vmem>>, vector<16x288xf32>
    %cst_141 = arith.constant dense<0.000000e+00> : vector<16x64xf32>
    %369 = tpu.matmul %368, %367, %cst_141 {dimension_numbers = #tpu.dot_dimension_numbers<[1], [0], [0], [1], [0, 0, 1, 1], [], []>} : vector<16x288xf32>, vector<288x64xf32>, vector<16x64xf32> -> vector<16x64xf32>
    %c0_142 = arith.constant 0 : index
    %c0_143 = arith.constant 0 : index
    %370 = vector.load %arg6[%c0_142, %c0_143] : memref<16x1xf32, #tpu.memory_space<vmem>>, vector<16x1xf32>
    %371 = vector.broadcast %370 : vector<16x1xf32> to vector<16x64xf32>
    %372 = arith.addf %369, %371 : vector<16x64xf32>
    %cst_144 = arith.constant 0.000000e+00 : f32
    %373 = vector.broadcast %cst_144 : f32 to vector<16x64xf32>
    %374 = arith.maximumf %372, %373 : vector<16x64xf32>
    %c0_145 = arith.constant 0 : index
    %c0_146 = arith.constant 0 : index
    %c0_147 = arith.constant 0 : index
    %375 = vector.load %arg7[%c0_145, %c0_146, %c0_147] : memref<9x64x256xf32, #tpu.memory_space<vmem>>, vector<1x64x256xf32>
    %376 = vector.shape_cast %375 : vector<1x64x256xf32> to vector<64x256xf32>
    %cst_148 = arith.constant dense<0.000000e+00> : vector<16x256xf32>
    %377 = tpu.matmul %374, %376, %cst_148 {dimension_numbers = #tpu.dot_dimension_numbers<[1], [0], [0], [1], [0, 0, 1, 1], [], []>} : vector<16x64xf32>, vector<64x256xf32>, vector<16x256xf32> -> vector<16x256xf32>
    %c1_149 = arith.constant 1 : index
    %c0_150 = arith.constant 0 : index
    %c0_151 = arith.constant 0 : index
    %378 = vector.load %arg7[%c1_149, %c0_150, %c0_151] : memref<9x64x256xf32, #tpu.memory_space<vmem>>, vector<1x64x256xf32>
    %379 = vector.shape_cast %378 : vector<1x64x256xf32> to vector<64x256xf32>
    %cst_152 = arith.constant dense<0.000000e+00> : vector<16x256xf32>
    %380 = tpu.matmul %374, %379, %cst_152 {dimension_numbers = #tpu.dot_dimension_numbers<[1], [0], [0], [1], [0, 0, 1, 1], [], []>} : vector<16x64xf32>, vector<64x256xf32>, vector<16x256xf32> -> vector<16x256xf32>
    %c2_153 = arith.constant 2 : index
    %c0_154 = arith.constant 0 : index
    %c0_155 = arith.constant 0 : index
    %381 = vector.load %arg7[%c2_153, %c0_154, %c0_155] : memref<9x64x256xf32, #tpu.memory_space<vmem>>, vector<1x64x256xf32>
    %382 = vector.shape_cast %381 : vector<1x64x256xf32> to vector<64x256xf32>
    %cst_156 = arith.constant dense<0.000000e+00> : vector<16x256xf32>
    %383 = tpu.matmul %374, %382, %cst_156 {dimension_numbers = #tpu.dot_dimension_numbers<[1], [0], [0], [1], [0, 0, 1, 1], [], []>} : vector<16x64xf32>, vector<64x256xf32>, vector<16x256xf32> -> vector<16x256xf32>
    %c3_157 = arith.constant 3 : index
    %c0_158 = arith.constant 0 : index
    %c0_159 = arith.constant 0 : index
    %384 = vector.load %arg7[%c3_157, %c0_158, %c0_159] : memref<9x64x256xf32, #tpu.memory_space<vmem>>, vector<1x64x256xf32>
    %385 = vector.shape_cast %384 : vector<1x64x256xf32> to vector<64x256xf32>
    %cst_160 = arith.constant dense<0.000000e+00> : vector<16x256xf32>
    %386 = tpu.matmul %374, %385, %cst_160 {dimension_numbers = #tpu.dot_dimension_numbers<[1], [0], [0], [1], [0, 0, 1, 1], [], []>} : vector<16x64xf32>, vector<64x256xf32>, vector<16x256xf32> -> vector<16x256xf32>
    %c4_161 = arith.constant 4 : index
    %c0_162 = arith.constant 0 : index
    %c0_163 = arith.constant 0 : index
    %387 = vector.load %arg7[%c4_161, %c0_162, %c0_163] : memref<9x64x256xf32, #tpu.memory_space<vmem>>, vector<1x64x256xf32>
    %388 = vector.shape_cast %387 : vector<1x64x256xf32> to vector<64x256xf32>
    %cst_164 = arith.constant dense<0.000000e+00> : vector<16x256xf32>
    %389 = tpu.matmul %374, %388, %cst_164 {dimension_numbers = #tpu.dot_dimension_numbers<[1], [0], [0], [1], [0, 0, 1, 1], [], []>} : vector<16x64xf32>, vector<64x256xf32>, vector<16x256xf32> -> vector<16x256xf32>
    %c5_165 = arith.constant 5 : index
    %c0_166 = arith.constant 0 : index
    %c0_167 = arith.constant 0 : index
    %390 = vector.load %arg7[%c5_165, %c0_166, %c0_167] : memref<9x64x256xf32, #tpu.memory_space<vmem>>, vector<1x64x256xf32>
    %391 = vector.shape_cast %390 : vector<1x64x256xf32> to vector<64x256xf32>
    %cst_168 = arith.constant dense<0.000000e+00> : vector<16x256xf32>
    %392 = tpu.matmul %374, %391, %cst_168 {dimension_numbers = #tpu.dot_dimension_numbers<[1], [0], [0], [1], [0, 0, 1, 1], [], []>} : vector<16x64xf32>, vector<64x256xf32>, vector<16x256xf32> -> vector<16x256xf32>
    %c6_169 = arith.constant 6 : index
    %c0_170 = arith.constant 0 : index
    %c0_171 = arith.constant 0 : index
    %393 = vector.load %arg7[%c6_169, %c0_170, %c0_171] : memref<9x64x256xf32, #tpu.memory_space<vmem>>, vector<1x64x256xf32>
    %394 = vector.shape_cast %393 : vector<1x64x256xf32> to vector<64x256xf32>
    %cst_172 = arith.constant dense<0.000000e+00> : vector<16x256xf32>
    %395 = tpu.matmul %374, %394, %cst_172 {dimension_numbers = #tpu.dot_dimension_numbers<[1], [0], [0], [1], [0, 0, 1, 1], [], []>} : vector<16x64xf32>, vector<64x256xf32>, vector<16x256xf32> -> vector<16x256xf32>
    %c7_173 = arith.constant 7 : index
    %c0_174 = arith.constant 0 : index
    %c0_175 = arith.constant 0 : index
    %396 = vector.load %arg7[%c7_173, %c0_174, %c0_175] : memref<9x64x256xf32, #tpu.memory_space<vmem>>, vector<1x64x256xf32>
    %397 = vector.shape_cast %396 : vector<1x64x256xf32> to vector<64x256xf32>
    %cst_176 = arith.constant dense<0.000000e+00> : vector<16x256xf32>
    %398 = tpu.matmul %374, %397, %cst_176 {dimension_numbers = #tpu.dot_dimension_numbers<[1], [0], [0], [1], [0, 0, 1, 1], [], []>} : vector<16x64xf32>, vector<64x256xf32>, vector<16x256xf32> -> vector<16x256xf32>
    %c8_177 = arith.constant 8 : index
    %c0_178 = arith.constant 0 : index
    %c0_179 = arith.constant 0 : index
    %399 = vector.load %arg7[%c8_177, %c0_178, %c0_179] : memref<9x64x256xf32, #tpu.memory_space<vmem>>, vector<1x64x256xf32>
    %400 = vector.shape_cast %399 : vector<1x64x256xf32> to vector<64x256xf32>
    %cst_180 = arith.constant dense<0.000000e+00> : vector<16x256xf32>
    %401 = tpu.matmul %374, %400, %cst_180 {dimension_numbers = #tpu.dot_dimension_numbers<[1], [0], [0], [1], [0, 0, 1, 1], [], []>} : vector<16x64xf32>, vector<64x256xf32>, vector<16x256xf32> -> vector<16x256xf32>
    %402 = tpu.concatenate %377, %380, %383, %386, %389, %392, %395, %398, %401 in 0 : vector<16x256xf32>, vector<16x256xf32>, vector<16x256xf32>, vector<16x256xf32>, vector<16x256xf32>, vector<16x256xf32>, vector<16x256xf32>, vector<16x256xf32>, vector<16x256xf32> -> vector<144x256xf32>
    %c0_181 = arith.constant 0 : index
    %c0_182 = arith.constant 0 : index
    %403 = vector.load %arg8[%c0_181, %c0_182] : memref<8x144xf32, #tpu.memory_space<vmem>>, vector<8x144xf32>
    %cst_183 = arith.constant dense<0.000000e+00> : vector<8x256xf32>
    %404 = tpu.matmul %403, %402, %cst_183 {dimension_numbers = #tpu.dot_dimension_numbers<[1], [0], [0], [1], [0, 0, 1, 1], [], []>} : vector<8x144xf32>, vector<144x256xf32>, vector<8x256xf32> -> vector<8x256xf32>
    %c0_184 = arith.constant 0 : index
    %c0_185 = arith.constant 0 : index
    %405 = vector.load %arg9[%c0_184, %c0_185] : memref<8x1xf32, #tpu.memory_space<vmem>>, vector<8x1xf32>
    %406 = vector.broadcast %405 : vector<8x1xf32> to vector<8x256xf32>
    %407 = arith.addf %404, %406 : vector<8x256xf32>
    %cst_186 = arith.constant 0.000000e+00 : f32
    %408 = vector.broadcast %cst_186 : f32 to vector<8x256xf32>
    %409 = arith.maximumf %407, %408 : vector<8x256xf32>
    %c1_187 = arith.constant 1 : index
    %c0_188 = arith.constant 0 : index
    %c0_189 = arith.constant 0 : index
    %410 = vector.load %arg10[%c1_187, %c0_188, %c0_189] : memref<2x8x256xf32, #tpu.memory_space<vmem>>, vector<1x8x256xf32>
    %411 = vector.shape_cast %410 : vector<1x8x256xf32> to vector<8x256xf32>
    %412 = vector.shape_cast %409 : vector<8x256xf32> to vector<1x8x256xf32>
    tpu.vector_store %arg10[%c1_187, %c0_188, %c0_189], %412 {strides = array<i32>} : memref<2x8x256xf32, #tpu.memory_space<vmem>>, vector<1x8x256xf32>,
    return
  }
  func.func @transform_0(%arg0: i32) -> (i32, i32) {
    %c0_i32 = arith.constant 0 : i32
    %c0_i32_0 = arith.constant 0 : i32
    %c0_i32_1 = arith.constant 0 : i32
    return %c0_i32, %c0_i32_0 : i32, i32
  }
  func.func @transform_1(%arg0: i32) -> (i32, i32) {
    %c0_i32 = arith.constant 0 : i32
    %c0_i32_0 = arith.constant 0 : i32
    %c0_i32_1 = arith.constant 0 : i32
    return %c0_i32, %c0_i32_0 : i32, i32
  }
  func.func @transform_2(%arg0: i32) -> (i32, i32) {
    %c0_i32 = arith.constant 0 : i32
    %c0_i32_0 = arith.constant 0 : i32
    %c0_i32_1 = arith.constant 0 : i32
    return %c0_i32, %c0_i32_0 : i32, i32
  }
  func.func @transform_3(%arg0: i32) -> (i32, i32, i32) {
    %c0_i32 = arith.constant 0 : i32
    %c0_i32_0 = arith.constant 0 : i32
    %c0_i32_1 = arith.constant 0 : i32
    %c0_i32_2 = arith.constant 0 : i32
    return %c0_i32, %c0_i32_0, %c0_i32_1 : i32, i32, i32
  }
  func.func @transform_4(%arg0: i32) -> (i32, i32) {
    %c0_i32 = arith.constant 0 : i32
    %c0_i32_0 = arith.constant 0 : i32
    %c0_i32_1 = arith.constant 0 : i32
    return %c0_i32, %c0_i32_0 : i32, i32
  }
  func.func @transform_5(%arg0: i32) -> (i32, i32) {
    %c0_i32 = arith.constant 0 : i32
    %c0_i32_0 = arith.constant 0 : i32
    %c0_i32_1 = arith.constant 0 : i32
    return %c0_i32, %c0_i32_0 : i32, i32
  }
  func.func @transform_6(%arg0: i32) -> (i32, i32, i32) {
    %c0_i32 = arith.constant 0 : i32
    %c0_i32_0 = arith.constant 0 : i32
    %c0_i32_1 = arith.constant 0 : i32
    %c0_i32_2 = arith.constant 0 : i32
    return %c0_i32, %c0_i32_0, %c0_i32_1 : i32, i32, i32
  }
  func.func @transform_7(%arg0: i32) -> (i32, i32) {
    %c0_i32 = arith.constant 0 : i32
    %c0_i32_0 = arith.constant 0 : i32
    %c0_i32_1 = arith.constant 0 : i32
    return %c0_i32, %c0_i32_0 : i32, i32
  }
  func.func @transform_8(%arg0: i32) -> (i32, i32) {
    %c0_i32 = arith.constant 0 : i32
    %c0_i32_0 = arith.constant 0 : i32
    %c0_i32_1 = arith.constant 0 : i32
    return %c0_i32, %c0_i32_0 : i32, i32
  }
  func.func @transform_9(%arg0: i32) -> (i32, i32, i32) {
    %c0_i32 = arith.constant 0 : i32
    %c0_i32_0 = arith.constant 0 : i32
    %c0_i32_1 = arith.constant 0 : i32
    %c0_i32_2 = arith.constant 0 : i32
    return %c0_i32, %c0_i32_0, %c0_i32_1 : i32, i32, i32
  }
}

</mosaic_0001>

<bundles_post_ra>
// kernel: tpu_custom_call.1
= control target key start
LH: loop header
LB: loop body
LE: loop exit
PB: predicated region body
PF: predicated region fallthrough
CT: control target
= control target key end

     0   :  { %14 = vsyncpa [#allocation3], 0  ;;  %s7392_s0 = inlined_call_operand.vmem [shape: f32[48,2], index: 0, kind: input, shape index: {}]   ;;  %s7393_s1 = inlined_call_operand.vmem [shape: f32[512,48], index: 1, kind: input, shape index: {}]   ;;  %s7394_s2 = inlined_call_operand.vmem [shape: f32[512,1], index: 2, kind: input, shape index: {}]   ;;  %s7395_s3 = inlined_call_operand.hbm [shape: f32[9,16,64], index: 3, kind: input, shape index: {}]   ;;  %s7396_s4 = inlined_call_operand.vmem [shape: f32[16,288], index: 4, kind: input, shape index: {}]   ;;  %s7397_s5 = inlined_call_operand.vmem [shape: f32[16,1], index: 5, kind: input, shape index: {}]   ;;  %s7398_s6 = inlined_call_operand.vmem [shape: f32[9,64,256], index: 6, kind: input, shape index: {}]   ;;  %s7399_s7 = inlined_call_operand.vmem [shape: f32[8,144], index: 7, kind: input, shape index: {}]   ;;  %s7400_s8 = inlined_call_operand.vmem [shape: f32[8,1], index: 8, kind: input, shape index: {}]   ;;  %s7401_s9 = inlined_call_operand.hbm [shape: f32[2,8,256], index: 9, kind: output, shape index: {}]  }
   0x1   :  { %15 = vsyncpa [#allocation4], 0  ;;  %s26_s11 = sshll.u32 %s7395_s3, 4  ;;  %s4546_s12 = smov [#allocation2]   ;;  %s27_s11 = int_to_ptr.hbm [resolvable:$true] %s26_s11 }
   0x2   :  { %s28_s13 = sshll.u32 %s4546_s12, 4  ;;  %s4547_s14 = smov 128   ;;  %s29_s13 = int_to_ptr.vmem [resolvable:$true] %s28_s13 }
   0x3   :  { %s4548_s15 = smov 8  }
   0x4   :  { %34 = dma.hbm_to_vmem [thread:$0]  %s27_s11, 2304, %s29_s13, [#allocation3], %s4547_s14, %s4547_s14, %s4548_s15  }
   0x5   :  { %4542 = dma.done.wait [#allocation3], 2304  }
   0x6   :  { %4543 = vsyncadd [#allocation3], 4294964992  ;;  %v7402_v0 = vmov 0   ;;  %v136_v1 = vld [vmem:[%s7394_s2 + $0x88] sm:$0xff]  ;;  %v117_v5 = vld [vmem:[%s7392_s0 + $0x20] sm:$0xff]  ;;  %vm503_vm0 = vcmask 392192  }
   0x7   :  { %4487 = vset.pattern.permute.xlu2 %v7402_v0  ;;  %4486 = vset.pattern.permute.xlu1 %v7402_v0  ;;  %v128_v2 = vld [vmem:[%s7394_s2 + $0x48] sm:$0xff]  ;;  %v116_v6 = vld [vmem:[%s7392_s0 + $0x18] sm:$0xff]  ;;  %v115_v7 = vld [vmem:[%s7392_s0 + $0x10] sm:$0xff]  ;;  %s3967_s16 = sshll.u32 %s7401_s9, 4  ;;  %s4553_s17 = smov 256   ;;  %s3968_s16 = int_to_ptr.hbm [resolvable:$true] %s3967_s16 }
   0x8   :  { %4485 = vset.pattern.permute.xlu0 %v7402_v0  ;;  %v120_v3 = vld [vmem:[%s7394_s2 + $0x8] sm:$0xff]  ;;  %270 = vperm.xlu2 %4487, %v136_v1   ;;  %v121_v9 = vld [vmem:[%s7394_s2 + $0x10] sm:$0xff]  ;;  %v113_v12 = vld [vmem:[%s7392_s0] sm:$0xff]  ;;  %s4554_s3 = smov 16  }
   0x9   :  { %230 = vperm.xlu1 %4486, %v128_v2   ;;  %v118_v4 = vld [vmem:[%s7392_s0 + $0x28] sm:$0xff]  ;;  %190 = vperm.xlu0 %4485, %v120_v3   ;;  %v49_v13 = vld [vmem:[%s7393_s1] sm:$0xff]  ;;  %v129_v15 = vld [vmem:[%s7394_s2 + $0x50] sm:$0xff] }
   0xa   :  { %706 = vmatpush.msra.mxu0 %v118_v4  ;;  %4468 = vmatpush.msra.mxu1 %v118_v4  ;;  %v132_v8 = vld [vmem:[%s7394_s2 + $0x68] sm:$0xff]  ;;  %v125_v16 = vld [vmem:[%s7394_s2 + $0x30] sm:$0xff]  ;;  %v122_v23 = vld [vmem:[%s7394_s2 + $0x18] sm:$0xff] }
   0xb   :  { %v124_v10 = vld [vmem:[%s7394_s2 + $0x28] sm:$0xff]  ;;  %v133_v18 = vld [vmem:[%s7394_s2 + $0x70] sm:$0xff]  ;;  %v52_v25 = vld [vmem:[%s7393_s1 + $0x18] sm:$0xff] }
   0xc   :  { %707 = vmatpush.msra.mxu0 %v117_v5  ;;  %4469 = vmatpush.msra.mxu1 %v117_v5  ;;  %v114_v11 = vld [vmem:[%s7392_s0 + $0x8] sm:$0xff]  ;;  %v51_v21 = vld [vmem:[%s7393_s1 + $0x10] sm:$0xff]  ;;  %v126_v28 = vld [vmem:[%s7394_s2 + $0x38] sm:$0xff] }
   0xd   :  { %v140_v14 = vld [vmem:[%s7394_s2 + $0xa8] sm:$0xff]  ;;  %v137_v24 = vld [vmem:[%s7394_s2 + $0x90] sm:$0xff]  ;;  %v53_v29 = vld [vmem:[%s7393_s1 + $0x20] sm:$0xff] }
   0xe   :  { %708 = vmatpush.msra.mxu0 %v116_v6  ;;  %4470 = vmatpush.msra.mxu1 %v116_v6  ;;  %v50_v17 = vld [vmem:[%s7393_s1 + $0x8] sm:$0xff]  ;;  %v141_v26 = vld [vmem:[%s7394_s2 + $0xb0] sm:$0xff]  ;;  %v130_v32 = vld [vmem:[%s7394_s2 + $0x58] sm:$0xff] }
   0xf   :  { %v148_v19 = vld [vmem:[%s7394_s2 + $0xe8] sm:$0xff]  ;;  %v145_v30 = vld [vmem:[%s7394_s2 + $0xd0] sm:$0xff]  ;;  %v134_v36 = vld [vmem:[%s7394_s2 + $0x78] sm:$0xff] }
  0x10   :  { %709 = vmatpush.msra.mxu0 %v115_v7  ;;  %195 = vperm.xlu2 %4487, %v121_v9   ;;  %v144_v20 = vld [vmem:[%s7394_s2 + $0xc8] sm:$0xff]  ;;  %v149_v34 = vld [vmem:[%s7394_s2 + $0xf0] sm:$0xff]  ;;  %v138_v40 = vld [vmem:[%s7394_s2 + $0x98] sm:$0xff] }
  0x11   :  { %250 = vperm.xlu1 %4486, %v132_v8   ;;  %210 = vperm.xlu0 %4485, %v124_v10   ;;  %v152_v22 = vld [vmem:[%s7394_s2 + $0x108] sm:$0xff]  ;;  %v55_v37 = vld [vmem:[%s7393_s1 + $0x30] sm:$0xff]  ;;  %v56_v41 = vld [vmem:[%s7393_s1 + $0x38] sm:$0xff] }
  0x12   :  { %710 = vmatpush.msra.mxu0 %v114_v11  ;;  %4471 = vmatpush.msra.mxu1 %v115_v7  ;;  %v156_v27 = vld [vmem:[%s7394_s2 + $0x128] sm:$0xff]  ;;  %v153_v38 = vld [vmem:[%s7394_s2 + $0x110] sm:$0xff]  ;;  %v108_v42 = vld [vmem:[%s7393_s1 + $0x1d8] sm:$0xff] }
  0x13   :  { %v160_v31 = vld [vmem:[%s7394_s2 + $0x148] sm:$0xff]  ;;  %v123_v43 = vld [vmem:[%s7394_s2 + $0x20] sm:$0xff]  ;;  %v142_v44 = vld [vmem:[%s7394_s2 + $0xb8] sm:$0xff] }
  0x14   :  { %711 = vmatpush.msra.mxu0 %v113_v12  ;;  %4472 = vmatpush.msra.mxu1 %v114_v11  ;;  %v54_v33 = vld [vmem:[%s7393_s1 + $0x28] sm:$0xff]  ;;  %v119_v45 = vld [vmem:[%s7394_s2] sm:$0xff]  ;;  %v157_v50 = vld [vmem:[%s7394_s2 + $0x130] sm:$0xff] }
  0x15   :  { %3980 = vmatmul.msk.f32.vlgmr.msra.gmra.mxu0 %vm503_vm0, %v49_v13  ;;  %v164_v35 = vld [vmem:[%s7394_s2 + $0x168] sm:$0xff]  ;;  %v57_v46 = vld [vmem:[%s7393_s1 + $0x40] sm:$0xff]  ;;  %v161_v53 = vld [vmem:[%s7394_s2 + $0x150] sm:$0xff] }
  0x16   :  { %4473 = vmatpush.msra.mxu1 %v113_v12  ;;  %v168_v39 = vld [vmem:[%s7394_s2 + $0x188] sm:$0xff]  ;;  %v109_v47 = vld [vmem:[%s7393_s1 + $0x1e0] sm:$0xff]  ;;  %v146_v55 = vld [vmem:[%s7394_s2 + $0xd8] sm:$0xff] }
  0x17   :  { %4039 = vmatmul.msk.f32.vlgmr.msra.gmra.mxu1 %vm503_vm0, %v108_v42  ;;  %v172_v48 = vld [vmem:[%s7394_s2 + $0x1a8] sm:$0xff]  ;;  %v127_v49 = vld [vmem:[%s7394_s2 + $0x40] sm:$0xff]  ;;  %v59_v56 = vld [vmem:[%s7393_s1 + $0x50] sm:$0xff] }
  0x18   :  { %235 = vperm.xlu2 %4487, %v129_v15   ;;  %v58_v51 = vld [vmem:[%s7393_s1 + $0x48] sm:$0xff]  ;;  %v111_v58 = vld [vmem:[%s7393_s1 + $0x1f0] sm:$0xff]  ;;  %v150_v59 = vld [vmem:[%s7394_s2 + $0xf8] sm:$0xff] }
  0x19   :  { %290 = vperm.xlu1 %4486, %v140_v14   ;;  %215 = vperm.xlu0 %4485, %v125_v16   ;;  %v110_v52 = vld [vmem:[%s7393_s1 + $0x1e8] sm:$0xff]  ;;  %v165_v60 = vld [vmem:[%s7394_s2 + $0x170] sm:$0xff]  ;;  %v131_v61 = vld [vmem:[%s7394_s2 + $0x60] sm:$0xff] }
  0x1a   :  { %v176_v54 = vld [vmem:[%s7394_s2 + $0x1c8] sm:$0xff]  ;;  %v60_v62 = vld [vmem:[%s7393_s1 + $0x58] sm:$0xff]  ;;  %v135_v1 = vld [vmem:[%s7394_s2 + $0x80] sm:$0xff] }
  0x1b   :  { %v154_v2 = vld [vmem:[%s7394_s2 + $0x118] sm:$0xff]  ;;  %v180_v3 = vld [vmem:[%s7394_s2 + $0x1e8] sm:$0xff]  ;;  %v61_v4 = vld [vmem:[%s7393_s1 + $0x60] sm:$0xff] }
  0x1c   :  { %v139_v6 = vld [vmem:[%s7394_s2 + $0xa0] sm:$0xff]  ;;  %v158_v7 = vld [vmem:[%s7394_s2 + $0x138] sm:$0xff]  ;;  %v169_v8 = vld [vmem:[%s7394_s2 + $0x190] sm:$0xff] }
  0x1d   :  { %3981 = vmatmul.msk.f32.gmra.mxu0 %vm503_vm0, %v50_v17  ;;  %v62_v9 = vld [vmem:[%s7393_s1 + $0x68] sm:$0xff]  ;;  %v143_v13 = vld [vmem:[%s7394_s2 + $0xc0] sm:$0xff]  ;;  %v162_v14 = vld [vmem:[%s7394_s2 + $0x158] sm:$0xff] }
  0x1e   :  { %v173_v15 = vld [vmem:[%s7394_s2 + $0x1b0] sm:$0xff] }
  0x1f   :  { %4040 = vmatmul.msk.f32.gmra.mxu1 %vm503_vm0, %v109_v47  ;;  %v63_v16 = vld [vmem:[%s7393_s1 + $0x70] sm:$0xff] }
  0x20   :  { %330 = vperm.xlu2 %4487, %v148_v19  }
  0x21   :  { %255 = vperm.xlu1 %4486, %v133_v18   ;;  %310 = vperm.xlu0 %4485, %v144_v20   ;;  %v147_v20 = vld [vmem:[%s7394_s2 + $0xe0] sm:$0xff] }
  0x25   :  { %3982 = vmatmul.msk.f32.gmra.mxu0 %vm503_vm0, %v51_v21  ;;  %v166_v21 = vld [vmem:[%s7394_s2 + $0x178] sm:$0xff] }
  0x27   :  { %4041 = vmatmul.msk.f32.gmra.mxu1 %vm503_vm0, %v110_v52 }
  0x28   :  { %200 = vperm.xlu2 %4487, %v122_v23   ;;  %v64_v23 = vld [vmem:[%s7393_s1 + $0x78] sm:$0xff] }
  0x29   :  { %350 = vperm.xlu1 %4486, %v152_v22   ;;  %275 = vperm.xlu0 %4485, %v137_v24   ;;  %v177_v22 = vld [vmem:[%s7394_s2 + $0x1d0] sm:$0xff] }
  0x2d   :  { %3983 = vmatmul.msk.f32.gmra.mxu0 %vm503_vm0, %v52_v25 }
  0x2f   :  { %4042 = vmatmul.msk.f32.gmra.mxu1 %vm503_vm0, %v111_v58  ;;  %v68_v58 = vld [vmem:[%s7393_s1 + $0x98] sm:$0xff] }
  0x30   :  { %370 = vperm.xlu2 %4487, %v156_v27   ;;  %v151_v27 = vld [vmem:[%s7394_s2 + $0x100] sm:$0xff] }
  0x31   :  { %295 = vperm.xlu1 %4486, %v141_v26   ;;  %220 = vperm.xlu0 %4485, %v126_v28   ;;  %v170_v28 = vld [vmem:[%s7394_s2 + $0x198] sm:$0xff] }
  0x35   :  { %3984 = vmatmul.msk.f32.gmra.mxu0 %vm503_vm0, %v53_v29  ;;  %v181_v29 = vld [vmem:[%s7394_s2 + $0x1f0] sm:$0xff] }
  0x38   :  { %390 = vperm.xlu2 %4487, %v160_v31   ;;  %v65_v31 = vld [vmem:[%s7393_s1 + $0x80] sm:$0xff] }
  0x39   :  { %315 = vperm.xlu1 %4486, %v145_v30   ;;  %240 = vperm.xlu0 %4485, %v130_v32  }
  0x3d   :  { %3985 = vmatmul.msk.f32.gmra.mxu0 %vm503_vm0, %v54_v33 }
  0x40   :  { %410 = vperm.xlu2 %4487, %v164_v35   ;;  %v174_v35 = vld [vmem:[%s7394_s2 + $0x1b8] sm:$0xff] }
  0x41   :  { %335 = vperm.xlu1 %4486, %v149_v34   ;;  %260 = vperm.xlu0 %4485, %v134_v36   ;;  %v159_v36 = vld [vmem:[%s7394_s2 + $0x140] sm:$0xff] }
  0x45   :  { %3986 = vmatmul.msk.f32.gmra.mxu0 %vm503_vm0, %v55_v37  ;;  %v155_v37 = vld [vmem:[%s7394_s2 + $0x120] sm:$0xff] }
  0x48   :  { %430 = vperm.xlu2 %4487, %v168_v39   ;;  %v66_v39 = vld [vmem:[%s7393_s1 + $0x88] sm:$0xff] }
  0x49   :  { %355 = vperm.xlu1 %4486, %v153_v38   ;;  %280 = vperm.xlu0 %4485, %v138_v40  }
  0x4d   :  { %3987 = vmatmul.msk.f32.gmra.mxu0 %vm503_vm0, %v56_v41 }
  0x50   :  { %300 = vperm.xlu2 %4487, %v142_v44   ;;  %v171_v44 = vld [vmem:[%s7394_s2 + $0x1a0] sm:$0xff] }
  0x51   :  { %205 = vperm.xlu1 %4486, %v123_v43   ;;  %185 = vperm.xlu0 %4485, %v119_v45  }
  0x55   :  { %3988 = vmatmul.msk.f32.gmra.mxu0 %vm503_vm0, %v57_v46  ;;  %v178_v46 = vld [vmem:[%s7394_s2 + $0x1d8] sm:$0xff] }
  0x58   :  { %225 = vperm.xlu2 %4487, %v127_v49  }
  0x59   :  { %450 = vperm.xlu1 %4486, %v172_v48   ;;  %375 = vperm.xlu0 %4485, %v157_v50   ;;  %v67_v48 = vld [vmem:[%s7393_s1 + $0x90] sm:$0xff] }
  0x5d   :  { %3989 = vmatmul.msk.f32.gmra.mxu0 %vm503_vm0, %v58_v51 }
  0x60   :  { %470 = vperm.xlu2 %4487, %v176_v54  }
  0x61   :  { %395 = vperm.xlu1 %4486, %v161_v53   ;;  %320 = vperm.xlu0 %4485, %v146_v55   ;;  %v182_v53 = vld [vmem:[%s7394_s2 + $0x1f8] sm:$0xff]  ;;  %v163_v55 = vld [vmem:[%s7394_s2 + $0x160] sm:$0xff] }
  0x62   :  { %v4792_v57 = vpop.permute.xlu2 %270 }
  0x65   :  { %3990 = vmatmul.msk.f32.gmra.mxu0 %vm503_vm0, %v59_v56 }
  0x68   :  { %415 = vperm.xlu2 %4487, %v165_v60  }
  0x69   :  { %340 = vperm.xlu1 %4486, %v150_v59   ;;  %245 = vperm.xlu0 %4485, %v131_v61  }
  0x6a   :  { %v4811_v63 = vpop.permute.xlu2 %195 }
  0x6d   :  { %3991 = vmatmul.msk.f32.gmra.mxu0 %vm503_vm0, %v60_v62  ;;  %v179_v62 = vld [vmem:[%s7394_s2 + $0x1e0] sm:$0xff] }
  0x70   :  { %360 = vperm.xlu2 %4487, %v154_v2  }
  0x71   :  { %265 = vperm.xlu1 %4486, %v135_v1   ;;  %490 = vperm.xlu0 %4485, %v180_v3   ;;  %v167_v1 = vld [vmem:[%s7394_s2 + $0x180] sm:$0xff] }
  0x72   :  { %v4826_v5 = vpop.permute.xlu2 %235  ;;  %v69_v3 = vld [vmem:[%s7393_s1 + $0xa0] sm:$0xff] }
  0x75   :  { %3992 = vmatmul.msk.f32.gmra.mxu0 %vm503_vm0, %v61_v4 }
  0x78   :  { %380 = vperm.xlu2 %4487, %v158_v7  }
  0x79   :  { %285 = vperm.xlu1 %4486, %v139_v6   ;;  %435 = vperm.xlu0 %4485, %v169_v8  }
  0x7a   :  { %v4843_v11 = vpop.permute.xlu2 %330 }
  0x7b   :  { %v4841_v10 = vpop.permute.xlu1 %230  ;;  %v191_v12 = vpop.permute.xlu0 %190 }
  0x7d   :  { %3993 = vmatmul.msk.f32.gmra.mxu0 %vm503_vm0, %v62_v9 }
  0x80   :  { %400 = vperm.xlu2 %4487, %v162_v14  }
  0x81   :  { %305 = vperm.xlu1 %4486, %v143_v13   ;;  %455 = vperm.xlu0 %4485, %v173_v15   ;;  %v70_v13 = vld [vmem:[%s7393_s1 + $0xa8] sm:$0xff] }
  0x82   :  { %v4860_v18 = vpop.permute.xlu2 %200 }
  0x83   :  { %v4858_v17 = vpop.permute.xlu1 %250  ;;  %v4862_v19 = vpop.permute.xlu0 %210 }
  0x85   :  { %3994 = vmatmul.msk.f32.gmra.mxu0 %vm503_vm0, %v63_v16 }
  0x88   :  { %420 = vperm.xlu2 %4487, %v166_v21  }
  0x89   :  { %325 = vperm.xlu1 %4486, %v147_v20   ;;  %475 = vperm.xlu0 %4485, %v177_v22   ;;  %v71_v20 = vld [vmem:[%s7393_s1 + $0xb0] sm:$0xff] }
  0x8a   :  { %v4879_v25 = vpop.permute.xlu2 %370 }
  0x8b   :  { %v4877_v24 = vpop.permute.xlu1 %290  ;;  %v4881_v26 = vpop.permute.xlu0 %215 }
  0x8d   :  { %3995 = vmatmul.msk.f32.gmra.mxu0 %vm503_vm0, %v64_v23 }
  0x90   :  { %440 = vperm.xlu2 %4487, %v170_v28  }
  0x91   :  { %345 = vperm.xlu1 %4486, %v151_v27   ;;  %495 = vperm.xlu0 %4485, %v181_v29  }
  0x92   :  { %v4893_v30 = vpop.f32.mrf.mxu0  ;;  %v4900_v33 = vpop.permute.xlu2 %390 }
  0x93   :  { %v4898_v32 = vpop.permute.xlu1 %255  ;;  %v4902_v34 = vpop.permute.xlu0 %310 }
  0x95   :  { %3996 = vmatmul.msk.f32.gmra.mxu0 %vm503_vm0, %v65_v31 }
  0x98   :  { %385 = vperm.xlu2 %4487, %v159_v36  }
  0x99   :  { %460 = vperm.xlu1 %4486, %v174_v35   ;;  %365 = vperm.xlu0 %4485, %v155_v37   ;;  %v72_v37 = vld [vmem:[%s7393_s1 + $0xb8] sm:$0xff] }
  0x9a   :  { %v716_v38 = vpop.f32.mrf.mxu0  ;;  %v4921_v42 = vpop.permute.xlu2 %410 }
  0x9b   :  { %v4917_v40 = vadd.f32 %v716_v38, %v191_v12  ;;  %v4919_v41 = vpop.permute.xlu1 %350  ;;  %v4923_v43 = vpop.permute.xlu0 %275 }
  0x9d   :  { %7516 = vst [vmem:[#allocation8_spill] sm:$0xff] %v4917_v40  ;;  %3997 = vmatmul.msk.f32.gmra.mxu0 %vm503_vm0, %v66_v39  ;;  %v7409_v45 = vmax.f32 %v4917_v40, 0.0 }
  0xa0   :  { %445 = vperm.xlu2 %4487, %v171_v44  }
  0xa1   :  { %981 = vperm.xlu1 %4486, %v7409_v45   ;;  %480 = vperm.xlu0 %4485, %v178_v46   ;;  %v78_v45 = vld [vmem:[%s7393_s1 + $0xe8] sm:$0xff] }
  0xa2   :  { %v719_v47 = vpop.f32.mrf.mxu0  ;;  %v4943_v51 = vpop.permute.xlu2 %430 }
  0xa3   :  { %v4939_v49 = vadd.f32 %v719_v47, %v4811_v63  ;;  %v4941_v50 = vpop.permute.xlu1 %295  ;;  %v4945_v52 = vpop.permute.xlu0 %220  ;;  %v175_v63 = vld [vmem:[%s7394_s2 + $0x1c0] sm:$0xff] }
  0xa4   :  { %v5039_v47 = vpop.f32.mrf.mxu1 }
  0xa5   :  { %7517 = vst [vmem:[#allocation9_spill] sm:$0xff] %v4939_v49  ;;  %3998 = vmatmul.msk.f32.gmra.mxu0 %vm503_vm0, %v67_v48  ;;  %v7405_v54 = vmax.f32 %v4939_v49, 0.0  ;;  %v73_v48 = vld [vmem:[%s7393_s1 + $0xc0] sm:$0xff] }
  0xa8   :  { %986 = vperm.xlu2 %4487, %v7405_v54   ;;  %v77_v54 = vld [vmem:[%s7393_s1 + $0xe0] sm:$0xff] }
  0xa9   :  { %500 = vperm.xlu1 %4486, %v182_v53   ;;  %405 = vperm.xlu0 %4485, %v163_v55  }
  0xaa   :  { %v722_v56 = vpop.f32.mrf.mxu0  ;;  %v4962_v60 = vpop.permute.xlu2 %300 }
  0xab   :  { %v4960_v59 = vpop.permute.xlu1 %315  ;;  %v4964_v61 = vpop.permute.xlu0 %240  ;;  %v4982_v7 = vadd.f32 %v722_v56, %v4860_v18 }
  0xad   :  { %3999 = vmatmul.msk.f32.gmra.mxu0 %vm503_vm0, %v68_v58  ;;  %7518 = vst [vmem:[#allocation10_spill] sm:$0xff] %v4982_v7  ;;  %v7404_v9 = vmax.f32 %v4982_v7, 0.0 }
  0xb0   :  { %485 = vperm.xlu2 %4487, %v179_v62  }
  0xb1   :  { %465 = vperm.xlu1 %4486, %v175_v63   ;;  %425 = vperm.xlu0 %4485, %v167_v1   ;;  %v5058_v63 = vpop.f32.mrf.mxu1 }
  0xb2   :  { %v725_v2 = vpop.f32.mrf.mxu0  ;;  %v226_v6 = vpop.permute.xlu2 %225  ;;  %7523 = vst [vmem:[#allocation15_spill] sm:$0xff] %v5058_v63 }
  0xb3   :  { %v4979_v4 = vpop.permute.xlu1 %335  ;;  %v4984_v8 = vpop.permute.xlu0 %260 }
  0xb5   :  { %4000 = vmatmul.msk.f32.gmra.mxu0 %vm503_vm0, %v69_v3 }
  0xb9   :  { %991 = vperm.xlu0 %4485, %v7404_v9  }
  0xba   :  { %v728_v12 = vpop.f32.mrf.mxu0  ;;  %v4995_v15 = vpop.permute.xlu2 %470 }
  0xbb   :  { %v4993_v14 = vpop.permute.xlu1 %355  ;;  %v4997_v16 = vpop.permute.xlu0 %280 }
  0xbd   :  { %4001 = vmatmul.msk.f32.gmra.mxu0 %vm503_vm0, %v70_v13 }
  0xc2   :  { %v731_v18 = vpop.f32.mrf.mxu0  ;;  %v5006_v23 = vpop.permute.xlu2 %415 }
  0xc3   :  { %v5004_v21 = vadd.f32 %v731_v18, %v4881_v26  ;;  %v206_v22 = vpop.permute.xlu1 %205  ;;  %v186_v28 = vpop.permute.xlu0 %185  ;;  %v5024_v26 = vadd.f32 %v728_v12, %v4862_v19 }
  0xc4   :  { %v5008_v27 = vadd.f32 %v725_v2, %v206_v22  ;;  %v5012_v31 = vadd.f32 %v4893_v30, %v186_v28  ;;  %v74_v2 = vld [vmem:[%s7393_s1 + $0xc8] sm:$0xff]  ;;  %v75_v22 = vld [vmem:[%s7393_s1 + $0xd0] sm:$0xff] }
  0xc5   :  { %7519 = vst [vmem:[#allocation11_spill] sm:$0xff] %v5004_v21  ;;  %v7410_v29 = vmax.f32 %v5004_v21, 0.0  ;;  %4002 = vmatmul.msk.f32.gmra.mxu0 %vm503_vm0, %v71_v20  ;;  %v7413_v46 = vmax.f32 %v5024_v26, 0.0 }
  0xc6   :  { %7520 = vst [vmem:[#allocation12_spill] sm:$0xff] %v5012_v31  ;;  %v7414_v35 = vmax.f32 %v5008_v27, 0.0  ;;  %v7411_v36 = vmax.f32 %v5012_v31, 0.0 }
  0xc7   :  { %1017 = vperm.xlu0 %4485, %v7410_v29   ;;  %7521 = vst [vmem:[#allocation13_spill] sm:$0xff] %v5024_v26 }
  0xc8   :  { %1007 = vperm.xlu2 %4487, %v7414_v35   ;;  %976 = vperm.xlu1 %4486, %v7411_v36  }
  0xca   :  { %v5026_v30 = vpop.f32.mrf.mxu0  ;;  %v5033_v39 = vpop.permute.xlu2 %360 }
  0xcb   :  { %v5031_v38 = vpop.permute.xlu1 %450  ;;  %v5035_v44 = vpop.permute.xlu0 %375 }
  0xcd   :  { %4003 = vmatmul.msk.f32.gmra.mxu0 %vm503_vm0, %v72_v37 }
  0xd0   :  { %1012 = vperm.xlu2 %4487, %v7413_v46  }
  0xd2   :  { %v737_v19 = vpop.f32.mrf.mxu0  ;;  %v5050_v56 = vpop.permute.xlu2 %380 }
  0xd3   :  { %v5046_v53 = vadd.f32 %v737_v19, %v226_v6  ;;  %v5048_v55 = vpop.permute.xlu1 %395  ;;  %v5052_v58 = vpop.permute.xlu0 %320 }
  0xd5   :  { %7522 = vst [vmem:[#allocation14_spill] sm:$0xff] %v5046_v53  ;;  %v7412_v62 = vmax.f32 %v5046_v53, 0.0  ;;  %4004 = vmatmul.msk.f32.gmra.mxu0 %vm503_vm0, %v73_v48 }
  0xd7   :  { %1038 = vperm.xlu0 %4485, %v7412_v62  }
  0xda   :  { %v740_v1 = vpop.f32.mrf.mxu0  ;;  %v5072_v18 = vpop.permute.xlu2 %400 }
  0xdb   :  { %v5064_v3 = vadd.f32 %v740_v1, %v4841_v10  ;;  %v5066_v6 = vpop.permute.xlu1 %340  ;;  %v5068_v12 = vpop.permute.xlu0 %245 }
  0xdc   :  { %v896_v10 = vpop.f32.mrf.mxu1 }
  0xdd   :  { %7524 = vst [vmem:[#allocation16_spill] sm:$0xff] %v5064_v3  ;;  %v7406_v13 = vmax.f32 %v5064_v3, 0.0  ;;  %4005 = vmatmul.msk.f32.gmra.mxu0 %vm503_vm0, %v74_v2 }
  0xdf   :  { %1043 = vperm.xlu2 %4487, %v7406_v13  }
  0xe2   :  { %v743_v20 = vpop.f32.mrf.mxu0  ;;  %v5089_v0 = vpop.permute.xlu2 %420 }
  0xe3   :  { %v5080_v28 = vadd.f32 %v743_v20, %v4826_v5  ;;  %v266_v37 = vpop.permute.xlu1 %265  ;;  %v491_v19 = vpop.permute.xlu0 %490  ;;  %v76_v20 = vld [vmem:[%s7393_s1 + $0xd8] sm:$0xff] }
  0xe4   :  { %v5084_v1 = vadd.f32 %v896_v10, %v491_v19  ;;  %v899_v46 = vpop.f32.mrf.mxu1 }
  0xe5   :  { %7525 = vst [vmem:[#allocation17_spill] sm:$0xff] %v5080_v28  ;;  %v7408_v48 = vmax.f32 %v5080_v28, 0.0  ;;  %4006 = vmatmul.msk.f32.gmra.mxu0 %vm503_vm0, %v75_v22 }
  0xe6   :  { %7526 = vst [vmem:[#allocation18_spill] sm:$0xff] %v5084_v1  ;;  %v7407_v2 = vmax.f32 %v5084_v1, 0.0  ;;  %v112_v1 = vld [vmem:[%s7393_s1 + $0x1f8] sm:$0xff] }
  0xe7   :  { %1048 = vperm.xlu0 %4485, %v7408_v48   ;;  %4043 = vmatmul.msk.f32.gmra.mxu1 %vm503_vm0, %v112_v1 }
  0xe8   :  { %1446 = vperm.xlu1 %4486, %v7407_v2  }
  0xea   :  { %v746_v5 = vpop.f32.mrf.mxu0  ;;  %v5101_v10 = vpop.permute.xlu2 %440 }
  0xeb   :  { %v5096_v9 = vpop.permute.xlu0 %435  ;;  %v5098_v22 = vpop.permute.xlu1 %285 }
  0xed   :  { %4007 = vmatmul.msk.f32.gmra.mxu0 %vm503_vm0, %v76_v20 }
  0xf2   :  { %v749_v19 = vpop.f32.mrf.mxu0  ;;  %v5114_v29 = vpop.permute.xlu2 %385 }
  0xf3   :  { %v5106_v13 = vpop.permute.xlu0 %455  ;;  %v5109_v2 = vpop.permute.xlu1 %305 }
  0xf5   :  { %4008 = vmatmul.msk.f32.gmra.mxu0 %vm503_vm0, %v77_v54  ;;  %v79_v54 = vld [vmem:[%s7393_s1 + $0xf0] sm:$0xff] }
  0xfa   :  { %v752_v48 = vpop.f32.mrf.mxu0  ;;  %v5135_v3 = vpop.permute.xlu2 %445 }
  0xfb   :  { %v5116_v20 = vpop.permute.xlu0 %475  ;;  %v5119_v36 = vpop.permute.xlu1 %325 }
  0xfd   :  { %4009 = vmatmul.msk.f32.gmra.mxu0 %vm503_vm0, %v78_v45 }
 0x102   :  { %v755_v62 = vpop.f32.mrf.mxu0 }
 0x103   :  { %v5125_v35 = vadd.f32 %v755_v62, %v4898_v32  ;;  %v496_v7 = vpop.permute.xlu0 %495  ;;  %v80_v62 = vld [vmem:[%s7393_s1 + $0xf8] sm:$0xff] }
 0x104   :  { %v5132_v49 = vadd.f32 %v899_v46, %v496_v7  ;;  %v5147_v7 = vadd.f32 %v5026_v30, %v4945_v52  ;;  %v5149_v46 = vpop.permute.xlu1 %345  ;;  %v5163_v52 = vadd.f32 %v746_v5, %v4964_v61 }
 0x105   :  { %7527 = vst [vmem:[#allocation19_spill] sm:$0xff] %v5125_v35  ;;  %v7420_v45 = vmax.f32 %v5125_v35, 0.0  ;;  %4010 = vmatmul.msk.f32.gmra.mxu0 %vm503_vm0, %v79_v54 }
 0x106   :  { %7528 = vst [vmem:[#allocation20_spill] sm:$0xff] %v5132_v49  ;;  %v7421_v28 = vmax.f32 %v5132_v49, 0.0  ;;  %v7425_v54 = vmax.f32 %v5147_v7, 0.0  ;;  %v81_v49 = vld [vmem:[%s7393_s1 + $0x100] sm:$0xff] }
 0x107   :  { %1079 = vperm.xlu2 %4487, %v7420_v45   ;;  %7529 = vst [vmem:[#allocation21_spill] sm:$0xff] %v5147_v7  ;;  %v5155_v45 = vpop.permute.xlu2 %986 }
 0x108   :  { %1451 = vperm.xlu1 %4486, %v7421_v28   ;;  %7530 = vst [vmem:[#allocation22_spill] sm:$0xff] %v5163_v52 }
 0x10a   :  { %v758_v32 = vpop.f32.mrf.mxu0 }
 0x10b   :  { %v5151_v1 = vpop.permute.xlu0 %365  ;;  %v5226_v53 = vadd.f32 %v758_v32, %v4984_v8  ;;  %v85_v8 = vld [vmem:[%s7393_s1 + $0x120] sm:$0xff] }
 0x10d   :  { %4011 = vmatmul.msk.f32.gmra.mxu0 %vm503_vm0, %v80_v62  ;;  %v5169_v62 = vpop.permute.xlu1 %460  ;;  %7539 = vst [vmem:[#allocation31_spill] sm:$0xff] %v5226_v53  ;;  %v7443_v63 = vmax.f32 %v5226_v53, 0.0 }
 0x10f   :  { %v5176_v7 = vpop.permute.xlu2 %485 }
 0x110   :  { %1022 = vperm.xlu1 %4486, %v7425_v54   ;;  %v7429_v54 = vmax.f32 %v5163_v52, 0.0  ;;  %7532 = vst [vmem:[#allocation24_spill] sm:$0xff] %v5176_v7 }
 0x112   :  { %v761_v28 = vpop.f32.mrf.mxu0 }
 0x113   :  { %v5165_v30 = vadd.f32 %v761_v28, %v266_v37  ;;  %v5167_v35 = vpop.permute.xlu0 %480  ;;  %v82_v28 = vld [vmem:[%s7393_s1 + $0x108] sm:$0xff]  ;;  %v5184_v37 = vadd.f32 %v749_v19, %v5068_v12 }
 0x115   :  { %7531 = vst [vmem:[#allocation23_spill] sm:$0xff] %v5165_v30  ;;  %v7428_v40 = vmax.f32 %v5165_v30, 0.0  ;;  %4012 = vmatmul.msk.f32.gmra.mxu0 %vm503_vm0, %v81_v49  ;;  %v982_v52 = vpop.permute.xlu1 %981 }
 0x116   :  { %7533 = vst [vmem:[#allocation25_spill] sm:$0xff] %v5184_v37 }
 0x117   :  { %1100 = vperm.xlu2 %4487, %v7428_v40   ;;  %v7432_v40 = vmax.f32 %v5184_v37, 0.0  ;;  %v7440_v37 = vmov 0.0  }
 0x118   :  { %1053 = vperm.xlu1 %4486, %v7429_v54   ;;  %v969_v54 = vlaneseq }
 0x11a   :  { %v764_v61 = vpop.f32.mrf.mxu0 }
 0x11b   :  { %v5187_v49 = vadd.f32 %v764_v61, %v4792_v57  ;;  %v5190_v21 = vpop.permute.xlu0 %405  ;;  %v83_v57 = vld [vmem:[%s7393_s1 + $0x110] sm:$0xff]  ;;  %v5202_v61 = vadd.f32 %v752_v48, %v4858_v17 }
 0x11d   :  { %7534 = vst [vmem:[#allocation26_spill] sm:$0xff] %v5187_v49  ;;  %v7433_v5 = vmax.f32 %v5187_v49, 0.0  ;;  %4013 = vmatmul.msk.f32.gmra.mxu0 %vm503_vm0, %v82_v28  ;;  %v5204_v28 = vand.u32 127, %v969_v54  ;;  %v7438_v31 = vmax.f32 %v5202_v61, 0.0  ;;  %v84_v49 = vld [vmem:[%s7393_s1 + $0x118] sm:$0xff] }
 0x11e   :  { %7535 = vst [vmem:[#allocation27_spill] sm:$0xff] %v5202_v61 }
 0x11f   :  { %1105 = vperm.xlu0 %4485, %v7433_v5   ;;  %vm971_vm1 = vcmp.eq.s32.totalorder %v5204_v28, 0  ;;  %vm1002_vm2 = vcmp.eq.s32.totalorder %v5204_v28, 1  ;;  %v5212_v5 = vpop.permute.xlu1 %500  ;;  %vm1033_vm3 = vcmp.eq.s32.totalorder %v5204_v28, 2  ;;  %vm1064_vm4 = vcmp.eq.s32.totalorder %v5204_v28, 3 }
 0x120   :  { %1069 = vperm.xlu1 %4486, %v7432_v40   ;;  %v5217_v17 = vsel %vm971_vm1, 1.0, %v7440_v37  ;;  %v5220_v48 = vsel %vm1002_vm2, 1.0, %v7440_v37  ;;  %vm1095_vm5 = vcmp.eq.s32.totalorder %v5204_v28, 4  ;;  %vm1126_vm6 = vcmp.eq.s32.totalorder %v5204_v28, 5 }
 0x121   :  { %7537 = vst [vmem:[#allocation29_spill] sm:$0xff] %v5217_v17  ;;  %v995_v26 = vmul.f32 %v5217_v17, %v982_v52  ;;  %vm1157_vm7 = vcmp.eq.s32.totalorder %v5204_v28, 6  ;;  %vm1188_vm8 = vcmp.eq.s32.totalorder %v5204_v28, 7  ;;  %vm1219_vm9 = vcmp.eq.s32.totalorder %v5204_v28, 8 }
 0x122   :  { %v767_v12 = vpop.f32.mrf.mxu0  ;;  %v1008_v19 = vpop.permute.xlu2 %1007  ;;  %7538 = vst [vmem:[#allocation30_spill] sm:$0xff] %v5220_v48  ;;  %vm1250_vm10 = vcmp.eq.s32.totalorder %v5204_v28, 9  ;;  %vm1281_vm11 = vcmp.eq.s32.totalorder %v5204_v28, 10  ;;  %vm1312_vm12 = vcmp.eq.s32.totalorder %v5204_v28, 11  ;;  %vm1343_vm13 = vcmp.eq.s32.totalorder %v5204_v28, 12 }
 0x123   :  { %v5210_v40 = vpop.permute.xlu0 %425  ;;  %v5242_v32 = vadd.f32 %v767_v12, %v4923_v43  ;;  %vm1374_vm14 = vcmp.eq.s32.totalorder %v5204_v28, 13  ;;  %vm1405_vm15 = vcmp.eq.s32.totalorder %v5204_v28, 14  ;;  %vm1469_vm1 = vcmask 130048  }
 0x124   :  { %7536 = vst [vmem:[#allocation28_spill] sm:$0xff] %v5210_v40  ;;  %v1025_v40 = vmul.f32 %v5220_v48, %v1008_v19  ;;  %vm1785_vm2 = vcmask 261120  }
 0x125   :  { %4014 = vmatmul.msk.f32.gmra.mxu0 %vm503_vm0, %v83_v57  ;;  %7541 = vst [vmem:[#allocation33_spill] sm:$0xff] %v5242_v32  ;;  %v7448_v52 = vmax.f32 %v5242_v32, 0.0 }
 0x127   :  { %v5236_v7 = vpop.permute.xlu1 %465 }
 0x128   :  { %1074 = vperm.xlu1 %4486, %v7438_v31   ;;  %7540 = vst [vmem:[#allocation32_spill] sm:$0xff] %v5236_v7 }
 0x12a   :  { %v770_v54 = vpop.f32.mrf.mxu0  ;;  %v1013_v57 = vpop.permute.xlu2 %1012 }
 0x12b   :  { %v1026_v31 = vmul.f32 %v5220_v48, %v1013_v57  ;;  %v5232_v37 = vpop.permute.xlu0 %991  ;;  %v5266_v53 = vadd.f32 %v770_v54, %v4997_v16  ;;  %v87_v16 = vld [vmem:[%s7393_s1 + $0x130] sm:$0xff] }
 0x12d   :  { %v1030_v61 = vadd.f32 %v1026_v31, %v995_v26  ;;  %4015 = vmatmul.msk.f32.gmra.mxu0 %vm503_vm0, %v84_v49  ;;  %v7543_v49 = vmov 0.0  }
 0x12e   :  { %v5254_v57 = vsel %vm1033_vm3, 1.0, %v7543_v49  ;;  %vm1879_vm3 = vcmask 523264  }
 0x12f   :  { %7544 = vst [vmem:[#allocation35_spill] sm:$0xff] %v5254_v57 }
 0x130   :  { %1084 = vperm.xlu1 %4486, %v7443_v63  }
 0x132   :  { %v773_v30 = vpop.f32.mrf.mxu0 }
 0x133   :  { %v5245_v31 = vadd.f32 %v773_v30, %v5098_v22  ;;  %v996_v22 = vmul.f32 %v5217_v17, %v5155_v45 }
 0x135   :  { %7542 = vst [vmem:[#allocation34_spill] sm:$0xff] %v5245_v31  ;;  %v7444_v26 = vmax.f32 %v5245_v31, 0.0  ;;  %4016 = vmatmul.msk.f32.gmra.mxu0 %vm503_vm0, %v85_v8 }
 0x137   :  { %1131 = vperm.xlu2 %4487, %v7444_v26   ;;  %v86_v26 = vld [vmem:[%s7393_s1 + $0x128] sm:$0xff] }
 0x138   :  { %1110 = vperm.xlu1 %4486, %v7448_v52  }
 0x139   :  { %v1018_v63 = vpop.permute.xlu0 %1017  ;;  %v1044_v43 = vpop.permute.xlu2 %1043 }
 0x13a   :  { %v1027_v30 = vmul.f32 %v5220_v48, %v1018_v63  ;;  %v1057_v12 = vmul.f32 %v5254_v57, %v1044_v43  ;;  %v776_v8 = vpop.f32.mrf.mxu0  ;;  %v977_v31 = vpop.permute.xlu1 %976  ;;  %v7450_v43 = vmax.f32 %v5266_v53, 0.0 }
 0x13b   :  { %v994_v45 = vmul.f32 %v5217_v17, %v977_v31  ;;  %v5280_v19 = vadd.f32 %v776_v8, %v4877_v24  ;;  %v89_v8 = vld [vmem:[%s7393_s1 + $0x140] sm:$0xff] }
 0x13c   :  { %v1031_v32 = vadd.f32 %v1027_v30, %v996_v22  ;;  %v5269_v52 = vadd.f32 %v1057_v12, %v1030_v61 }
 0x13d   :  { %4017 = vmatmul.msk.f32.gmra.mxu0 %vm503_vm0, %v86_v26  ;;  %v1029_v63 = vadd.f32 %v1025_v40, %v994_v45  ;;  %v7457_v40 = vmax.f32 %v5280_v19, 0.0 }
 0x140   :  { %1115 = vperm.xlu1 %4486, %v7450_v43  }
 0x142   :  { %v779_v7 = vpop.f32.mrf.mxu0 }
 0x143   :  { %v5283_v61 = vadd.f32 %v779_v7, %v4941_v50  ;;  %v88_v50 = vld [vmem:[%s7393_s1 + $0x138] sm:$0xff] }
 0x145   :  { %v7452_v54 = vmax.f32 %v5283_v61, 0.0  ;;  %4018 = vmatmul.msk.f32.gmra.mxu0 %vm503_vm0, %v87_v16 }
 0x147   :  { %1141 = vperm.xlu2 %4487, %v7452_v54  }
 0x148   :  { %1136 = vperm.xlu1 %4486, %v7457_v40  }
 0x149   :  { %v1039_v31 = vpop.permute.xlu0 %1038 }
 0x14a   :  { %v1056_v26 = vmul.f32 %v5254_v57, %v1039_v31  ;;  %v782_v24 = vpop.f32.mrf.mxu0 }
 0x14b   :  { %v5297_v7 = vadd.f32 %v782_v24, %v4962_v60 }
 0x14c   :  { %v5299_v22 = vadd.f32 %v1056_v26, %v1029_v63  ;;  %v90_v26 = vld [vmem:[%s7393_s1 + $0x148] sm:$0xff] }
 0x14d   :  { %v7449_v30 = vmax.f32 %v5297_v7, 0.0  ;;  %4019 = vmatmul.msk.f32.gmra.mxu0 %vm503_vm0, %v88_v50 }
 0x14f   :  { %1146 = vperm.xlu0 %4485, %v7449_v30  }
 0x152   :  { %v785_v12 = vpop.f32.mrf.mxu0 }
 0x153   :  { %v5309_v45 = vadd.f32 %v785_v12, %v5109_v2  ;;  %v5328_v12 = vsel %vm1064_vm4, 1.0, %v7543_v49 }
 0x155   :  { %v7458_v60 = vmax.f32 %v5309_v45, 0.0  ;;  %4020 = vmatmul.msk.f32.gmra.mxu0 %vm503_vm0, %v89_v8 }
 0x157   :  { %1162 = vperm.xlu2 %4487, %v7458_v60  }
 0x159   :  { %v1049_v63 = vpop.permute.xlu0 %1048 }
 0x15a   :  { %v1058_v16 = vmul.f32 %v5254_v57, %v1049_v63  ;;  %v788_v31 = vpop.f32.mrf.mxu0 }
 0x15b   :  { %v5320_v24 = vadd.f32 %v788_v31, %v4902_v34  ;;  %v91_v34 = vld [vmem:[%s7393_s1 + $0x150] sm:$0xff] }
 0x15c   :  { %v1062_v2 = vadd.f32 %v1058_v16, %v1031_v32 }
 0x15d   :  { %v7454_v50 = vmax.f32 %v5320_v24, 0.0  ;;  %4021 = vmatmul.msk.f32.gmra.mxu0 %vm503_vm0, %v90_v26 }
 0x15f   :  { %1167 = vperm.xlu1 %4486, %v7454_v50  }
 0x161   :  { %v1080_v8 = vpop.permute.xlu2 %1079 }
 0x162   :  { %v1089_v63 = vmul.f32 %v5328_v12, %v1080_v8  ;;  %v791_v30 = vpop.f32.mrf.mxu0  ;;  %v92_v8 = vld [vmem:[%s7393_s1 + $0x158] sm:$0xff] }
 0x163   :  { %v5335_v32 = vadd.f32 %v791_v30, %v4960_v59  ;;  %v5353_v30 = vpop.permute.xlu1 %1446 }
 0x164   :  { %v5337_v16 = vadd.f32 %v1089_v63, %v1062_v2  ;;  %v93_v63 = vld [vmem:[%s7393_s1 + $0x160] sm:$0xff] }
 0x165   :  { %v7453_v31 = vmax.f32 %v5335_v32, 0.0  ;;  %4022 = vmatmul.msk.f32.gmra.mxu0 %vm503_vm0, %v91_v34 }
 0x167   :  { %1172 = vperm.xlu2 %4487, %v7453_v31  }
 0x16a   :  { %v794_v26 = vpop.f32.mrf.mxu0 }
 0x16b   :  { %v5347_v43 = vadd.f32 %v794_v26, %v5052_v58 }
 0x16d   :  { %7545 = vst [vmem:[#allocation36_spill] sm:$0xff] %v5347_v43  ;;  %v7451_v59 = vmax.f32 %v5347_v43, 0.0  ;;  %4023 = vmatmul.msk.f32.gmra.mxu0 %vm503_vm0, %v92_v8  ;;  %v94_v8 = vld [vmem:[%s7393_s1 + $0x168] sm:$0xff] }
 0x16f   :  { %1177 = vperm.xlu1 %4486, %v7451_v59  }
 0x172   :  { %v797_v2 = vpop.f32.mrf.mxu0 }
 0x173   :  { %v5359_v34 = vadd.f32 %v797_v2, %v5119_v36 }
 0x175   :  { %v7455_v58 = vmax.f32 %v5359_v34, 0.0  ;;  %4024 = vmatmul.msk.f32.gmra.mxu0 %vm503_vm0, %v93_v63  ;;  %v95_v63 = vld [vmem:[%s7393_s1 + $0x170] sm:$0xff] }
 0x177   :  { %1193 = vperm.xlu2 %4487, %v7455_v58  }
 0x17a   :  { %v800_v26 = vpop.f32.mrf.mxu0  ;;  %v5371_v54 = vpop.permute.xlu1 %1451 }
 0x17b   :  { %v5369_v59 = vadd.f32 %v800_v26, %v4843_v11  ;;  %v997_v11 = vmul.f32 %v5217_v17, %v5232_v37 }
 0x17d   :  { %v7456_v36 = vmax.f32 %v5369_v59, 0.0  ;;  %4025 = vmatmul.msk.f32.gmra.mxu0 %vm503_vm0, %v94_v8 }
 0x17f   :  { %1198 = vperm.xlu0 %4485, %v7456_v36  }
 0x182   :  { %v803_v2 = vpop.f32.mrf.mxu0  ;;  %v1023_v50 = vpop.permute.xlu1 %1022 }
 0x183   :  { %v5381_v31 = vadd.f32 %v803_v2, %v4979_v4  ;;  %v1028_v26 = vmul.f32 %v5220_v48, %v1023_v50  ;;  %v96_v4 = vld [vmem:[%s7393_s1 + $0x178] sm:$0xff]  ;;  %v1101_v50 = vpop.permute.xlu2 %1100 }
 0x185   :  { %v7460_v58 = vmax.f32 %v5381_v31, 0.0  ;;  %4026 = vmatmul.msk.f32.gmra.mxu0 %vm503_vm0, %v95_v63  ;;  %v1032_v8 = vadd.f32 %v1028_v26, %v997_v11 }
 0x187   :  { %1203 = vperm.xlu2 %4487, %v7460_v58  }
 0x18a   :  { %v806_v36 = vpop.f32.mrf.mxu0  ;;  %v1054_v40 = vpop.permute.xlu1 %1053 }
 0x18b   :  { %v5394_v2 = vadd.f32 %v806_v36, %v5066_v6  ;;  %v1059_v37 = vmul.f32 %v5254_v57, %v1054_v40  ;;  %v97_v6 = vld [vmem:[%s7393_s1 + $0x180] sm:$0xff]  ;;  %v5407_v40 = vsel %vm1095_vm5, 1.0, %v7543_v49 }
 0x18c   :  { %7547 = vst [vmem:[#allocation38_spill] sm:$0xff] %v5407_v40  ;;  %v1118_v58 = vmul.f32 %v5407_v40, %v1101_v50 }
 0x18d   :  { %7546 = vst [vmem:[#allocation37_spill] sm:$0xff] %v5394_v2  ;;  %v7459_v60 = vmax.f32 %v5394_v2, 0.0  ;;  %4027 = vmatmul.msk.f32.gmra.mxu0 %vm503_vm0, %v96_v4  ;;  %v1063_v63 = vadd.f32 %v1059_v37, %v1032_v8  ;;  %v5414_v4 = vsel %vm1126_vm6, 1.0, %v7543_v49 }
 0x18f   :  { %1208 = vperm.xlu2 %4487, %v7459_v60  }
 0x191   :  { %v1132_v37 = vpop.permute.xlu2 %1131  ;;  %v1106_v48 = vpop.permute.xlu0 %1105 }
 0x192   :  { %v809_v11 = vpop.f32.mrf.mxu0  ;;  %v1070_v26 = vpop.permute.xlu1 %1069 }
 0x193   :  { %v5410_v36 = vadd.f32 %v809_v11, %v5149_v46  ;;  %v1087_v8 = vmul.f32 %v5328_v12, %v1070_v26  ;;  %v1149_v46 = vmul.f32 %v5414_v4, %v1132_v37  ;;  %v98_v26 = vld [vmem:[%s7393_s1 + $0x188] sm:$0xff] }
 0x195   :  { %v7477_v60 = vmax.f32 %v5410_v36, 0.0  ;;  %4028 = vmatmul.msk.f32.gmra.mxu0 %vm503_vm0, %v97_v6  ;;  %v1091_v2 = vadd.f32 %v1087_v8, %v5299_v22  ;;  %v1119_v8 = vmul.f32 %v5407_v40, %v1106_v48 }
 0x197   :  { %1224 = vperm.xlu2 %4487, %v7477_v60   ;;  %v1122_v11 = vadd.f32 %v1118_v58, %v1091_v2 }
 0x199   :  { %v1153_v17 = vadd.f32 %v1149_v46, %v1122_v11 }
 0x19a   :  { %v812_v57 = vpop.f32.mrf.mxu0  ;;  %v1075_v6 = vpop.permute.xlu1 %1074 }
 0x19b   :  { %v5427_v43 = vadd.f32 %v812_v57, %v4919_v41  ;;  %v1088_v50 = vmul.f32 %v5328_v12, %v1075_v6  ;;  %v99_v41 = vld [vmem:[%s7393_s1 + $0x190] sm:$0xff] }
 0x19d   :  { %v7471_v22 = vmax.f32 %v5427_v43, 0.0  ;;  %4029 = vmatmul.msk.f32.gmra.mxu0 %vm503_vm0, %v98_v26  ;;  %v1092_v58 = vadd.f32 %v1088_v50, %v5269_v52  ;;  %v100_v50 = vld [vmem:[%s7393_s1 + $0x198] sm:$0xff] }
 0x19f   :  { %1229 = vperm.xlu2 %4487, %v7471_v22   ;;  %v5436_v2 = vadd.f32 %v1119_v8, %v1092_v58  ;;  %v103_v22 = vld [vmem:[%s7393_s1 + $0x1b0] sm:$0xff] }
 0x1a1   :  { %v1142_v26 = vpop.permute.xlu2 %1141 }
 0x1a2   :  { %v815_v37 = vpop.f32.mrf.mxu0  ;;  %v1085_v46 = vpop.permute.xlu1 %1084 }
 0x1a3   :  { %v5442_v57 = vadd.f32 %v815_v37, %v4993_v14  ;;  %v1090_v11 = vmul.f32 %v5328_v12, %v1085_v46  ;;  %v5464_v46 = vsel %vm1157_vm7, 1.0, %v7543_v49 }
 0x1a4   :  { %7549 = vst [vmem:[#allocation40_spill] sm:$0xff] %v5464_v46 }
 0x1a5   :  { %v7470_v48 = vmax.f32 %v5442_v57, 0.0  ;;  %4030 = vmatmul.msk.f32.gmra.mxu0 %vm503_vm0, %v99_v41  ;;  %v1094_v52 = vadd.f32 %v1090_v11, %v1063_v63  ;;  %v1151_v63 = vmul.f32 %v5414_v4, %v1142_v26 }
 0x1a7   :  { %1234 = vperm.xlu2 %4487, %v7470_v48  }
 0x1aa   :  { %v818_v6 = vpop.f32.mrf.mxu0  ;;  %v1111_v8 = vpop.permute.xlu1 %1110 }
 0x1ab   :  { %v5453_v14 = vadd.f32 %v818_v6, %v5033_v39  ;;  %v1120_v58 = vmul.f32 %v5407_v40, %v1111_v8 }
 0x1ad   :  { %7548 = vst [vmem:[#allocation39_spill] sm:$0xff] %v5453_v14  ;;  %v7469_v37 = vmax.f32 %v5453_v14, 0.0  ;;  %4031 = vmatmul.msk.f32.gmra.mxu0 %vm503_vm0, %v100_v50  ;;  %v1124_v41 = vadd.f32 %v1120_v58, %v5337_v16  ;;  %v101_v50 = vld [vmem:[%s7393_s1 + $0x1a0] sm:$0xff] }
 0x1af   :  { %1239 = vperm.xlu0 %4485, %v7469_v37   ;;  %v5466_v39 = vadd.f32 %v1151_v63, %v1124_v41  ;;  %v102_v41 = vld [vmem:[%s7393_s1 + $0x1a8] sm:$0xff] }
 0x1b1   :  { %v1163_v11 = vpop.permute.xlu2 %1162 }
 0x1b2   :  { %v1180_v6 = vmul.f32 %v5464_v46, %v1163_v11  ;;  %v821_v8 = vpop.f32.mrf.mxu0  ;;  %v1116_v11 = vpop.permute.xlu1 %1115 }
 0x1b3   :  { %v5473_v26 = vadd.f32 %v821_v8, %v5151_v1 }
 0x1b4   :  { %v1184_v16 = vadd.f32 %v1180_v6, %v1153_v17  ;;  %v1121_v17 = vmul.f32 %v5407_v40, %v1116_v11 }
 0x1b5   :  { %v7475_v58 = vmax.f32 %v5473_v26, 0.0  ;;  %4032 = vmatmul.msk.f32.gmra.mxu0 %vm503_vm0, %v101_v50 }
 0x1b6   :  { %v1125_v8 = vadd.f32 %v1121_v17, %v1094_v52  ;;  %v104_v17 = vld [vmem:[%s7393_s1 + $0x1b8] sm:$0xff] }
 0x1b7   :  { %1255 = vperm.xlu1 %4486, %v7475_v58  }
 0x1ba   :  { %v824_v63 = vpop.f32.mrf.mxu0 }
 0x1bb   :  { %v5483_v37 = vadd.f32 %v824_v63, %v4879_v25 }
 0x1bd   :  { %v7474_v1 = vmax.f32 %v5483_v37, 0.0  ;;  %4033 = vmatmul.msk.f32.gmra.mxu0 %vm503_vm0, %v102_v41 }
 0x1bf   :  { %1260 = vperm.xlu0 %4485, %v7474_v1  }
 0x1c1   :  { %v1147_v6 = vpop.permute.xlu0 %1146  ;;  %v5503_v52 = vpop.permute.xlu2 %1172 }
 0x1c2   :  { %v1152_v50 = vmul.f32 %v5414_v4, %v1147_v6  ;;  %v827_v48 = vpop.f32.mrf.mxu0 }
 0x1c3   :  { %v5495_v25 = vadd.f32 %v827_v48, %v5035_v44 }
 0x1c4   :  { %v5497_v63 = vadd.f32 %v1152_v50, %v1125_v8 }
 0x1c5   :  { %v7472_v41 = vmax.f32 %v5495_v25, 0.0  ;;  %4034 = vmatmul.msk.f32.gmra.mxu0 %vm503_vm0, %v103_v22  ;;  %v5517_v22 = vsel %vm1188_vm8, 1.0, %v7543_v49 }
 0x1c7   :  { %1265 = vperm.xlu1 %4486, %v7472_v41   ;;  %v106_v41 = vld [vmem:[%s7393_s1 + $0x1c8] sm:$0xff] }
 0x1ca   :  { %v830_v11 = vpop.f32.mrf.mxu0 }
 0x1cb   :  { %v5509_v6 = vadd.f32 %v830_v11, %v5050_v56  ;;  %v105_v56 = vld [vmem:[%s7393_s1 + $0x1c0] sm:$0xff] }
 0x1cd   :  { %v7473_v44 = vmax.f32 %v5509_v6, 0.0  ;;  %4035 = vmatmul.msk.f32.gmra.mxu0 %vm503_vm0, %v104_v17 }
 0x1cf   :  { %1270 = vperm.xlu0 %4485, %v7473_v44  }
 0x1d1   :  { %v1194_v48 = vpop.permute.xlu2 %1193 }
 0x1d2   :  { %v1211_v8 = vmul.f32 %v5517_v22, %v1194_v48  ;;  %v5520_v50 = vpop.f32.mrf.mxu0 }
 0x1d4   :  { %v5525_v11 = vadd.f32 %v1211_v8, %v1184_v16  ;;  %v107_v16 = vld [vmem:[%s7393_s1 + $0x1d0] sm:$0xff]  ;;  %v1137_v8 = vpop.permute.xlu1 %1136 }
 0x1d5   :  { %4036 = vmatmul.msk.f32.gmra.mxu0 %vm503_vm0, %v105_v56 }
 0x1da   :  { %v836_v17 = vpop.f32.mrf.mxu0 }
 0x1db   :  { %v5532_v44 = vadd.f32 %v836_v17, %v4900_v33 }
 0x1dd   :  { %v7476_v48 = vmax.f32 %v5532_v44, 0.0  ;;  %4037 = vmatmul.msk.f32.gmra.mxu0 %vm503_vm0, %v106_v41  ;;  %v1168_v41 = vpop.permute.xlu1 %1167 }
 0x1de   :  { %v1181_v14 = vmul.f32 %v5464_v46, %v1168_v41 }
 0x1df   :  { %1291 = vperm.xlu0 %4485, %v7476_v48   ;;  %v1150_v48 = vmul.f32 %v5414_v4, %v1137_v8 }
 0x1e2   :  { %v839_v1 = vpop.f32.mrf.mxu0 }
 0x1e3   :  { %v5542_v56 = vadd.f32 %v839_v1, %v5048_v55  ;;  %v1154_v55 = vadd.f32 %v1150_v48, %v5436_v2  ;;  %v5578_v48 = vpop.permute.xlu2 %1203 }
 0x1e5   :  { %7550 = vst [vmem:[#allocation41_spill] sm:$0xff] %v5542_v56  ;;  %v7479_v58 = vmax.f32 %v5542_v56, 0.0  ;;  %4038 = vmatmul.msk.f32.gmra.mxu0 %vm503_vm0, %v107_v16  ;;  %v1185_v16 = vadd.f32 %v1181_v14, %v1154_v55  ;;  %vm1436_vm0 = vcmp.eq.s32.totalorder %v5204_v28, 15 }
 0x1e7   :  { %1296 = vperm.xlu2 %4487, %v7479_v58  }
 0x1ea   :  { %v842_v33 = vpop.f32.mrf.mxu0 }
 0x1eb   :  { %v5549_v17 = vadd.f32 %v842_v33, %v5072_v18 }
 0x1ed   :  { %7551 = vst [vmem:[#allocation42_spill] sm:$0xff] %v5549_v17  ;;  %v7483_v60 = vmax.f32 %v5549_v17, 0.0 }
 0x1ef   :  { %1301 = vperm.xlu0 %4485, %v7483_v60  }
 0x1f1   :  { %v1199_v1 = vpop.permute.xlu0 %1198 }
 0x1f2   :  { %v1212_v58 = vmul.f32 %v5517_v22, %v1199_v1  ;;  %v845_v56 = vpop.f32.mrf.mxu0 }
 0x1f4   :  { %v5558_v40 = vadd.f32 %v1212_v58, %v1185_v16  ;;  %v1209_v16 = vpop.permute.xlu2 %1208 }
 0x1fa   :  { %v848_v18 = vpop.f32.mrf.mxu0 }
 0x1fb   :  { %v5561_v33 = vadd.f32 %v848_v18, %v4921_v42 }
 0x1fd   :  { %v7486_v8 = vmax.f32 %v5561_v33, 0.0 }
 0x1ff   :  { %1322 = vperm.xlu0 %4485, %v7486_v8  }
 0x202   :  { %v851_v41 = vpop.f32.mrf.mxu0 }
 0x203   :  { %v5567_v60 = vadd.f32 %v851_v41, %v5006_v23  ;;  %v1178_v23 = vpop.permute.xlu1 %1177 }
 0x204   :  { %v1183_v41 = vmul.f32 %v5464_v46, %v1178_v23 }
 0x205   :  { %7552 = vst [vmem:[#allocation43_spill] sm:$0xff] %v5567_v60  ;;  %v7485_v2 = vmax.f32 %v5567_v60, 0.0 }
 0x207   :  { %1327 = vperm.xlu0 %4485, %v7485_v2   ;;  %v5593_v2 = vsel %vm1219_vm9, 1.0, %v7543_v49 }
 0x20a   :  { %v854_v14 = vpop.f32.mrf.mxu0 }
 0x20b   :  { %v5573_v58 = vadd.f32 %v854_v14, %v5089_v0  ;;  %v1214_v14 = vmul.f32 %v5517_v22, %v1209_v16 }
 0x20d   :  { %7553 = vst [vmem:[#allocation44_spill] sm:$0xff] %v5573_v58  ;;  %v7484_v42 = vmax.f32 %v5573_v58, 0.0 }
 0x20f   :  { %1332 = vperm.xlu0 %4485, %v7484_v42   ;;  %v1187_v42 = vadd.f32 %v1183_v41, %v5497_v63 }
 0x211   :  { %v1218_v17 = vadd.f32 %v1214_v14, %v1187_v42 }
 0x212   :  { %v5580_v55 = vpop.f32.mrf.mxu0 }
 0x21a   :  { %v860_v1 = vpop.f32.mrf.mxu0 }
 0x21b   :  { %v5583_v18 = vadd.f32 %v860_v1, %v4943_v51 }
 0x21d   :  { %v7489_v0 = vmax.f32 %v5583_v18, 0.0 }
 0x21f   :  { %1353 = vperm.xlu0 %4485, %v7489_v0  }
 0x221   :  { %v1240_v8 = vpop.permute.xlu0 %1239 }
 0x222   :  { %v1245_v51 = vmul.f32 %v5593_v2, %v1240_v8  ;;  %v863_v1 = vpop.f32.mrf.mxu0 }
 0x223   :  { %v5597_v23 = vadd.f32 %v863_v1, %v5096_v9 }
 0x224   :  { %v1249_v58 = vadd.f32 %v1245_v51, %v1218_v17 }
 0x225   :  { %7554 = vst [vmem:[#allocation45_spill] sm:$0xff] %v5597_v23  ;;  %v7490_v16 = vmax.f32 %v5597_v23, 0.0 }
 0x227   :  { %1358 = vperm.xlu1 %4486, %v7490_v16  }
 0x22a   :  { %v866_v0 = vpop.f32.mrf.mxu0 }
 0x22b   :  { %v5603_v63 = vadd.f32 %v866_v0, %v5101_v10  ;;  %v5618_v10 = vsel %vm1250_vm10, 1.0, %v7543_v49 }
 0x22d   :  { %7555 = vst [vmem:[#allocation46_spill] sm:$0xff] %v5603_v63  ;;  %v7491_v41 = vmax.f32 %v5603_v63, 0.0 }
 0x22f   :  { %1363 = vperm.xlu0 %4485, %v7491_v41  }
 0x231   :  { %v5608_v42 = vpop.permute.xlu0 %1260 }
 0x232   :  { %v869_v8 = vpop.f32.mrf.mxu0 }
 0x23a   :  { %v872_v9 = vpop.f32.mrf.mxu0 }
 0x23b   :  { %v5611_v17 = vadd.f32 %v872_v9, %v5031_v38 }
 0x23d   :  { %v7492_v14 = vmax.f32 %v5611_v17, 0.0 }
 0x23f   :  { %1384 = vperm.xlu2 %4487, %v7492_v14  }
 0x241   :  { %v1271_v0 = vpop.permute.xlu0 %1270 }
 0x242   :  { %v1276_v51 = vmul.f32 %v5618_v10, %v1271_v0  ;;  %v875_v1 = vpop.f32.mrf.mxu0  ;;  %v5636_v0 = vadd.f32 %v845_v56, %v5190_v21  ;;  %v5655_v21 = vadd.f32 %v5520_v50, %v5114_v29 }
 0x243   :  { %v5622_v16 = vadd.f32 %v875_v1, %v5106_v13 }
 0x244   :  { %v5624_v41 = vadd.f32 %v1276_v51, %v1249_v58  ;;  %v7503_v58 = vmax.f32 %v5636_v0, 0.0  ;;  %v5642_v51 = vadd.f32 %v869_v8, %v5135_v3  ;;  %v7504_v8 = vmax.f32 %v5655_v21, 0.0 }
 0x245   :  { %7556 = vst [vmem:[#allocation47_spill] sm:$0xff] %v5622_v16  ;;  %v7495_v38 = vmax.f32 %v5622_v16, 0.0 }
 0x247   :  { %1389 = vperm.xlu1 %4486, %v7495_v38   ;;  %v902_v38 = vpop.f32.mrf.mxu1 }
 0x248   :  { %v5670_v29 = vadd.f32 %v902_v38, %v5212_v5  ;;  %v7561_v5 = vld [vmem:[#allocation32_spill] sm:$0xff] }
 0x24a   :  { %v878_v9 = vpop.f32.mrf.mxu0  ;;  %7558 = vst [vmem:[#allocation49_spill] sm:$0xff] %v5670_v29  ;;  %v7500_v50 = vmax.f32 %v5670_v29, 0.0 }
 0x24b   :  { %v5630_v14 = vadd.f32 %v878_v9, %v5169_v62  ;;  %v7498_v9 = vmax.f32 %v5642_v51, 0.0 }
 0x24d   :  { %7557 = vst [vmem:[#allocation48_spill] sm:$0xff] %v5630_v14  ;;  %v7494_v23 = vmax.f32 %v5630_v14, 0.0 }
 0x24f   :  { %1394 = vperm.xlu2 %4487, %v7494_v23  }
 0x252   :  { %v881_v13 = vpop.f32.mrf.mxu0 }
 0x253   :  { %v5685_v38 = vadd.f32 %v881_v13, %v7561_v5  ;;  %v7566_v13 = vld [vmem:[#allocation15_spill] sm:$0xff] }
 0x257   :  { %1317 = vperm.xlu2 %4487, %v7503_v58  }
 0x25a   :  { %v884_v1 = vpop.f32.mrf.mxu0 }
 0x25b   :  { %v5645_v62 = vadd.f32 %v884_v1, %v4995_v15  ;;  %v1773_v15 = vld [vmem:[%s7397_s5] sm:$0xff] }
 0x25d   :  { %v7496_v23 = vmax.f32 %v5645_v62, 0.0 }
 0x25f   :  { %1415 = vperm.xlu0 %4485, %v7496_v23   ;;  %1379 = vperm.xlu2 %4487, %v7498_v9   ;;  %v4551_v23 = vmov 1  }
 0x262   :  { %v887_v3 = vpop.f32.mrf.mxu0 }
 0x263   :  { %v5658_v56 = vadd.f32 %v887_v3, %v5116_v20  ;;  %v5674_v20 = vadd.f32 %v5039_v47, %v5167_v35  ;;  %v7562_v35 = vld [vmem:[#allocation28_spill] sm:$0xff] }
 0x264   :  { %v5689_v47 = vadd.f32 %v5580_v55, %v7562_v35  ;;  %v1774_v55 = vld [vmem:[%s7397_s5 + $0x8] sm:$0xff] }
 0x265   :  { %v7497_v1 = vmax.f32 %v5658_v56, 0.0  ;;  %7559 = vst [vmem:[#allocation50_spill] sm:$0xff] %v5674_v20  ;;  %v7499_v3 = vmax.f32 %v5674_v20, 0.0 }
 0x266   :  { %v7502_v9 = vmax.f32 %v5689_v47, 0.0 }
 0x267   :  { %1286 = vperm.xlu0 %4485, %v7504_v8   ;;  %1777 = vperm.xlu2 %4487, %v1773_v15   ;;  %v7560_v15 = vmax.f32 %v5008_v27, 0.0  ;;  %v7574_v8 = vld [vmem:[#allocation26_spill] sm:$0xff] }
 0x268   :  { %1420 = vperm.xlu1 %4486, %v7497_v1   ;;  %v7501_v1 = vmax.f32 %v5685_v38, 0.0  ;;  %v7575_v20 = vmax.f32 %v7574_v8, 0.0 }
 0x26f   :  { %4489 = vset.pattern.permute.xlu2 %v4551_v23  ;;  %1456 = vperm.xlu0 %4485, %v7500_v50   ;;  %v7567_v50 = vld [vmem:[#allocation13_spill] sm:$0xff] }
 0x270   :  { %1425 = vperm.xlu1 %4486, %v7499_v3   ;;  %2556 = vperm.xlu2 %4489, %v7560_v15   ;;  %v7563_v3 = vld [vmem:[#allocation23_spill] sm:$0xff]  ;;  %v7565_v15 = vld [vmem:[#allocation24_spill] sm:$0xff] }
 0x271   :  { %v7564_v27 = vmax.f32 %v7563_v3, 0.0  ;;  %v5701_v5 = vadd.f32 %v7566_v13, %v7565_v15  ;;  %v7569_v3 = vmax.f32 %v5309_v45, 0.0  ;;  %v7572_v13 = vld [vmem:[#allocation12_spill] sm:$0xff]  ;;  %v7580_v45 = vld [vmem:[#allocation11_spill] sm:$0xff] }
 0x272   :  { %v7573_v58 = vmax.f32 %v7572_v13, 0.0 }
 0x273   :  { %v7506_v35 = vmax.f32 %v5701_v5, 0.0 }
 0x277   :  { %1410 = vperm.xlu0 %4485, %v7501_v1   ;;  %v7568_v1 = vmax.f32 %v7567_v50, 0.0 }
 0x278   :  { %1348 = vperm.xlu1 %4486, %v7502_v9   ;;  %2628 = vperm.xlu2 %4489, %v7564_v27   ;;  %v5711_v9 = vpop.permute.xlu2 %1224  ;;  %v7570_v27 = vld [vmem:[#allocation14_spill] sm:$0xff] }
 0x279   :  { %v7571_v15 = vmax.f32 %v7570_v27, 0.0  ;;  %v7582_v27 = vld [vmem:[#allocation27_spill] sm:$0xff] }
 0x27f   :  { %1782 = vperm.xlu0 %4485, %v1774_v55  }
 0x280   :  { %1441 = vperm.xlu1 %4486, %v7506_v35   ;;  %2560 = vperm.xlu2 %4489, %v7568_v1   ;;  %v1230_v55 = vpop.permute.xlu2 %1229  ;;  %v7576_v35 = vld [vmem:[#allocation34_spill] sm:$0xff]  ;;  %v7578_v1 = vld [vmem:[#allocation25_spill] sm:$0xff] }
 0x281   :  { %v7577_v50 = vmax.f32 %v7576_v35, 0.0  ;;  %v7579_v14 = vmax.f32 %v7578_v1, 0.0  ;;  %v7586_v35 = vld [vmem:[#allocation17_spill] sm:$0xff]  ;;  %v7589_v1 = vld [vmem:[#allocation16_spill] sm:$0xff] }
 0x282   :  { %v7590_v60 = vmax.f32 %v7589_v1, 0.0 }
 0x287   :  { %4490 = vset.pattern.permute.xlu0 %v4551_v23 }
 0x288   :  { %4488 = vset.pattern.permute.xlu1 %v4551_v23  ;;  %2676 = vperm.xlu2 %4489, %v7569_v3   ;;  %v1292_v23 = vpop.permute.xlu0 %1291  ;;  %v5725_v29 = vpop.permute.xlu2 %1234  ;;  %v7581_v3 = vmax.f32 %v7580_v45, 0.0 }
 0x289   :  { %2580 = vperm.xlu0 %4490, %v7571_v15   ;;  %2532 = vperm.xlu1 %4488, %v7573_v58   ;;  %v7583_v15 = vmax.f32 %v7582_v27, 0.0  ;;  %v7584_v58 = vld [vmem:[#allocation8_spill] sm:$0xff]  ;;  %v7591_v27 = vld [vmem:[#allocation19_spill] sm:$0xff] }
 0x28a   :  { %v7585_v13 = vmax.f32 %v7584_v58, 0.0  ;;  %v7593_v58 = vmax.f32 %v5280_v19, 0.0  ;;  %v1467_v19 = vld [vmem:[#allocation2] sm:$0xff] }
 0x290   :  { %2632 = vperm.xlu2 %4489, %v7575_v20   ;;  %v5733_v8 = vpop.permute.xlu0 %1301  ;;  %v5735_v20 = vpop.permute.xlu2 %1296 }
 0x291   :  { %2652 = vperm.xlu0 %4490, %v7577_v50   ;;  %2604 = vperm.xlu1 %4488, %v7579_v14   ;;  %v7587_v50 = vmax.f32 %v7586_v35, 0.0  ;;  %v7588_v14 = vmax.f32 %v5410_v36, 0.0  ;;  %v7595_v36 = vld [vmem:[#allocation33_spill] sm:$0xff] }
 0x298   :  { %2564 = vperm.xlu2 %4489, %v7581_v3   ;;  %v1323_v45 = vpop.permute.xlu0 %1322 }
 0x299   :  { %2608 = vperm.xlu0 %4490, %v7583_v15   ;;  %2536 = vperm.xlu1 %4488, %v7585_v13   ;;  %v1385_v3 = vpop.permute.xlu2 %1384  ;;  %v7592_v15 = vmax.f32 %v7591_v27, 0.0  ;;  %v7594_v13 = vmax.f32 %v5359_v34, 0.0  ;;  %v1468_v27 = vld [vmem:[#allocation2 + $0x8] sm:$0xff]  ;;  %v7600_v34 = vld [vmem:[#allocation10_spill] sm:$0xff] }
 0x29a   :  { %4474 = vmatpush.msra.mxu2 %v1468_v27  ;;  %1496 = vmatpush.msrb.mxu1 %v1468_v27  ;;  %v7606_v27 = vmax.f32 %v5655_v21, 0.0 }
 0x29c   :  { %4475 = vmatpush.msra.mxu2 %v1467_v19  ;;  %1497 = vmatpush.msrb.mxu1 %v1467_v19 }
 0x2a0   :  { %2588 = vperm.xlu2 %4489, %v7587_v50   ;;  %v5751_v35 = vpop.permute.xlu0 %1327  ;;  %v7596_v50 = vmax.f32 %v7595_v36, 0.0  ;;  %v7602_v36 = vmax.f32 %v5369_v59, 0.0  ;;  %v1243_v59 = vmul.f32 %v5593_v2, %v1230_v55  ;;  %v7607_v55 = vmax.f32 %v5335_v32, 0.0 }
 0x2a1   :  { %2724 = vperm.xlu0 %4490, %v7588_v14   ;;  %2584 = vperm.xlu1 %4488, %v7590_v60   ;;  %v7597_v60 = vmax.f32 %v5320_v24, 0.0  ;;  %v7598_v14 = vld [vmem:[#allocation9_spill] sm:$0xff]  ;;  %v7603_v24 = vmax.f32 %v5473_v26, 0.0  ;;  %v5789_v26 = vsel %vm1312_vm12, 1.0, %v7543_v49  ;;  %v1213_v32 = vmul.f32 %v5517_v22, %v5578_v48 }
 0x2a2   :  { %v7599_v1 = vmax.f32 %v7598_v14, 0.0  ;;  %v1247_v21 = vadd.f32 %v1243_v59, %v5558_v40  ;;  %v7610_v40 = vmax.f32 %v5636_v0, 0.0 }
 0x2a8   :  { %2612 = vperm.xlu2 %4489, %v7592_v15  }
 0x2a9   :  { %2656 = vperm.xlu0 %4490, %v7593_v58   ;;  %2700 = vperm.xlu1 %4488, %v7594_v13   ;;  %v5749_v16 = vpop.permute.xlu2 %1394  ;;  %v7601_v58 = vmax.f32 %v7600_v34, 0.0  ;;  %v5763_v13 = vpop.permute.xlu0 %1332 }
 0x2b0   :  { %2636 = vperm.xlu2 %4489, %v7596_v50   ;;  %v5769_v50 = vpop.permute.xlu1 %1255 }
 0x2b1   :  { %2680 = vperm.xlu0 %4490, %v7597_v60   ;;  %2540 = vperm.xlu1 %4488, %v7599_v1   ;;  %v5759_v15 = vpop.permute.xlu2 %1317  ;;  %v7604_v60 = vmax.f32 %v5483_v37, 0.0  ;;  %v1354_v14 = vpop.permute.xlu0 %1353  ;;  %v7605_v1 = vmax.f32 %v5427_v43, 0.0  ;;  %v1274_v37 = vmul.f32 %v5618_v10, %v5608_v42  ;;  %v5786_v43 = vsel %vm1281_vm11, 1.0, %v7543_v49 }
 0x2b2   :  { %v1305_v19 = vmul.f32 %v5786_v43, %v1292_v23  ;;  %v1182_v42 = vmul.f32 %v5464_v46, %v5503_v52  ;;  %v5811_v52 = vsel %vm1374_vm14, 1.0, %v7543_v49  ;;  %v1306_v28 = vmul.f32 %v5786_v43, %v5735_v20  ;;  %v1513_v20 = vld [vmem:[#allocation2 + $0x18] sm:$0xff] }
 0x2b3   :  { %v1278_v23 = vadd.f32 %v1274_v37, %v1247_v21  ;;  %v1244_v37 = vmul.f32 %v5593_v2, %v5725_v29  ;;  %v1398_v48 = vmul.f32 %v5811_v52, %v1385_v3  ;;  %v7614_v29 = vmax.f32 %v5642_v51, 0.0  ;;  %1528 = vmatpush.msrb.mxu2 %v1513_v20 }
 0x2b4   :  { %v1186_v0 = vadd.f32 %v1182_v42, %v5466_v39  ;;  %v5829_v39 = vsel %vm1436_vm0, 1.0, %v7543_v49  ;;  %v7615_v3 = vmax.f32 %v5689_v47, 0.0  ;;  %v1512_v47 = vld [vmem:[#allocation2 + $0x10] sm:$0xff]  ;;  %v7620_v20 = vmax.f32 %v5381_v31, 0.0 }
 0x2b5   :  { %7613 = vst [vmem:[#allocation32_spill] sm:$0xff] %v5829_v39  ;;  %1529 = vmatpush.msrb.mxu2 %v1512_v47 }
 0x2b6   :  { %v1217_v21 = vadd.f32 %v1213_v32, %v1186_v0 }
 0x2b8   :  { %2544 = vperm.xlu2 %4489, %v7601_v58   ;;  %v1266_v34 = vpop.permute.xlu1 %1265  ;;  %v1248_v42 = vadd.f32 %v1244_v37, %v1217_v21  ;;  %v1545_v37 = vld [vmem:[#allocation2 + $0x28] sm:$0xff] }
 0x2b9   :  { %2704 = vperm.xlu0 %4490, %v7602_v36   ;;  %2748 = vperm.xlu1 %4488, %v7603_v24   ;;  %v5777_v58 = vpop.permute.xlu2 %1379  ;;  %v5799_v36 = vsel %vm1343_vm13, 1.0, %v7543_v49  ;;  %v5801_v24 = vpop.permute.xlu0 %1363 }
 0x2ba   :  { %v1367_v63 = vmul.f32 %v5799_v36, %v1354_v14  ;;  %1560 = vmatpush.msra.mxu3 %v1545_v37 }
 0x2c0   :  { %2752 = vperm.xlu2 %4489, %v7604_v60   ;;  %v7608_v60 = vld [vmem:[#allocation21_spill] sm:$0xff]  ;;  %v1359_v59 = vpop.permute.xlu1 %1358 }
 0x2c1   :  { %2728 = vperm.xlu0 %4490, %v7605_v1   ;;  %2772 = vperm.xlu1 %4488, %v7606_v27   ;;  %v7609_v1 = vmax.f32 %v7608_v60, 0.0  ;;  %v1336_v27 = vmul.f32 %v5789_v26, %v1323_v45  ;;  %v5814_v46 = vpop.permute.xlu2 %1777  ;;  %v1275_v60 = vmul.f32 %v5618_v10, %v1266_v34 }
 0x2c3   :  { %v1279_v32 = vadd.f32 %v1275_v60, %v1248_v42  ;;  %v7618_v42 = vmax.f32 %v5283_v61, 0.0  ;;  %v1576_v61 = vld [vmem:[#allocation2 + $0x30] sm:$0xff] }
 0x2c5   :  { %v1310_v51 = vadd.f32 %v1306_v28, %v1279_v32  ;;  %v1242_v32 = vmul.f32 %v5593_v2, %v5711_v9  ;;  %v7621_v9 = vld [vmem:[#allocation22_spill] sm:$0xff] }
 0x2c6   :  { %v7622_v37 = vmax.f32 %v7621_v9, 0.0 }
 0x2c8   :  { %2684 = vperm.xlu2 %4489, %v7607_v55   ;;  %v1309_v55 = vadd.f32 %v1305_v19, %v1278_v23  ;;  %v5824_v19 = vsel %vm1405_vm15, 1.0, %v7543_v49  ;;  %v1337_v49 = vmul.f32 %v5789_v26, %v5751_v35 }
 0x2c9   :  { %2568 = vperm.xlu0 %4490, %v7609_v1   ;;  %2796 = vperm.xlu1 %4488, %v7610_v40   ;;  %v7611_v1 = vld [vmem:[#allocation31_spill] sm:$0xff] }
 0x2ca   :  { %v1340_v45 = vadd.f32 %v1336_v27, %v1309_v55  ;;  %v7612_v40 = vmax.f32 %v7611_v1, 0.0  ;;  %v1390_v27 = vpop.permute.xlu1 %1389  ;;  %v1460_v55 = vmul.f32 %v5829_v39, %v5353_v30  ;;  %v5843_v21 = vpop.permute.xlu2 %2556  ;;  %v7616_v30 = vmax.f32 %v5701_v5, 0.0 }
 0x2cb   :  { %v1399_v35 = vmul.f32 %v5811_v52, %v1390_v27  ;;  %v1461_v27 = vmul.f32 %v5829_v39, %v5371_v54  ;;  %v7619_v54 = vmax.f32 %v5583_v18, 0.0 }
 0x2cc   :  { %v1371_v14 = vadd.f32 %v1367_v63, %v1340_v45  ;;  %v1368_v45 = vmul.f32 %v5799_v36, %v1359_v59  ;;  %v1307_v59 = vmul.f32 %v5786_v43, %v5733_v8 }
 0x2ce   :  { %v1402_v23 = vadd.f32 %v1398_v48, %v1371_v14  ;;  %v1544_v48 = vld [vmem:[#allocation2 + $0x20] sm:$0xff]  ;;  %v1341_v14 = vadd.f32 %v1337_v49, %v1310_v51  ;;  %v1311_v8 = vadd.f32 %v1307_v59, %v5624_v41  ;;  %v1273_v41 = vmul.f32 %v5618_v10, %v5769_v50 }
 0x2cf   :  { %1561 = vmatpush.msra.mxu3 %v1544_v48  ;;  %v7623_v59 = vmax.f32 %v5611_v17, 0.0 }
 0x2d0   :  { %2616 = vperm.xlu2 %4489, %v7612_v40   ;;  %v1372_v1 = vadd.f32 %v1368_v45, %v1341_v14  ;;  %v7617_v40 = vmax.f32 %v5532_v44, 0.0  ;;  %v1369_v44 = vmul.f32 %v5799_v36, %v5801_v24  ;;  %v1246_v45 = vadd.f32 %v1242_v32, %v5525_v11 }
 0x2d1   :  { %2844 = vperm.xlu0 %4490, %v7614_v29   ;;  %2820 = vperm.xlu1 %4488, %v7615_v3   ;;  %v1416_v34 = vpop.permute.xlu0 %1415  ;;  %v1338_v3 = vmul.f32 %v5789_v26, %v5763_v13  ;;  %v1400_v13 = vmul.f32 %v5811_v52, %v5749_v16  ;;  %v7624_v11 = vmax.f32 %v5266_v53, 0.0 }
 0x2d2   :  { %v1429_v63 = vmul.f32 %v5824_v19, %v1416_v34  ;;  %v1403_v5 = vadd.f32 %v1399_v35, %v1372_v1  ;;  %v1277_v50 = vadd.f32 %v1273_v41, %v1246_v45  ;;  %v1335_v1 = vmul.f32 %v5789_v26, %v5759_v15  ;;  %v7631_v41 = vld [vmem:[#allocation36_spill] sm:$0xff]  ;;  %v7635_v45 = vld [vmem:[#allocation29_spill] sm:$0xff] }
 0x2d3   :  { %v1342_v49 = vadd.f32 %v1338_v3, %v1311_v8  ;;  %v7628_v8 = vmax.f32 %v5561_v33, 0.0  ;;  %v1640_v33 = vld [vmem:[#allocation2 + $0x50] sm:$0xff] }
 0x2d4   :  { %v1433_v0 = vadd.f32 %v1429_v63, %v1402_v23  ;;  %v1577_v23 = vld [vmem:[#allocation2 + $0x38] sm:$0xff] }
 0x2d5   :  { %1592 = vmatpush.msra.mxu1 %v1577_v23  ;;  %v1373_v24 = vadd.f32 %v1369_v44, %v1342_v49  ;;  %v1641_v49 = vld [vmem:[#allocation2 + $0x58] sm:$0xff] }
 0x2d6   :  { %v5845_v60 = vadd.f32 %v1460_v55, %v1433_v0  ;;  %v5872_v0 = vpop.permute.xlu2 %2628  ;;  %1656 = vmatpush.msrb.mxu3 %v1641_v49 }
 0x2d7   :  { %1593 = vmatpush.msra.mxu1 %v1576_v61  ;;  %v1404_v47 = vadd.f32 %v1400_v13, %v1373_v24  ;;  %v7632_v24 = vmax.f32 %v7631_v41, 0.0  ;;  %v7650_v41 = vld [vmem:[#allocation47_spill] sm:$0xff] }
 0x2d8   :  { %2892 = vperm.xlu2 %4489, %v7616_v30   ;;  %4061 = vmatmul.msk.f32.vlgmr.msra.gmra.mxu2 %vm1469_vm1, %v5845_v60 }
 0x2d9   :  { %2776 = vperm.xlu0 %4490, %v7617_v40   ;;  %2660 = vperm.xlu1 %4488, %v7618_v42   ;;  %v1287_v28 = vpop.permute.xlu0 %1286  ;;  %v7625_v40 = vmax.f32 %v5685_v38, 0.0  ;;  %v7626_v38 = vmax.f32 %v5645_v62, 0.0  ;;  %v7629_v62 = vld [vmem:[#allocation18_spill] sm:$0xff] }
 0x2da   :  { %v1421_v29 = vpop.permute.xlu1 %1420  ;;  %v1304_v18 = vmul.f32 %v5786_v43, %v1287_v28  ;;  %1657 = vmatpush.msrb.mxu3 %v1640_v33 }
 0x2db   :  { %v1430_v34 = vmul.f32 %v5824_v19, %v1421_v29 }
 0x2dc   :  { %v1308_v35 = vadd.f32 %v1304_v18, %v1277_v50  ;;  %v1673_v18 = vld [vmem:[#allocation2 + $0x68] sm:$0xff] }
 0x2dd   :  { %v1434_v63 = vadd.f32 %v1430_v34, %v1403_v5  ;;  %v1397_v5 = vmul.f32 %v5811_v52, %v5777_v58  ;;  %v1609_v34 = vld [vmem:[#allocation2 + $0x48] sm:$0xff] }
 0x2de   :  { %v5898_v28 = vpop.permute.xlu2 %2560  ;;  %v1339_v3 = vadd.f32 %v1335_v1, %v1308_v35  ;;  %1624 = vmatpush.msra.mxu2 %v1609_v34  ;;  %v7636_v50 = vld [vmem:[#allocation35_spill] sm:$0xff]  ;;  %v7642_v34 = vmax.f32 %v5658_v56, 0.0  ;;  %v1705_v56 = vld [vmem:[#allocation2 + $0x78] sm:$0xff] }
 0x2df   :  { %v5870_v55 = vadd.f32 %v1461_v27, %v1434_v63  ;;  %v7627_v27 = vmax.f32 %v5297_v7, 0.0  ;;  %v1608_v7 = vld [vmem:[#allocation2 + $0x40] sm:$0xff] }
 0x2e0   :  { %2824 = vperm.xlu2 %4489, %v7619_v54   ;;  %v7630_v54 = vmax.f32 %v7629_v62, 0.0  ;;  %1625 = vmatpush.msra.mxu2 %v1608_v7 }
 0x2e1   :  { %2708 = vperm.xlu0 %4490, %v7620_v20   ;;  %2592 = vperm.xlu1 %4488, %v7622_v37   ;;  %v1457_v51 = vpop.permute.xlu0 %1456  ;;  %v7633_v20 = vmax.f32 %v5442_v57, 0.0  ;;  %v1672_v57 = vld [vmem:[#allocation2 + $0x60] sm:$0xff] }
 0x2e2   :  { %4062 = vmatmul.msk.f32.gmra.mxu2 %vm1469_vm1, %v5870_v55  ;;  %v1426_v16 = vpop.permute.xlu1 %1425  ;;  %v1462_v14 = vmul.f32 %v5829_v39, %v1457_v51  ;;  %v7634_v51 = vld [vmem:[#allocation30_spill] sm:$0xff] }
 0x2e3   :  { %v1431_v48 = vmul.f32 %v5824_v19, %v1426_v16  ;;  %v2571_v16 = vmul.f32 %v7634_v51, %v5843_v21  ;;  %v7637_v21 = vmax.f32 %v5509_v6, 0.0  ;;  %v2572_v49 = vmul.f32 %v7634_v51, %v5898_v28  ;;  %v7652_v28 = vld [vmem:[#allocation43_spill] sm:$0xff] }
 0x2e5   :  { %v1435_v31 = vadd.f32 %v1431_v48, %v1404_v47 }
 0x2e6   :  { %v2677_v32 = vpop.permute.xlu2 %2676 }
 0x2e7   :  { %v5888_v30 = vadd.f32 %v1462_v14, %v1435_v31 }
 0x2e8   :  { %2848 = vperm.xlu2 %4489, %v7623_v59   ;;  %v7638_v59 = vld [vmem:[#allocation37_spill] sm:$0xff] }
 0x2e9   :  { %2640 = vperm.xlu0 %4490, %v7624_v11   ;;  %2868 = vperm.xlu1 %4488, %v7625_v40   ;;  %v1411_v42 = vpop.permute.xlu0 %1410  ;;  %v7639_v1 = vmax.f32 %v7638_v59, 0.0  ;;  %v7640_v11 = vmax.f32 %v5495_v25, 0.0 }
 0x2ea   :  { %4063 = vmatmul.msk.f32.gmra.mxu2 %vm1469_vm1, %v5888_v30  ;;  %v1349_v29 = vpop.permute.xlu1 %1348  ;;  %v1428_v23 = vmul.f32 %v5824_v19, %v1411_v42 }
 0x2eb   :  { %v1366_v17 = vmul.f32 %v5799_v36, %v1349_v29 }
 0x2ed   :  { %v1370_v15 = vadd.f32 %v1366_v17, %v1339_v3  ;;  %v7641_v3 = vld [vmem:[#allocation38_spill] sm:$0xff] }
 0x2ee   :  { %v2633_v48 = vpop.permute.xlu2 %2632  ;;  %v2643_v17 = vmul.f32 %v7641_v3, %v5872_v0  ;;  %v7645_v0 = vld [vmem:[#allocation41_spill] sm:$0xff] }
 0x2ef   :  { %v1401_v53 = vadd.f32 %v1397_v5, %v1370_v15 }
 0x2f0   :  { %2872 = vperm.xlu2 %4489, %v7626_v38  }
 0x2f1   :  { %2664 = vperm.xlu0 %4490, %v7627_v27   ;;  %2800 = vperm.xlu1 %4488, %v7628_v8   ;;  %v5912_v44 = vpop.permute.xlu0 %1782  ;;  %v1432_v61 = vadd.f32 %v1428_v23, %v1401_v53  ;;  %v7643_v53 = vld [vmem:[#allocation39_spill] sm:$0xff]  ;;  %v7646_v23 = vmax.f32 %v7645_v0, 0.0  ;;  %v7647_v27 = vld [vmem:[#allocation40_spill] sm:$0xff] }
 0x2f2   :  { %v1442_v63 = vpop.permute.xlu1 %1441  ;;  %v7644_v38 = vmax.f32 %v7643_v53, 0.0  ;;  %v2691_v8 = vmul.f32 %v7647_v27, %v2677_v32  ;;  %v7648_v32 = vld [vmem:[#allocation46_spill] sm:$0xff] }
 0x2f3   :  { %v1459_v58 = vmul.f32 %v5829_v39, %v1442_v63 }
 0x2f5   :  { %v5915_v13 = vadd.f32 %v1459_v58, %v1432_v61 }
 0x2f6   :  { %v2565_v6 = vpop.permute.xlu2 %2564 }
 0x2f7   :  { %4060 = vmatmul.msk.f32.vlgmr.msrb.gmra.mxu1 %vm1469_vm1, %v5915_v13  ;;  %4064 = vmatmul.msk.f32.vlgmr.msrb.gmra.mxu2 %vm1469_vm1, %v5915_v13 }
 0x2f8   :  { %4068 = vmatmul.msk.f32.vlgmr.msra.gmra.mxu3 %vm1469_vm1, %v5915_v13  ;;  %2896 = vperm.xlu2 %4489, %v7630_v54   ;;  %v7649_v54 = vmax.f32 %v7648_v32, 0.0 }
 0x2f9   :  { %2688 = vperm.xlu0 %4490, %v7632_v24   ;;  %2732 = vperm.xlu1 %4488, %v7633_v20   ;;  %v7651_v24 = vmax.f32 %v7650_v41, 0.0  ;;  %v7653_v20 = vmax.f32 %v7652_v28, 0.0 }
 0x2fa   :  { %1688 = vmatpush.msrb.mxu1 %v1673_v18  ;;  %1720 = vmatpush.msrb.mxu2 %v1705_v56  ;;  %v1737_v18 = vld [vmem:[#allocation2 + $0x88] sm:$0xff]  ;;  %v2573_v56 = vmul.f32 %v7634_v51, %v2565_v6  ;;  %v7665_v6 = vld [vmem:[#allocation20_spill] sm:$0xff] }
 0x2fb   :  { %v2581_v9 = vpop.permute.xlu0 %2580  ;;  %v2533_v37 = vpop.permute.xlu1 %2532  ;;  %1752 = vmatpush.msra.mxu3 %v1737_v18 }
 0x2fc   :  { %v2547_v47 = vmul.f32 %v7635_v45, %v2533_v37  ;;  %v2595_v14 = vmul.f32 %v7636_v50, %v2581_v9  ;;  %1689 = vmatpush.msrb.mxu1 %v1672_v57  ;;  %v1704_v57 = vld [vmem:[#allocation2 + $0x70] sm:$0xff] }
 0x2fd   :  { %1721 = vmatpush.msrb.mxu2 %v1704_v57 }
 0x2fe   :  { %v2575_v31 = vadd.f32 %v2571_v16, %v2547_v47  ;;  %v2589_v9 = vpop.permute.xlu2 %2588 }
 0x2ff   :  { %4065 = vmatmul.msk.f32.gmra.mxu2 %vm1469_vm1, %v5845_v60  ;;  %4072 = vmatmul.msk.f32.vlgmr.msra.gmra.mxu1 %vm1469_vm1, %v5915_v13  ;;  %v2597_v41 = vmul.f32 %v7636_v50, %v2589_v9 }
 0x300   :  { %4069 = vmatmul.msk.f32.gmra.mxu3 %vm1469_vm1, %v5845_v60  ;;  %2760 = vperm.xlu2 %4489, %v7637_v21   ;;  %v2599_v35 = vadd.f32 %v2595_v14, %v2575_v31  ;;  %v1736_v21 = vld [vmem:[#allocation2 + $0x80] sm:$0xff] }
 0x301   :  { %2712 = vperm.xlu0 %4490, %v7639_v1   ;;  %2756 = vperm.xlu1 %4488, %v7640_v11   ;;  %v7654_v1 = vld [vmem:[#allocation49_spill] sm:$0xff] }
 0x302   :  { %v7655_v11 = vmax.f32 %v7654_v1, 0.0  ;;  %1753 = vmatpush.msra.mxu3 %v1736_v21 }
 0x303   :  { %v2653_v40 = vpop.permute.xlu0 %2652  ;;  %v2605_v42 = vpop.permute.xlu1 %2604 }
 0x304   :  { %v2619_v29 = vmul.f32 %v5328_v12, %v2605_v42  ;;  %v2667_v15 = vmul.f32 %v5414_v4, %v2653_v40  ;;  %v7656_v40 = vld [vmem:[#allocation44_spill] sm:$0xff] }
 0x305   :  { %v7657_v42 = vmax.f32 %v7656_v40, 0.0 }
 0x306   :  { %v2623_v5 = vadd.f32 %v2619_v29, %v2599_v35  ;;  %v2644_v35 = vmul.f32 %v7641_v3, %v2633_v48  ;;  %v7658_v29 = vld [vmem:[#allocation45_spill] sm:$0xff]  ;;  %v2613_v53 = vpop.permute.xlu2 %2612 }
 0x307   :  { %4066 = vmatmul.msk.f32.gmra.mxu2 %vm1469_vm1, %v5870_v55  ;;  %4073 = vmatmul.msk.f32.gmra.mxu1 %vm1469_vm1, %v5845_v60 }
 0x308   :  { %v2647_v25 = vadd.f32 %v2643_v17, %v2623_v5  ;;  %4070 = vmatmul.msk.f32.gmra.mxu3 %vm1469_vm1, %v5870_v55  ;;  %2876 = vperm.xlu2 %4489, %v7642_v34   ;;  %v7659_v17 = vmax.f32 %v7658_v29, 0.0 }
 0x309   :  { %2736 = vperm.xlu0 %4490, %v7644_v38   ;;  %2780 = vperm.xlu1 %4488, %v7646_v23  }
 0x30a   :  { %v2671_v63 = vadd.f32 %v2667_v15, %v2647_v25 }
 0x30b   :  { %v2609_v61 = vpop.permute.xlu0 %2608  ;;  %v2537_v58 = vpop.permute.xlu1 %2536 }
 0x30c   :  { %v2548_v7 = vmul.f32 %v7635_v45, %v2537_v58  ;;  %v2695_v33 = vadd.f32 %v2691_v8, %v2671_v63  ;;  %v2620_v14 = vmul.f32 %v5328_v12, %v2609_v61  ;;  %v7660_v63 = vmov 0   ;;  %v7661_v61 = vld [vmem:[#allocation48_spill] sm:$0xff] }
 0x30d   :  { %v7662_v58 = vmax.f32 %v7661_v61, 0.0 }
 0x30e   :  { %v2576_v62 = vadd.f32 %v2572_v49, %v2548_v7  ;;  %v7663_v49 = vld [vmem:[#allocation42_spill] sm:$0xff] }
 0x30f   :  { %4067 = vmatmul.msk.f32.gmra.mxu2 %vm1469_vm1, %v5888_v30  ;;  %4074 = vmatmul.msk.f32.gmra.mxu1 %vm1469_vm1, %v5870_v55  ;;  %v7664_v7 = vmax.f32 %v7663_v49, 0.0 }
 0x310   :  { %4071 = vmatmul.msk.f32.gmra.mxu3 %vm1469_vm1, %v5888_v30  ;;  %2832 = vperm.xlu2 %4489, %v7649_v54  }
 0x311   :  { %2852 = vperm.xlu0 %4490, %v7651_v24   ;;  %2804 = vperm.xlu1 %4488, %v7653_v20   ;;  %v2637_v20 = vpop.permute.xlu2 %2636 }
 0x312   :  { %v2645_v9 = vmul.f32 %v7641_v3, %v2637_v20 }
 0x313   :  { %v2725_v37 = vpop.permute.xlu0 %2724  ;;  %v2585_v16 = vpop.permute.xlu1 %2584 }
 0x314   :  { %v2596_v47 = vmul.f32 %v7636_v50, %v2585_v16  ;;  %v2739_v38 = vmul.f32 %v5593_v2, %v2725_v37  ;;  %v2621_v37 = vmul.f32 %v5328_v12, %v2613_v53 }
 0x316   :  { %v2600_v31 = vadd.f32 %v2596_v47, %v2576_v62  ;;  %v7666_v47 = vmax.f32 %v7665_v6, 0.0 }
 0x317   :  { %4075 = vmatmul.msk.f32.gmra.mxu1 %vm1469_vm1, %v5888_v30  ;;  %4076 = vmatmul.msk.f32.vlgmr.msra.gmra.mxu2 %vm1469_vm1, %v5915_v13 }
 0x318   :  { %v2624_v59 = vadd.f32 %v2620_v14, %v2600_v31  ;;  %4080 = vmatmul.msk.f32.vlgmr.msrb.gmra.mxu3 %vm1469_vm1, %v5915_v13  ;;  %2904 = vperm.xlu2 %4489, %v7655_v11   ;;  %v7667_v11 = vld [vmem:[#allocation50_spill] sm:$0xff] }
 0x319   :  { %2808 = vperm.xlu0 %4490, %v7657_v42   ;;  %2828 = vperm.xlu1 %4488, %v7659_v17   ;;  %v7668_v40 = vmax.f32 %v7667_v11, 0.0 }
 0x31a   :  { %v2648_v5 = vadd.f32 %v2644_v35, %v2624_v59 }
 0x31b   :  { %v2657_v15 = vpop.permute.xlu0 %2656  ;;  %v2701_v25 = vpop.permute.xlu1 %2700 }
 0x31c   :  { %v2668_v48 = vmul.f32 %v5414_v4, %v2657_v15  ;;  %v2715_v34 = vmul.f32 %v5517_v22, %v2701_v25 }
 0x31e   :  { %v2672_v0 = vadd.f32 %v2668_v48, %v2648_v5  ;;  %v2719_v23 = vadd.f32 %v2715_v34, %v2695_v33  ;;  %v2545_v48 = vpop.permute.xlu2 %2544 }
 0x31f   :  { %4077 = vmatmul.msk.f32.gmra.mxu2 %vm1469_vm1, %v5845_v60  ;;  %4084 = vmatmul.msk.f32.vlgmr.msrb.gmra.mxu1 %vm1469_vm1, %v5915_v13 }
 0x320   :  { %4081 = vmatmul.msk.f32.gmra.mxu3 %vm1469_vm1, %v5845_v60  ;;  %v2743_v8 = vadd.f32 %v2739_v38, %v2719_v23  ;;  %4493 = vset.pattern.permute.xlu2 %v7660_v63  ;;  %v2550_v38 = vmul.f32 %v7635_v45, %v2545_v48 }
 0x321   :  { %2856 = vperm.xlu0 %4490, %v7662_v58   ;;  %2784 = vperm.xlu1 %4488, %v7664_v7  }
 0x323   :  { %v2681_v62 = vpop.permute.xlu0 %2680  ;;  %v2541_v33 = vpop.permute.xlu1 %2540 }
 0x324   :  { %v2692_v32 = vmul.f32 %v7647_v27, %v2681_v62  ;;  %v2549_v54 = vmul.f32 %v7635_v45, %v2541_v33 }
 0x326   :  { %v2696_v24 = vadd.f32 %v2692_v32, %v2672_v0  ;;  %v2577_v28 = vadd.f32 %v2573_v56, %v2549_v54 }
 0x327   :  { %4078 = vmatmul.msk.f32.gmra.mxu2 %vm1469_vm1, %v5870_v55  ;;  %4085 = vmatmul.msk.f32.gmra.mxu1 %vm1469_vm1, %v5845_v60 }
 0x328   :  { %v2601_v16 = vadd.f32 %v2597_v41, %v2577_v28  ;;  %4082 = vmatmul.msk.f32.gmra.mxu3 %vm1469_vm1, %v5870_v55 }
 0x329   :  { %2900 = vperm.xlu1 %4488, %v7666_v47   ;;  %4491 = vset.pattern.permute.xlu0 %v7660_v63 }
 0x32a   :  { %v2625_v18 = vadd.f32 %v2621_v37, %v2601_v16 }
 0x32b   :  { %v2705_v14 = vpop.permute.xlu0 %2704  ;;  %v2749_v31 = vpop.permute.xlu1 %2748 }
 0x32c   :  { %v2716_v57 = vmul.f32 %v5517_v22, %v2705_v14  ;;  %v2763_v21 = vmul.f32 %v5618_v10, %v2749_v31  ;;  %v6023_v35 = vadd.f32 %v2645_v9, %v2625_v18  ;;  %v1767_v14 = vld [vmem:[%s7396_s4] sm:$0xff] }
 0x32e   :  { %v2720_v59 = vadd.f32 %v2716_v57, %v2696_v24  ;;  %v2767_v1 = vadd.f32 %v2763_v21, %v2743_v8  ;;  %v1770_v21 = vld [vmem:[%s7396_s4 + $0x18] sm:$0xff] }
 0x32f   :  { %4079 = vmatmul.msk.f32.gmra.mxu2 %vm1469_vm1, %v5888_v30  ;;  %4086 = vmatmul.msk.f32.gmra.mxu1 %vm1469_vm1, %v5870_v55 }
 0x330   :  { %4083 = vmatmul.msk.f32.gmra.mxu3 %vm1469_vm1, %v5888_v30 }
 0x331   :  { %2880 = vperm.xlu1 %4488, %v7668_v40  }
 0x333   :  { %v2729_v42 = vpop.permute.xlu0 %2728  ;;  %v2773_v29 = vpop.permute.xlu1 %2772 }
 0x334   :  { %v2740_v17 = vmul.f32 %v5593_v2, %v2729_v42  ;;  %v2787_v5 = vmul.f32 %v5786_v43, %v2773_v29 }
 0x336   :  { %v6035_v15 = vadd.f32 %v2740_v17, %v2720_v59  ;;  %v2791_v25 = vadd.f32 %v2787_v5, %v2767_v1 }
 0x337   :  { %4087 = vmatmul.msk.f32.gmra.mxu1 %vm1469_vm1, %v5888_v30  ;;  %4088 = vmatmul.msk.f32.vlgmr.msrb.gmra.mxu2 %vm1469_vm1, %v5915_v13 }
 0x338   :  { %4092 = vmatmul.msk.f32.vlgmr.msra.gmra.mxu3 %vm1469_vm1, %v5915_v13 }
 0x339   :  { %4492 = vset.pattern.permute.xlu1 %v7660_v63 }
 0x33b   :  { %v2569_v34 = vpop.permute.xlu0 %2568  ;;  %v2797_v53 = vpop.permute.xlu1 %2796 }
 0x33c   :  { %v2574_v0 = vmul.f32 %v7634_v51, %v2569_v34  ;;  %v2811_v23 = vmul.f32 %v5789_v26, %v2797_v53  ;;  %v1769_v53 = vld [vmem:[%s7396_s4 + $0x10] sm:$0xff] }
 0x33e   :  { %v6047_v8 = vadd.f32 %v2574_v0, %v2550_v38  ;;  %v2815_v61 = vadd.f32 %v2811_v23, %v2791_v25  ;;  %v1772_v0 = vld [vmem:[%s7396_s4 + $0x28] sm:$0xff] }
 0x33f   :  { %4089 = vmatmul.msk.f32.gmra.mxu2 %vm1469_vm1, %v5845_v60  ;;  %v1768_v23 = vld [vmem:[%s7396_s4 + $0x8] sm:$0xff] }
 0x340   :  { %4093 = vmatmul.msk.f32.gmra.mxu3 %vm1469_vm1, %v5845_v60 }
 0x343   :  { %v2821_v13 = vpop.permute.xlu1 %2820 }
 0x344   :  { %v2835_v63 = vmul.f32 %v5799_v36, %v2821_v13  ;;  %v1877_v13 = vld [vmem:[%s7398_s6 + $0x70] sm:$0xff] }
 0x346   :  { %v6054_v58 = vadd.f32 %v2835_v63, %v2815_v61  ;;  %v1771_v61 = vld [vmem:[%s7396_s4 + $0x20] sm:$0xff]  ;;  %v1878_v63 = vld [vmem:[%s7398_s6 + $0x78] sm:$0xff] }
 0x347   :  { %4090 = vmatmul.msk.f32.gmra.mxu2 %vm1469_vm1, %v5870_v55 }
 0x348   :  { %4094 = vmatmul.msk.f32.gmra.mxu3 %vm1469_vm1, %v5870_v55 }
 0x34f   :  { %4091 = vmatmul.msk.f32.gmra.mxu2 %vm1469_vm1, %v5888_v30 }
 0x350   :  { %4095 = vmatmul.msk.f32.gmra.mxu3 %vm1469_vm1, %v5888_v30 }
 0x35b   :  { %v1502_v51 = vpop.f32.mrf.mxu2 }
 0x365   :  { %v1505_v45 = vpop.f32.mrf.mxu2 }
 0x36d   :  { %v1508_v60 = vpop.f32.mrf.mxu2 }
 0x374   :  { %v1499_v49 = vpop.f32.mrf.mxu1 }
 0x37a   :  { %v1531_v7 = vpop.f32.mrf.mxu2 }
 0x37b   :  { %v1563_v62 = vpop.f32.mrf.mxu3 }
 0x37c   :  { %v1595_v33 = vpop.f32.mrf.mxu1 }
 0x382   :  { %v1534_v56 = vpop.f32.mrf.mxu2 }
 0x383   :  { %v1566_v32 = vpop.f32.mrf.mxu3 }
 0x384   :  { %v1598_v54 = vpop.f32.mrf.mxu1 }
 0x38a   :  { %v1537_v41 = vpop.f32.mrf.mxu2 }
 0x38b   :  { %v1569_v24 = vpop.f32.mrf.mxu3 }
 0x38c   :  { %v1601_v28 = vpop.f32.mrf.mxu1 }
 0x392   :  { %v1540_v55 = vpop.f32.mrf.mxu2 }
 0x393   :  { %v1572_v20 = vpop.f32.mrf.mxu3 }
 0x394   :  { %v1604_v37 = vpop.f32.mrf.mxu1 }
 0x395   :  { %1792 = vmatpush.msra.mxu1 %v1604_v37  ;;  %v4106_v37 = vld [vmem:[%s7398_s6 + $0xa0] sm:$0xff] }
 0x397   :  { %1793 = vmatpush.msra.mxu1 %v1601_v28  ;;  %v4108_v28 = vld [vmem:[%s7398_s6 + $0xb0] sm:$0xff] }
 0x399   :  { %1794 = vmatpush.msra.mxu1 %v1598_v54  ;;  %v4110_v54 = vld [vmem:[%s7398_s6 + $0xc0] sm:$0xff] }
 0x39a   :  { %v1627_v30 = vpop.f32.mrf.mxu2 }
 0x39b   :  { %v1659_v16 = vpop.f32.mrf.mxu3  ;;  %1795 = vmatpush.msra.mxu1 %v1595_v33  ;;  %v4112_v33 = vld [vmem:[%s7398_s6 + $0xd0] sm:$0xff] }
 0x39c   :  { %v1691_v11 = vpop.f32.mrf.mxu1 }
 0x39d   :  { %1796 = vmatpush.msra.mxu1 %v1572_v20  ;;  %v1868_v20 = vld [vmem:[%s7398_s6 + $0x28] sm:$0xff] }
 0x39f   :  { %1797 = vmatpush.msra.mxu1 %v1569_v24  ;;  %v1870_v24 = vld [vmem:[%s7398_s6 + $0x38] sm:$0xff] }
 0x3a1   :  { %1798 = vmatpush.msra.mxu1 %v1566_v32  ;;  %v1872_v32 = vld [vmem:[%s7398_s6 + $0x48] sm:$0xff] }
 0x3a2   :  { %v1630_v6 = vpop.f32.mrf.mxu2 }
 0x3a3   :  { %v1662_v47 = vpop.f32.mrf.mxu3  ;;  %1799 = vmatpush.msra.mxu1 %v1563_v62  ;;  %v1874_v62 = vld [vmem:[%s7398_s6 + $0x58] sm:$0xff] }
 0x3a4   :  { %v1694_v29 = vpop.f32.mrf.mxu1 }
 0x3a5   :  { %1800 = vmatpush.msra.mxu1 %v1540_v55  ;;  %v1867_v55 = vld [vmem:[%s7398_s6 + $0x20] sm:$0xff] }
 0x3a7   :  { %1801 = vmatpush.msra.mxu1 %v1537_v41  ;;  %v1869_v41 = vld [vmem:[%s7398_s6 + $0x30] sm:$0xff] }
 0x3a9   :  { %1802 = vmatpush.msra.mxu1 %v1534_v56  ;;  %v1871_v56 = vld [vmem:[%s7398_s6 + $0x40] sm:$0xff] }
 0x3aa   :  { %v1633_v9 = vpop.f32.mrf.mxu2 }
 0x3ab   :  { %v1665_v18 = vpop.f32.mrf.mxu3  ;;  %1803 = vmatpush.msra.mxu1 %v1531_v7  ;;  %v1873_v7 = vld [vmem:[%s7398_s6 + $0x50] sm:$0xff] }
 0x3ac   :  { %v1697_v25 = vpop.f32.mrf.mxu1 }
 0x3ad   :  { %1804 = vmatpush.msra.mxu1 %v1508_v60  ;;  %v1876_v60 = vld [vmem:[%s7398_s6 + $0x68] sm:$0xff] }
 0x3af   :  { %1805 = vmatpush.msra.mxu1 %v1505_v45  ;;  %v1875_v45 = vld [vmem:[%s7398_s6 + $0x60] sm:$0xff] }
 0x3b1   :  { %1806 = vmatpush.msra.mxu1 %v1502_v51  ;;  %v4116_v51 = vld [vmem:[%s7398_s6 + $0xf0] sm:$0xff] }
 0x3b2   :  { %v1636_v31 = vpop.f32.mrf.mxu2 }
 0x3b3   :  { %v1668_v57 = vpop.f32.mrf.mxu3  ;;  %1807 = vmatpush.msra.mxu1 %v1499_v49  ;;  %v4114_v49 = vld [vmem:[%s7398_s6 + $0xe0] sm:$0xff] }
 0x3b4   :  { %1808 = vmatmul.f32.vlgmr.msra.gmra.mxu1 %v1767_v14  ;;  %v1700_v38 = vpop.f32.mrf.mxu1  ;;  %v4117_v14 = vld [vmem:[%s7398_s6 + $0xf8] sm:$0xff] }
 0x3b5   :  { %1894 = vmatpush.msrb.mxu1 %v1877_v13  ;;  %v4125_v13 = vld [vmem:[%s7398_s6 + $0x118] sm:$0xff] }
 0x3b7   :  { %1895 = vmatpush.msrb.mxu1 %v1875_v45  ;;  %v4123_v45 = vld [vmem:[%s7398_s6 + $0x108] sm:$0xff] }
 0x3b9   :  { %1896 = vmatpush.msrb.mxu1 %v1873_v7 }
 0x3ba   :  { %v1723_v59 = vpop.f32.mrf.mxu2 }
 0x3bb   :  { %v1755_v1 = vpop.f32.mrf.mxu3  ;;  %1897 = vmatpush.msrb.mxu1 %v1871_v56 }
 0x3bc   :  { %1811 = vmatmul.f32.gmra.mxu1 %v1770_v21  ;;  %v4115_v21 = vld [vmem:[%s7398_s6 + $0xe8] sm:$0xff] }
 0x3bd   :  { %1898 = vmatpush.msrb.mxu1 %v1869_v41  ;;  %v4156_v41 = vld [vmem:[%s7398_s6 + $0x1f0] sm:$0xff] }
 0x3bf   :  { %1899 = vmatpush.msrb.mxu1 %v1867_v55  ;;  %v4154_v55 = vld [vmem:[%s7398_s6 + $0x1e0] sm:$0xff] }
 0x3c2   :  { %v1726_v40 = vpop.f32.mrf.mxu2 }
 0x3c3   :  { %v1758_v42 = vpop.f32.mrf.mxu3 }
 0x3ca   :  { %v1729_v17 = vpop.f32.mrf.mxu2 }
 0x3cb   :  { %v1761_v5 = vpop.f32.mrf.mxu3 }
 0x3d2   :  { %v1732_v48 = vpop.f32.mrf.mxu2 }
 0x3d3   :  { %v1764_v34 = vpop.f32.mrf.mxu3  ;;  %1815 = vmatpush.msra.mxu2 %v1732_v48  ;;  %v4128_v48 = vld [vmem:[%s7398_s6 + $0x130] sm:$0xff] }
 0x3d4   :  { %1850 = vmatpush.msrb.mxu3 %v1764_v34  ;;  %v4129_v34 = vld [vmem:[%s7398_s6 + $0x138] sm:$0xff] }
 0x3d5   :  { %1816 = vmatpush.msra.mxu2 %v1729_v17  ;;  %v4130_v17 = vld [vmem:[%s7398_s6 + $0x140] sm:$0xff] }
 0x3d6   :  { %1851 = vmatpush.msrb.mxu3 %v1761_v5  ;;  %v4131_v5 = vld [vmem:[%s7398_s6 + $0x148] sm:$0xff] }
 0x3d7   :  { %1817 = vmatpush.msra.mxu2 %v1726_v40  ;;  %v4132_v40 = vld [vmem:[%s7398_s6 + $0x150] sm:$0xff] }
 0x3d8   :  { %1852 = vmatpush.msrb.mxu3 %v1758_v42  ;;  %v4133_v42 = vld [vmem:[%s7398_s6 + $0x158] sm:$0xff] }
 0x3d9   :  { %1818 = vmatpush.msra.mxu2 %v1723_v59  ;;  %v4134_v59 = vld [vmem:[%s7398_s6 + $0x160] sm:$0xff] }
 0x3da   :  { %1853 = vmatpush.msrb.mxu3 %v1755_v1  ;;  %v4135_v1 = vld [vmem:[%s7398_s6 + $0x168] sm:$0xff] }
 0x3db   :  { %1819 = vmatpush.msra.mxu2 %v1700_v38  ;;  %4096 = vmatmul.msk.f32.vlgmr.msrb.gmra.mxu3 %vm1785_vm2, %v1769_v53  ;;  %v4107_v53 = vld [vmem:[%s7398_s6 + $0xa8] sm:$0xff]  ;;  %v4126_v38 = vld [vmem:[%s7398_s6 + $0x120] sm:$0xff] }
 0x3dc   :  { %1957 = vmatpush.msra.mxu3 %v4116_v51  ;;  %v4122_v51 = vld [vmem:[%s7398_s6 + $0x100] sm:$0xff] }
 0x3dd   :  { %1820 = vmatpush.msra.mxu2 %v1697_v25  ;;  %v4109_v25 = vld [vmem:[%s7398_s6 + $0xb8] sm:$0xff] }
 0x3de   :  { %1958 = vmatpush.msra.mxu3 %v4114_v49 }
 0x3df   :  { %1821 = vmatpush.msra.mxu2 %v1694_v29  ;;  %v4111_v29 = vld [vmem:[%s7398_s6 + $0xc8] sm:$0xff] }
 0x3e0   :  { %1959 = vmatpush.msra.mxu3 %v4112_v33 }
 0x3e1   :  { %1822 = vmatpush.msra.mxu2 %v1691_v11  ;;  %v4113_v11 = vld [vmem:[%s7398_s6 + $0xd8] sm:$0xff] }
 0x3e2   :  { %1960 = vmatpush.msra.mxu3 %v4110_v54 }
 0x3e3   :  { %1823 = vmatpush.msra.mxu2 %v1668_v57  ;;  %4097 = vmatmul.msk.f32.gmra.mxu3 %vm1785_vm2, %v1772_v0  ;;  %v4137_v57 = vld [vmem:[%s7398_s6 + $0x178] sm:$0xff]  ;;  %v4127_v0 = vld [vmem:[%s7398_s6 + $0x128] sm:$0xff] }
 0x3e4   :  { %1961 = vmatpush.msra.mxu3 %v4108_v28  ;;  %v4176_v28 = vld [vmem:[%s7398_s6 + $0x270] sm:$0xff] }
 0x3e5   :  { %1824 = vmatpush.msra.mxu2 %v1665_v18  ;;  %v4102_v18 = vld [vmem:[%s7398_s6 + $0x80] sm:$0xff] }
 0x3e6   :  { %1962 = vmatpush.msra.mxu3 %v4106_v37 }
 0x3e7   :  { %1825 = vmatpush.msra.mxu2 %v1662_v47  ;;  %v1863_v47 = vld [vmem:[%s7398_s6] sm:$0xff] }
 0x3e9   :  { %1826 = vmatpush.msra.mxu2 %v1659_v16  ;;  %v1866_v16 = vld [vmem:[%s7398_s6 + $0x18] sm:$0xff] }
 0x3eb   :  { %1827 = vmatpush.msra.mxu2 %v1636_v31  ;;  %v4136_v31 = vld [vmem:[%s7398_s6 + $0x170] sm:$0xff] }
 0x3ed   :  { %1828 = vmatpush.msra.mxu2 %v1633_v9  ;;  %v1864_v9 = vld [vmem:[%s7398_s6 + $0x8] sm:$0xff] }
 0x3ef   :  { %1829 = vmatpush.msra.mxu2 %v1630_v6  ;;  %v4104_v6 = vld [vmem:[%s7398_s6 + $0x90] sm:$0xff] }
 0x3f0   :  { %1963 = vmatpush.msra.mxu3 %v4104_v6  ;;  %v4152_v6 = vld [vmem:[%s7398_s6 + $0x1d0] sm:$0xff] }
 0x3f1   :  { %1830 = vmatpush.msra.mxu2 %v1627_v30  ;;  %v1865_v30 = vld [vmem:[%s7398_s6 + $0x10] sm:$0xff] }
 0x3f2   :  { %1831 = vmatmul.f32.vlgmr.msra.gmra.mxu2 %v1768_v23  ;;  %1900 = vmatpush.msrb.mxu1 %v1865_v30  ;;  %v4105_v23 = vld [vmem:[%s7398_s6 + $0x98] sm:$0xff]  ;;  %v4174_v30 = vld [vmem:[%s7398_s6 + $0x260] sm:$0xff] }
 0x3f3   :  { %1917 = vmatpush.msrb.mxu2 %v1878_v63  ;;  %1964 = vmatpush.msra.mxu3 %v4102_v18  ;;  %v4103_v63 = vld [vmem:[%s7398_s6 + $0x88] sm:$0xff] }
 0x3f4   :  { %1901 = vmatpush.msrb.mxu1 %v1863_v47  ;;  %v4153_v47 = vld [vmem:[%s7398_s6 + $0x1d8] sm:$0xff] }
 0x3f5   :  { %1918 = vmatpush.msrb.mxu2 %v1876_v60  ;;  %2043 = vmatpush.msrb.mxu3 %v4137_v57  ;;  %v4151_v57 = vld [vmem:[%s7398_s6 + $0x1c8] sm:$0xff] }
 0x3f6   :  { %1980 = vmatpush.msra.mxu1 %v4117_v14  ;;  %v4150_v14 = vld [vmem:[%s7398_s6 + $0x1c0] sm:$0xff] }
 0x3f7   :  { %1919 = vmatpush.msrb.mxu2 %v1874_v62  ;;  %2044 = vmatpush.msrb.mxu3 %v4135_v1  ;;  %v4149_v1 = vld [vmem:[%s7398_s6 + $0x1b8] sm:$0xff] }
 0x3f8   :  { %1981 = vmatpush.msra.mxu1 %v4115_v21  ;;  %v4170_v21 = vld [vmem:[%s7398_s6 + $0x240] sm:$0xff] }
 0x3f9   :  { %1920 = vmatpush.msrb.mxu2 %v1872_v32  ;;  %2045 = vmatpush.msrb.mxu3 %v4133_v42  ;;  %v4147_v42 = vld [vmem:[%s7398_s6 + $0x1a8] sm:$0xff] }
 0x3fa   :  { %1834 = vmatmul.f32.gmra.mxu2 %v1771_v61  ;;  %1982 = vmatpush.msra.mxu1 %v4113_v11  ;;  %v4124_v61 = vld [vmem:[%s7398_s6 + $0x110] sm:$0xff] }
 0x3fb   :  { %1921 = vmatpush.msrb.mxu2 %v1870_v24  ;;  %2046 = vmatpush.msrb.mxu3 %v4131_v5  ;;  %v4157_v24 = vld [vmem:[%s7398_s6 + $0x1f8] sm:$0xff]  ;;  %v4168_v11 = vld [vmem:[%s7398_s6 + $0x230] sm:$0xff] }
 0x3fc   :  { %1983 = vmatpush.msra.mxu1 %v4111_v29  ;;  %v4166_v29 = vld [vmem:[%s7398_s6 + $0x220] sm:$0xff]  ;;  %v4145_v5 = vld [vmem:[%s7398_s6 + $0x198] sm:$0xff] }
 0x3fd   :  { %1922 = vmatpush.msrb.mxu2 %v1868_v20  ;;  %2047 = vmatpush.msrb.mxu3 %v4129_v34  ;;  %v4143_v34 = vld [vmem:[%s7398_s6 + $0x188] sm:$0xff] }
 0x3fe   :  { %1984 = vmatpush.msra.mxu1 %v4109_v25  ;;  %v4142_v25 = vld [vmem:[%s7398_s6 + $0x180] sm:$0xff] }
 0x3ff   :  { %1923 = vmatpush.msrb.mxu2 %v1866_v16  ;;  %2048 = vmatpush.msrb.mxu3 %v4127_v0  ;;  %v4162_v0 = vld [vmem:[%s7398_s6 + $0x200] sm:$0xff] }
 0x400   :  { %1985 = vmatpush.msra.mxu1 %v4107_v53  ;;  %v4177_v53 = vld [vmem:[%s7398_s6 + $0x278] sm:$0xff] }
 0x401   :  { %1924 = vmatpush.msrb.mxu2 %v1864_v9  ;;  %2049 = vmatpush.msrb.mxu3 %v4125_v13  ;;  %v4172_v9 = vld [vmem:[%s7398_s6 + $0x250] sm:$0xff]  ;;  %v4194_v13 = vld [vmem:[%s7398_s6 + $0x2e0] sm:$0xff] }
 0x402   :  { %1986 = vmatpush.msra.mxu1 %v4105_v23  ;;  %v4197_v23 = vld [vmem:[%s7398_s6 + $0x2f8] sm:$0xff] }
 0x403   :  { %2020 = vmatpush.msra.mxu2 %v4136_v31  ;;  %2050 = vmatpush.msrb.mxu3 %v4123_v45  ;;  %v4192_v45 = vld [vmem:[%s7398_s6 + $0x2d0] sm:$0xff] }
 0x404   :  { %1987 = vmatpush.msra.mxu1 %v4103_v63  ;;  %v4195_v63 = vld [vmem:[%s7398_s6 + $0x2e8] sm:$0xff] }
 0x405   :  { %2021 = vmatpush.msra.mxu2 %v4134_v59  ;;  %v4148_v59 = vld [vmem:[%s7398_s6 + $0x1b0] sm:$0xff] }
 0x407   :  { %2022 = vmatpush.msra.mxu2 %v4132_v40  ;;  %v4146_v40 = vld [vmem:[%s7398_s6 + $0x1a0] sm:$0xff] }
 0x409   :  { %2023 = vmatpush.msra.mxu2 %v4130_v17  ;;  %v4144_v17 = vld [vmem:[%s7398_s6 + $0x190] sm:$0xff] }
 0x40b   :  { %2024 = vmatpush.msra.mxu2 %v4128_v48  ;;  %v4164_v48 = vld [vmem:[%s7398_s6 + $0x210] sm:$0xff] }
 0x40d   :  { %2025 = vmatpush.msra.mxu2 %v4126_v38  ;;  %v4196_v38 = vld [vmem:[%s7398_s6 + $0x2f0] sm:$0xff] }
 0x40f   :  { %2026 = vmatpush.msra.mxu2 %v4124_v61  ;;  %v4175_v61 = vld [vmem:[%s7398_s6 + $0x268] sm:$0xff] }
 0x411   :  { %2027 = vmatpush.msra.mxu2 %v4122_v51  ;;  %v4173_v51 = vld [vmem:[%s7398_s6 + $0x258] sm:$0xff] }
 0x431   :  { %v1809_v60 = vpop.f32.mrf.mxu1 }
 0x432   :  { %v1810_v7 = vadd.f32 %v1809_v60, %v5814_v46  ;;  %v4193_v60 = vld [vmem:[%s7398_s6 + $0x2d8] sm:$0xff] }
 0x439   :  { %v1812_v32 = vpop.f32.mrf.mxu1 }
 0x43a   :  { %v1813_v46 = vadd.f32 %v1812_v32, %v5912_v44  ;;  %v4155_v44 = vld [vmem:[%s7398_s6 + $0x1e8] sm:$0xff]  ;;  %v4189_v32 = vld [vmem:[%s7398_s6 + $0x2b8] sm:$0xff] }
 0x45e   :  { %v1855_v49 = vpop.f32.mrf.mxu3 }
 0x466   :  { %v1858_v37 = vpop.f32.mrf.mxu3 }
 0x475   :  { %v1832_v62 = vpop.f32.mrf.mxu2 }
 0x476   :  { %v1833_v33 = vadd.f32 %v1832_v62, %v1810_v7  ;;  %v4190_v7 = vld [vmem:[%s7398_s6 + $0x2c0] sm:$0xff]  ;;  %v4191_v62 = vld [vmem:[%s7398_s6 + $0x2c8] sm:$0xff] }
 0x478   :  { %v1856_v56 = vadd.f32 %v1855_v49, %v1833_v33  ;;  %v4171_v49 = vld [vmem:[%s7398_s6 + $0x248] sm:$0xff]  ;;  %v4169_v33 = vld [vmem:[%s7398_s6 + $0x238] sm:$0xff] }
 0x47a   :  { %v6229_v54 = vmax.f32 %v1856_v56, 0.0  ;;  %v4188_v56 = vld [vmem:[%s7398_s6 + $0x2b0] sm:$0xff] }
 0x47c   :  { %4098 = vmatmul.msk.f32.vlgmr.msrb.gmra.mxu1 %vm1879_vm3, %v6229_v54  ;;  %4100 = vmatmul.msk.f32.vlgmr.msrb.gmra.mxu2 %vm1879_vm3, %v6229_v54 }
 0x47d   :  { %4118 = vmatmul.msk.f32.vlgmr.msra.gmra.mxu3 %vm1879_vm3, %v6229_v54  ;;  %v1835_v20 = vpop.f32.mrf.mxu2  ;;  %2083 = vmatpush.msrb.mxu1 %v4156_v41  ;;  %v4167_v41 = vld [vmem:[%s7398_s6 + $0x228] sm:$0xff] }
 0x47e   :  { %v1836_v16 = vadd.f32 %v1835_v20, %v1813_v46  ;;  %2106 = vmatpush.msrb.mxu2 %v4157_v24  ;;  %2146 = vmatpush.msra.mxu3 %v4176_v28  ;;  %v4186_v24 = vld [vmem:[%s7398_s6 + $0x2a0] sm:$0xff]  ;;  %v4165_v28 = vld [vmem:[%s7398_s6 + $0x218] sm:$0xff]  ;;  %v4187_v46 = vld [vmem:[%s7398_s6 + $0x2a8] sm:$0xff] }
 0x47f   :  { %2084 = vmatpush.msrb.mxu1 %v4154_v55  ;;  %v4184_v55 = vld [vmem:[%s7398_s6 + $0x290] sm:$0xff]  ;;  %v4163_v20 = vld [vmem:[%s7398_s6 + $0x208] sm:$0xff] }
 0x480   :  { %v1859_v18 = vadd.f32 %v1858_v37, %v1836_v16  ;;  %2107 = vmatpush.msrb.mxu2 %v4155_v44  ;;  %2147 = vmatpush.msra.mxu3 %v4174_v30  ;;  %v4185_v37 = vld [vmem:[%s7398_s6 + $0x298] sm:$0xff]  ;;  %v4182_v44 = vld [vmem:[%s7398_s6 + $0x280] sm:$0xff]  ;;  %v4216_v30 = vld [vmem:[%s7398_s6 + $0x370] sm:$0xff] }
 0x481   :  { %2085 = vmatpush.msrb.mxu1 %v4152_v6  ;;  %v4217_v16 = vld [vmem:[%s7398_s6 + $0x378] sm:$0xff]  ;;  %v4183_v6 = vld [vmem:[%s7398_s6 + $0x288] sm:$0xff] }
 0x482   :  { %v6268_v31 = vmax.f32 %v1859_v18, 0.0  ;;  %2108 = vmatpush.msrb.mxu2 %v4153_v47  ;;  %2148 = vmatpush.msra.mxu3 %v4172_v9  ;;  %v4236_v47 = vld [vmem:[%s7398_s6 + $0x3f0] sm:$0xff]  ;;  %v4214_v9 = vld [vmem:[%s7398_s6 + $0x360] sm:$0xff]  ;;  %v4215_v18 = vld [vmem:[%s7398_s6 + $0x368] sm:$0xff] }
 0x483   :  { %2086 = vmatpush.msrb.mxu1 %v4150_v14  ;;  %v4234_v14 = vld [vmem:[%s7398_s6 + $0x3e0] sm:$0xff] }
 0x484   :  { %4099 = vmatmul.msk.f32.gmra.mxu1 %vm1879_vm3, %v6268_v31  ;;  %4101 = vmatmul.msk.f32.gmra.mxu2 %vm1879_vm3, %v6268_v31 }
 0x485   :  { %4119 = vmatmul.msk.f32.gmra.mxu3 %vm1879_vm3, %v6268_v31  ;;  %2109 = vmatpush.msrb.mxu2 %v4151_v57  ;;  %v4212_v57 = vld [vmem:[%s7398_s6 + $0x350] sm:$0xff] }
 0x486   :  { %2149 = vmatpush.msra.mxu3 %v4170_v21  ;;  %2087 = vmatpush.msrb.mxu1 %v4148_v59  ;;  %v4213_v21 = vld [vmem:[%s7398_s6 + $0x358] sm:$0xff]  ;;  %v4232_v59 = vld [vmem:[%s7398_s6 + $0x3d0] sm:$0xff] }
 0x487   :  { %2110 = vmatpush.msrb.mxu2 %v4149_v1  ;;  %v4210_v1 = vld [vmem:[%s7398_s6 + $0x340] sm:$0xff] }
 0x488   :  { %2150 = vmatpush.msra.mxu3 %v4168_v11  ;;  %2088 = vmatpush.msrb.mxu1 %v4146_v40  ;;  %v4211_v11 = vld [vmem:[%s7398_s6 + $0x348] sm:$0xff]  ;;  %v4230_v40 = vld [vmem:[%s7398_s6 + $0x3c0] sm:$0xff] }
 0x489   :  { %2111 = vmatpush.msrb.mxu2 %v4147_v42  ;;  %v4208_v42 = vld [vmem:[%s7398_s6 + $0x330] sm:$0xff] }
 0x48a   :  { %2151 = vmatpush.msra.mxu3 %v4166_v29  ;;  %2089 = vmatpush.msrb.mxu1 %v4144_v17  ;;  %v4209_v29 = vld [vmem:[%s7398_s6 + $0x338] sm:$0xff]  ;;  %v4206_v17 = vld [vmem:[%s7398_s6 + $0x320] sm:$0xff] }
 0x48b   :  { %2112 = vmatpush.msrb.mxu2 %v4145_v5  ;;  %v4228_v5 = vld [vmem:[%s7398_s6 + $0x3b0] sm:$0xff] }
 0x48c   :  { %4120 = vmatmul.msk.f32.vlgmr.msra.gmra.mxu1 %vm1879_vm3, %v6229_v54  ;;  %4138 = vmatmul.msk.f32.vlgmr.msra.gmra.mxu2 %vm1879_vm3, %v6229_v54 }
 0x48d   :  { %4140 = vmatmul.msk.f32.vlgmr.msrb.gmra.mxu3 %vm1879_vm3, %v6229_v54  ;;  %2090 = vmatpush.msrb.mxu1 %v4142_v25  ;;  %v4207_v25 = vld [vmem:[%s7398_s6 + $0x328] sm:$0xff] }
 0x48e   :  { %2152 = vmatpush.msra.mxu3 %v4164_v48  ;;  %2113 = vmatpush.msrb.mxu2 %v4143_v34  ;;  %v4204_v48 = vld [vmem:[%s7398_s6 + $0x310] sm:$0xff]  ;;  %v4226_v34 = vld [vmem:[%s7398_s6 + $0x3a0] sm:$0xff] }
 0x48f   :  { %2169 = vmatpush.msra.mxu1 %v4177_v53  ;;  %v4205_v53 = vld [vmem:[%s7398_s6 + $0x318] sm:$0xff] }
 0x490   :  { %2209 = vmatpush.msra.mxu2 %v4196_v38  ;;  %2153 = vmatpush.msra.mxu3 %v4162_v0  ;;  %v4202_v38 = vld [vmem:[%s7398_s6 + $0x300] sm:$0xff]  ;;  %v4224_v0 = vld [vmem:[%s7398_s6 + $0x390] sm:$0xff] }
 0x491   :  { %2170 = vmatpush.msra.mxu1 %v4175_v61  ;;  %v4237_v61 = vld [vmem:[%s7398_s6 + $0x3f8] sm:$0xff] }
 0x492   :  { %2232 = vmatpush.msrb.mxu3 %v4197_v23  ;;  %2210 = vmatpush.msra.mxu2 %v4194_v13  ;;  %v4203_v23 = vld [vmem:[%s7398_s6 + $0x308] sm:$0xff]  ;;  %v4256_v13 = vld [vmem:[%s7398_s6 + $0x470] sm:$0xff] }
 0x493   :  { %2171 = vmatpush.msra.mxu1 %v4173_v51  ;;  %v4222_v51 = vld [vmem:[%s7398_s6 + $0x380] sm:$0xff] }
 0x494   :  { %2233 = vmatpush.msrb.mxu3 %v4195_v63  ;;  %4121 = vmatmul.msk.f32.gmra.mxu1 %vm1879_vm3, %v6268_v31  ;;  %v4235_v63 = vld [vmem:[%s7398_s6 + $0x3e8] sm:$0xff] }
 0x495   :  { %4139 = vmatmul.msk.f32.gmra.mxu2 %vm1879_vm3, %v6268_v31  ;;  %4141 = vmatmul.msk.f32.gmra.mxu3 %vm1879_vm3, %v6268_v31 }
 0x496   :  { %2211 = vmatpush.msra.mxu2 %v4192_v45  ;;  %2234 = vmatpush.msrb.mxu3 %v4193_v60  ;;  %v4254_v45 = vld [vmem:[%s7398_s6 + $0x460] sm:$0xff]  ;;  %v4257_v60 = vld [vmem:[%s7398_s6 + $0x478] sm:$0xff] }
 0x497   :  { %2172 = vmatpush.msra.mxu1 %v4171_v49  ;;  %v4233_v49 = vld [vmem:[%s7398_s6 + $0x3d8] sm:$0xff] }
 0x498   :  { %2212 = vmatpush.msra.mxu2 %v4190_v7  ;;  %2235 = vmatpush.msrb.mxu3 %v4191_v62  ;;  %v4252_v7 = vld [vmem:[%s7398_s6 + $0x450] sm:$0xff]  ;;  %v4255_v62 = vld [vmem:[%s7398_s6 + $0x468] sm:$0xff] }
 0x499   :  { %2173 = vmatpush.msra.mxu1 %v4169_v33  ;;  %v4231_v33 = vld [vmem:[%s7398_s6 + $0x3c8] sm:$0xff] }
 0x49a   :  { %2213 = vmatpush.msra.mxu2 %v4188_v56  ;;  %2236 = vmatpush.msrb.mxu3 %v4189_v32  ;;  %v4250_v56 = vld [vmem:[%s7398_s6 + $0x440] sm:$0xff]  ;;  %v4253_v32 = vld [vmem:[%s7398_s6 + $0x458] sm:$0xff] }
 0x49b   :  { %2174 = vmatpush.msra.mxu1 %v4167_v41  ;;  %v4229_v41 = vld [vmem:[%s7398_s6 + $0x3b8] sm:$0xff] }
 0x49c   :  { %2214 = vmatpush.msra.mxu2 %v4186_v24  ;;  %4158 = vmatmul.msk.f32.vlgmr.msrb.gmra.mxu1 %vm1879_vm3, %v6229_v54  ;;  %v4248_v24 = vld [vmem:[%s7398_s6 + $0x430] sm:$0xff] }
 0x49d   :  { %4160 = vmatmul.msk.f32.vlgmr.msrb.gmra.mxu2 %vm1879_vm3, %v6229_v54  ;;  %4178 = vmatmul.msk.f32.vlgmr.msra.gmra.mxu3 %vm1879_vm3, %v6229_v54 }
 0x49e   :  { %2175 = vmatpush.msra.mxu1 %v4165_v28  ;;  %2237 = vmatpush.msrb.mxu3 %v4187_v46  ;;  %v4251_v28 = vld [vmem:[%s7398_s6 + $0x448] sm:$0xff] }
 0x49f   :  { %2215 = vmatpush.msra.mxu2 %v4184_v55  ;;  %v4227_v46 = vld [vmem:[%s7398_s6 + $0x3a8] sm:$0xff]  ;;  %v4246_v55 = vld [vmem:[%s7398_s6 + $0x420] sm:$0xff] }
 0x4a0   :  { %2176 = vmatpush.msra.mxu1 %v4163_v20  ;;  %2238 = vmatpush.msrb.mxu3 %v4185_v37  ;;  %v4249_v20 = vld [vmem:[%s7398_s6 + $0x438] sm:$0xff] }
 0x4a1   :  { %2216 = vmatpush.msra.mxu2 %v4182_v44  ;;  %v4225_v37 = vld [vmem:[%s7398_s6 + $0x398] sm:$0xff]  ;;  %v4244_v44 = vld [vmem:[%s7398_s6 + $0x410] sm:$0xff] }
 0x4a2   :  { %2272 = vmatpush.msrb.mxu1 %v4216_v30  ;;  %2239 = vmatpush.msrb.mxu3 %v4183_v6  ;;  %v4247_v30 = vld [vmem:[%s7398_s6 + $0x428] sm:$0xff]  ;;  %v4242_v6 = vld [vmem:[%s7398_s6 + $0x400] sm:$0xff] }
 0x4a3   :  { %2295 = vmatpush.msrb.mxu2 %v4217_v16  ;;  %v4223_v16 = vld [vmem:[%s7398_s6 + $0x388] sm:$0xff] }
 0x4a4   :  { %2335 = vmatpush.msra.mxu3 %v4236_v47  ;;  %2273 = vmatpush.msrb.mxu1 %v4214_v9  ;;  %v4245_v47 = vld [vmem:[%s7398_s6 + $0x418] sm:$0xff]  ;;  %v4243_v9 = vld [vmem:[%s7398_s6 + $0x408] sm:$0xff] }
 0x4a5   :  { %4159 = vmatmul.msk.f32.gmra.mxu1 %vm1879_vm3, %v6268_v31  ;;  %4161 = vmatmul.msk.f32.gmra.mxu2 %vm1879_vm3, %v6268_v31 }
 0x4a6   :  { %4179 = vmatmul.msk.f32.gmra.mxu3 %vm1879_vm3, %v6268_v31  ;;  %2296 = vmatpush.msrb.mxu2 %v4215_v18 }
 0x4a7   :  { %2336 = vmatpush.msra.mxu3 %v4234_v14  ;;  %2274 = vmatpush.msrb.mxu1 %v4212_v57 }
 0x4a8   :  { %2297 = vmatpush.msrb.mxu2 %v4213_v21 }
 0x4a9   :  { %2337 = vmatpush.msra.mxu3 %v4232_v59  ;;  %2275 = vmatpush.msrb.mxu1 %v4210_v1 }
 0x4aa   :  { %2298 = vmatpush.msrb.mxu2 %v4211_v11 }
 0x4ab   :  { %2338 = vmatpush.msra.mxu3 %v4230_v40  ;;  %2276 = vmatpush.msrb.mxu1 %v4208_v42  ;;  %v6610_v40 = vpop.permute.xlu2 %2752 }
 0x4ac   :  { %2299 = vmatpush.msrb.mxu2 %v4209_v29  ;;  %v6616_v29 = vpop.permute.xlu0 %2844 }
 0x4ad   :  { %4180 = vmatmul.msk.f32.vlgmr.msra.gmra.mxu1 %vm1879_vm3, %v6229_v54  ;;  %4198 = vmatmul.msk.f32.vlgmr.msra.gmra.mxu2 %vm1879_vm3, %v6229_v54 }
 0x4ae   :  { %4200 = vmatmul.msk.f32.vlgmr.msrb.gmra.mxu3 %vm1879_vm3, %v6229_v54  ;;  %2277 = vmatpush.msrb.mxu1 %v4206_v17 }
 0x4af   :  { %2339 = vmatpush.msra.mxu3 %v4228_v5  ;;  %2300 = vmatpush.msrb.mxu2 %v4207_v25 }
 0x4b0   :  { %2278 = vmatpush.msrb.mxu1 %v4204_v48 }
 0x4b1   :  { %2340 = vmatpush.msra.mxu3 %v4226_v34  ;;  %2301 = vmatpush.msrb.mxu2 %v4205_v53 }
 0x4b2   :  { %2279 = vmatpush.msrb.mxu1 %v4202_v38 }
 0x4b3   :  { %2341 = vmatpush.msra.mxu3 %v4224_v0  ;;  %2302 = vmatpush.msrb.mxu2 %v4203_v23  ;;  %v6622_v48 = vpop.permute.xlu2 %2684 }
 0x4b4   :  { %2358 = vmatpush.msra.mxu1 %v4237_v61  ;;  %v2777_v38 = vpop.permute.xlu0 %2776 }
 0x4b5   :  { %2398 = vmatpush.msra.mxu2 %v4256_v13  ;;  %4181 = vmatmul.msk.f32.gmra.mxu1 %vm1879_vm3, %v6268_v31 }
 0x4b6   :  { %4199 = vmatmul.msk.f32.gmra.mxu2 %vm1879_vm3, %v6268_v31  ;;  %4201 = vmatmul.msk.f32.gmra.mxu3 %vm1879_vm3, %v6268_v31 }
 0x4b7   :  { %2359 = vmatpush.msra.mxu1 %v4235_v63  ;;  %2342 = vmatpush.msra.mxu3 %v4222_v51 }
 0x4b8   :  { %2399 = vmatpush.msra.mxu2 %v4254_v45 }
 0x4b9   :  { %2421 = vmatpush.msrb.mxu3 %v4257_v60  ;;  %2360 = vmatpush.msra.mxu1 %v4233_v49 }
 0x4ba   :  { %2400 = vmatpush.msra.mxu2 %v4252_v7 }
 0x4bb   :  { %2422 = vmatpush.msrb.mxu3 %v4255_v62  ;;  %2361 = vmatpush.msra.mxu1 %v4231_v33  ;;  %v6632_v63 = vpop.permute.xlu2 %2616 }
 0x4bc   :  { %2401 = vmatpush.msra.mxu2 %v4250_v56  ;;  %v6634_v51 = vpop.permute.xlu0 %2708 }
 0x4bd   :  { %2423 = vmatpush.msrb.mxu3 %v4253_v32  ;;  %2362 = vmatpush.msra.mxu1 %v4229_v41 }
 0x4be   :  { %4218 = vmatmul.msk.f32.vlgmr.msrb.gmra.mxu1 %vm1879_vm3, %v6229_v54  ;;  %4220 = vmatmul.msk.f32.vlgmr.msrb.gmra.mxu2 %vm1879_vm3, %v6229_v54 }
 0x4bf   :  { %4238 = vmatmul.msk.f32.vlgmr.msra.gmra.mxu3 %vm1879_vm3, %v6229_v54  ;;  %2402 = vmatpush.msra.mxu2 %v4248_v24 }
 0x4c0   :  { %2424 = vmatpush.msrb.mxu3 %v4251_v28  ;;  %2363 = vmatpush.msra.mxu1 %v4227_v46 }
 0x4c1   :  { %2403 = vmatpush.msra.mxu2 %v4246_v55 }
 0x4c2   :  { %2425 = vmatpush.msrb.mxu3 %v4249_v20  ;;  %2364 = vmatpush.msra.mxu1 %v4225_v37 }
 0x4c3   :  { %2404 = vmatpush.msra.mxu2 %v4244_v44  ;;  %v6642_v62 = vpop.permute.xlu2 %2892 }
 0x4c4   :  { %2426 = vmatpush.msrb.mxu3 %v4247_v30  ;;  %2365 = vmatpush.msra.mxu1 %v4223_v16  ;;  %7676 = vst [vmem:[#allocation26_spill] sm:$0xff] %v6642_v62  ;;  %v2641_v33 = vpop.permute.xlu0 %2640 }
 0x4c5   :  { %2405 = vmatpush.msra.mxu2 %v4242_v6 }
 0x4c6   :  { %4219 = vmatmul.msk.f32.gmra.mxu1 %vm1879_vm3, %v6268_v31  ;;  %4221 = vmatmul.msk.f32.gmra.mxu2 %vm1879_vm3, %v6268_v31 }
 0x4c7   :  { %4239 = vmatmul.msk.f32.gmra.mxu3 %vm1879_vm3, %v6268_v31 }
 0x4c8   :  { %2427 = vmatpush.msrb.mxu3 %v4245_v47 }
 0x4ca   :  { %2428 = vmatpush.msrb.mxu3 %v4243_v9 }
 0x4cb   :  { %v6646_v28 = vpop.permute.xlu2 %2824 }
 0x4cc   :  { %v2665_v37 = vpop.permute.xlu0 %2664 }
 0x4ce   :  { %4240 = vmatmul.msk.f32.vlgmr.msra.gmra.mxu1 %vm1879_vm3, %v6229_v54  ;;  %4258 = vmatmul.msk.f32.vlgmr.msra.gmra.mxu2 %vm1879_vm3, %v6229_v54 }
 0x4cf   :  { %4260 = vmatmul.msk.f32.vlgmr.msrb.gmra.mxu3 %vm1879_vm3, %v6229_v54  ;;  %v6604_v54 = vpop.permute.xlu1 %2660 }
 0x4d3   :  { %v6650_v16 = vpop.permute.xlu2 %2848 }
 0x4d4   :  { %7677 = vst [vmem:[#allocation34_spill] sm:$0xff] %v6650_v16  ;;  %v6652_v9 = vpop.permute.xlu0 %2688 }
 0x4d6   :  { %4241 = vmatmul.msk.f32.gmra.mxu1 %vm1879_vm3, %v6268_v31  ;;  %4259 = vmatmul.msk.f32.gmra.mxu2 %vm1879_vm3, %v6268_v31 }
 0x4d7   :  { %4261 = vmatmul.msk.f32.gmra.mxu3 %vm1879_vm3, %v6268_v31  ;;  %v2593_v5 = vpop.permute.xlu1 %2592 }
 0x4df   :  { %v6628_v0 = vpop.permute.xlu1 %2868 }
 0x4e7   :  { %v6636_v45 = vpop.permute.xlu1 %2800 }
 0x4ef   :  { %v6644_v32 = vpop.permute.xlu1 %2732 }
 0x4f7   :  { %v6648_v44 = vpop.permute.xlu1 %2756 }
 0x4f9   :  { %v6594_v18 = vpop.f32.mrf.mxu1 }
 0x4fa   :  { %7669 = vst [vmem:[#allocation28_spill] sm:$0xff] %v6594_v18  ;;  %v6658_v18 = vpop.permute.xlu0 %2712 }
 0x4ff   :  { %v6596_v14 = vpop.f32.mrf.mxu2 }
 0x500   :  { %7670 = vst [vmem:[#allocation23_spill] sm:$0xff] %v6596_v14  ;;  %v6598_v57 = vpop.f32.mrf.mxu3  ;;  %v6654_v14 = vpop.permute.xlu1 %2780 }
 0x501   :  { %v6600_v21 = vpop.f32.mrf.mxu1  ;;  %7678 = vst [vmem:[#allocation25_spill] sm:$0xff] %v6654_v14 }
 0x507   :  { %v6602_v59 = vpop.f32.mrf.mxu2 }
 0x508   :  { %7671 = vst [vmem:[#allocation24_spill] sm:$0xff] %v6602_v59  ;;  %v6606_v1 = vpop.f32.mrf.mxu3 }
 0x509   :  { %v6608_v11 = vpop.f32.mrf.mxu1 }
 0x50a   :  { %7672 = vst [vmem:[#allocation15_spill] sm:$0xff] %v6608_v11 }
 0x50f   :  { %v6612_v42 = vpop.f32.mrf.mxu2 }
 0x510   :  { %v6614_v31 = vpop.f32.mrf.mxu3 }
 0x511   :  { %7673 = vst [vmem:[#allocation13_spill] sm:$0xff] %v6614_v31  ;;  %v6618_v17 = vpop.f32.mrf.mxu1  ;;  %v6656_v31 = vpop.permute.xlu2 %2872 }
 0x512   :  { %7674 = vst [vmem:[#allocation14_spill] sm:$0xff] %v6618_v17 }
 0x513   :  { %7679 = vst [vmem:[#allocation11_spill] sm:$0xff] %v6656_v31 }
 0x518   :  { %v6620_v25 = vpop.f32.mrf.mxu2  ;;  %v6624_v34 = vpop.f32.mrf.mxu3 }
 0x519   :  { %7675 = vst [vmem:[#allocation12_spill] sm:$0xff] %v6624_v34  ;;  %v6626_v53 = vpop.f32.mrf.mxu1  ;;  %v6660_v34 = vpop.permute.xlu1 %2804 }
 0x51a   :  { %v6662_v14 = vpop.permute.xlu2 %2896 }
 0x520   :  { %v6630_v23 = vpop.f32.mrf.mxu2  ;;  %v2155_v61 = vpop.f32.mrf.mxu3 }
 0x521   :  { %v6665_v31 = vpop.permute.xlu1 %2828 }
 0x522   :  { %v2095_v13 = vpop.f32.mrf.mxu1 }
 0x528   :  { %v6638_v60 = vpop.f32.mrf.mxu2 }
 0x529   :  { %v2158_v49 = vpop.f32.mrf.mxu3 }
 0x52a   :  { %v6640_v7 = vpop.f32.mrf.mxu1 }
 0x530   :  { %v2218_v56 = vpop.f32.mrf.mxu2 }
 0x531   :  { %v2241_v41 = vpop.f32.mrf.mxu3 }
 0x532   :  { %v2181_v24 = vpop.f32.mrf.mxu1 }
 0x539   :  { %v2221_v46 = vpop.f32.mrf.mxu2  ;;  %v2244_v55 = vpop.f32.mrf.mxu3 }
 0x53b   :  { %v2281_v20 = vpop.f32.mrf.mxu1 }
 0x541   :  { %v2304_v30 = vpop.f32.mrf.mxu2 }
 0x542   :  { %v2344_v6 = vpop.f32.mrf.mxu3 }
 0x543   :  { %v2284_v47 = vpop.f32.mrf.mxu1 }
 0x549   :  { %v2307_v59 = vpop.f32.mrf.mxu2 }
 0x54a   :  { %v2347_v11 = vpop.f32.mrf.mxu3 }
 0x54b   :  { %2447 = vmatpush.msrb.mxu1 %v2347_v11  ;;  %v2367_v17 = vpop.f32.mrf.mxu1  ;;  %v2598_v11 = vmul.f32 %v7636_v50, %v2593_v5  ;;  %v2764_v50 = vmul.f32 %v5618_v10, %v6610_v40  ;;  %v2812_v40 = vmul.f32 %v5789_v26, %v6636_v45  ;;  %v2741_v45 = vmul.f32 %v5593_v2, %v6644_v32 }
 0x54d   :  { %2448 = vmatpush.msrb.mxu1 %v2344_v6 }
 0x54f   :  { %2449 = vmatpush.msrb.mxu1 %v2284_v47  ;;  %v2737_v47 = vpop.permute.xlu0 %2736 }
 0x550   :  { %v2742_v32 = vmul.f32 %v5593_v2, %v2737_v47  ;;  %v7686_v47 = vld [vmem:[#allocation13_spill] sm:$0xff] }
 0x551   :  { %2450 = vmatpush.msrb.mxu1 %v2281_v20  ;;  %v2407_v16 = vpop.f32.mrf.mxu2  ;;  %v7682_v20 = vld [vmem:[#allocation12_spill] sm:$0xff] }
 0x552   :  { %v2430_v39 = vpop.f32.mrf.mxu3 }
 0x553   :  { %2451 = vmatpush.msrb.mxu1 %v2221_v46  ;;  %v2370_v62 = vpop.f32.mrf.mxu1  ;;  %v2437_v46 = vld [vmem:[%s7399_s7 + $0x8] sm:$0xff] }
 0x554   :  { %2487 = vmatpush.msra.mxu3 %v2370_v62  ;;  %v2669_v62 = vmul.f32 %v5414_v4, %v6604_v54  ;;  %v2622_v54 = vmul.f32 %v5328_v12, %v6632_v63  ;;  %v2693_v12 = vmul.f32 %v7647_v27, %v6622_v48 }
 0x555   :  { %2452 = vmatpush.msrb.mxu1 %v2218_v56 }
 0x556   :  { %2488 = vmatpush.msra.mxu3 %v2367_v17  ;;  %v2602_v17 = vadd.f32 %v2598_v11, %v6047_v8  ;;  %v2673_v8 = vadd.f32 %v2669_v62, %v6023_v35  ;;  %v2717_v35 = vmul.f32 %v5517_v22, %v6634_v51  ;;  %v2785_v51 = vpop.permute.xlu1 %2784  ;;  %v7685_v11 = vld [vmem:[#allocation28_spill] sm:$0xff] }
 0x557   :  { %2453 = vmatpush.msrb.mxu1 %v2158_v49  ;;  %v2646_v49 = vmul.f32 %v7641_v3, %v2641_v33  ;;  %v2859_v3 = vmul.f32 %v5811_v52, %v6616_v29  ;;  %v6703_v63 = vpop.permute.xlu0 %2852 }
 0x558   :  { %2489 = vmatpush.msra.mxu3 %v2307_v59  ;;  %v2788_v59 = vmul.f32 %v5786_v43, %v2777_v38  ;;  %v2915_v38 = vld [vmem:[#allocation2] sm:$0xff]  ;;  %v2697_v29 = vadd.f32 %v2693_v12, %v2673_v8 }
 0x559   :  { %2454 = vmatpush.msrb.mxu1 %v2155_v61  ;;  %v2410_v6 = vpop.f32.mrf.mxu2  ;;  %v2916_v61 = vld [vmem:[#allocation2 + $0x8] sm:$0xff]  ;;  %v2863_v48 = vadd.f32 %v2859_v3, %v6054_v58  ;;  %v6740_v8 = vld [vmem:[%s7400_s8] sm:$0xff] }
 0x55a   :  { %2481 = vmatpush.msrb.mxu2 %v2410_v6  ;;  %2490 = vmatpush.msra.mxu3 %v2304_v30  ;;  %v2433_v5 = vpop.f32.mrf.mxu3 }
 0x55b   :  { %2455 = vmatpush.msrb.mxu1 %v2095_v13  ;;  %v2768_v13 = vadd.f32 %v2764_v50, %v6035_v15  ;;  %2441 = vperm.xlu2 %4493, %v6740_v8  }
 0x55c   :  { %2482 = vmatpush.msrb.mxu2 %v2407_v16  ;;  %2491 = vmatpush.msra.mxu3 %v2244_v55  ;;  %v2670_v55 = vmul.f32 %v5414_v4, %v2665_v37  ;;  %v2694_v4 = vmul.f32 %v7647_v27, %v6652_v9  ;;  %v2718_v27 = vmul.f32 %v5517_v22, %v6658_v18  ;;  %v2436_v22 = vld [vmem:[%s7399_s7] sm:$0xff] }
 0x55d   :  { %2456 = vmatpush.msrb.mxu1 %v6626_v53  ;;  %4262 = vmatmul.msk.f32.vlgmr.msrb.gmra.mxu2 %vm1469_vm1, %v2437_v46  ;;  %v2761_v53 = vpop.permute.xlu2 %2760  ;;  %v2792_v56 = vadd.f32 %v2788_v59, %v2768_v13  ;;  %v7680_v18 = vld [vmem:[#allocation26_spill] sm:$0xff] }
 0x55e   :  { %2521 = vmatpush.msra.mxu2 %v2433_v5  ;;  %2492 = vmatpush.msra.mxu3 %v2241_v41  ;;  %v2626_v41 = vadd.f32 %v2622_v54, %v2602_v17  ;;  %v7683_v37 = vld [vmem:[#allocation34_spill] sm:$0xff]  ;;  %v2813_v17 = vmul.f32 %v5789_v26, %v6660_v34  ;;  %v3052_v5 = vld [vmem:[#allocation2 + $0x48] sm:$0xff]  ;;  %v2837_v34 = vmul.f32 %v5799_v36, %v6665_v31 }
 0x55f   :  { %2457 = vmatpush.msrb.mxu1 %v6620_v25  ;;  %v2816_v25 = vadd.f32 %v2812_v40, %v2792_v56  ;;  %v2860_v30 = vmul.f32 %v5811_v52, %v7683_v37  ;;  %v7687_v54 = vld [vmem:[#allocation11_spill] sm:$0xff]  ;;  %v7688_v40 = vld [vmem:[#allocation14_spill] sm:$0xff]  ;;  %v2790_v56 = vmul.f32 %v5786_v43, %v2785_v51 }
 0x560   :  { %2522 = vmatpush.msra.mxu2 %v2430_v39  ;;  %2493 = vmatpush.msra.mxu3 %v2181_v24  ;;  %v2883_v39 = vmul.f32 %v5824_v19, %v6628_v0  ;;  %v2650_v15 = vadd.f32 %v2646_v49, %v2626_v41  ;;  %v2884_v13 = vmul.f32 %v5824_v19, %v7687_v54  ;;  %v3051_v41 = vld [vmem:[#allocation2 + $0x40] sm:$0xff] }
 0x561   :  { %2458 = vmatpush.msrb.mxu1 %v6612_v42  ;;  %v2836_v42 = vmul.f32 %v5799_v36, %v6646_v28  ;;  %v2766_v49 = vmul.f32 %v5618_v10, %v2761_v53  ;;  %v2901_v53 = vpop.permute.xlu1 %2900  ;;  %v2989_v51 = vld [vmem:[#allocation2 + $0x20] sm:$0xff] }
 0x562   :  { %2943 = vmatpush.msrb.mxu2 %v2916_v61  ;;  %2494 = vmatpush.msra.mxu3 %v6640_v7  ;;  %v2674_v0 = vadd.f32 %v2670_v55, %v2650_v15  ;;  %v2721_v7 = vadd.f32 %v2717_v35, %v2697_v29  ;;  %v2887_v33 = vadd.f32 %v2883_v39, %v2863_v48  ;;  %v3020_v61 = vld [vmem:[#allocation2 + $0x30] sm:$0xff]  ;;  %v7689_v55 = vld [vmem:[#allocation15_spill] sm:$0xff] }
 0x563   :  { %2459 = vmatpush.msrb.mxu1 %v6606_v1  ;;  %v3021_v1 = vld [vmem:[#allocation2 + $0x38] sm:$0xff]  ;;  %v2840_v58 = vadd.f32 %v2836_v42, %v2816_v25  ;;  %v7690_v39 = vld [vmem:[#allocation24_spill] sm:$0xff]  ;;  %v2990_v25 = vld [vmem:[#allocation2 + $0x28] sm:$0xff]  ;;  %v2861_v29 = vmul.f32 %v5811_v52, %v6703_v63 }
 0x564   :  { %2944 = vmatpush.msrb.mxu2 %v2915_v38  ;;  %2495 = vmatpush.msra.mxu3 %v6638_v60  ;;  %v2698_v24 = vadd.f32 %v2694_v4, %v2674_v0  ;;  %v2765_v60 = vmul.f32 %v5618_v10, %v6648_v44  ;;  %v2745_v16 = vadd.f32 %v2741_v45, %v2721_v7  ;;  %v7684_v44 = vld [vmem:[#allocation25_spill] sm:$0xff]  ;;  %v2809_v10 = vpop.permute.xlu0 %2808  ;;  %v7691_v4 = vld [vmem:[#allocation23_spill] sm:$0xff] }
 0x565   :  { %2460 = vmatpush.msrb.mxu1 %v6598_v57  ;;  %4263 = vmatmul.msk.f32.vlgmr.msra.gmra.mxu2 %vm1469_vm1, %v2437_v46  ;;  %v7681_v57 = vld [vmem:[#allocation32_spill] sm:$0xff]  ;;  %v2789_v2 = vmul.f32 %v5786_v43, %v7684_v44  ;;  %v2877_v6 = vpop.permute.xlu2 %2876  ;;  %v2864_v62 = vadd.f32 %v2860_v30, %v2840_v58  ;;  %v2814_v48 = vmul.f32 %v5789_v26, %v2809_v10  ;;  %v3113_v30 = vld [vmem:[#allocation2 + $0x60] sm:$0xff] }
 0x566   :  { %2496 = vmatpush.msra.mxu3 %v6630_v23  ;;  %3036 = vmatpush.msra.mxu2 %v3021_v1  ;;  %v2907_v28 = vmul.f32 %v7681_v57, %v7680_v18  ;;  %v2959_v23 = vld [vmem:[#allocation2 + $0x18] sm:$0xff]  ;;  %v2722_v9 = vadd.f32 %v2718_v27, %v2698_v24  ;;  %v2958_v46 = vld [vmem:[#allocation2 + $0x10] sm:$0xff]  ;;  %v2769_v50 = vadd.f32 %v2765_v60, %v2745_v16  ;;  %v3176_v16 = vld [vmem:[#allocation2 + $0x88] sm:$0xff] }
 0x567   :  { %2461 = vmatpush.msrb.mxu1 %v6600_v21  ;;  %v2888_v12 = vadd.f32 %v2884_v13, %v2864_v62  ;;  %v2908_v43 = vmul.f32 %v7681_v57, %v6662_v14  ;;  %v3083_v14 = vld [vmem:[#allocation2 + $0x58] sm:$0xff]  ;;  %v2885_v1 = vmul.f32 %v5824_v19, %v2877_v6  ;;  %v3082_v60 = vld [vmem:[#allocation2 + $0x50] sm:$0xff] }
 0x568   :  { %2497 = vmatpush.msra.mxu3 %v7682_v20  ;;  %v6728_v21 = vadd.f32 %v2907_v28, %v2887_v33  ;;  %v2746_v59 = vadd.f32 %v2742_v32, %v2722_v9  ;;  %3037 = vmatpush.msra.mxu2 %v3020_v61  ;;  %v2793_v38 = vadd.f32 %v2789_v2, %v2769_v50  ;;  %v3175_v9 = vld [vmem:[#allocation2 + $0x80] sm:$0xff] }
 0x569   :  { %2462 = vmatpush.msrb.mxu1 %v7685_v11  ;;  %v6755_v42 = vadd.f32 %v2908_v43, %v2888_v12  ;;  %v2909_v33 = vmul.f32 %v7681_v57, %v2901_v53  ;;  %v2881_v26 = vpop.permute.xlu1 %2880 }
 0x56a   :  { %2463 = vmatmul.f32.vlgmr.msrb.gmra.mxu1 %v2436_v22  ;;  %2498 = vmatpush.msra.mxu3 %v7686_v47  ;;  %v2817_v3 = vadd.f32 %v2813_v17, %v2793_v38  ;;  %v2770_v35 = vadd.f32 %v2766_v49, %v2746_v59  ;;  %v2886_v18 = vmul.f32 %v5824_v19, %v2881_v26  ;;  %v3114_v19 = vld [vmem:[#allocation2 + $0x68] sm:$0xff]  ;;  %v3209_v26 = vld [vmem:[%s7396_s4 + $0x18] sm:$0xff] }
 0x56b   :  { %2974 = vmatpush.msra.mxu1 %v2959_v23 }
 0x56c   :  { %2499 = vmatpush.msra.mxu3 %v7688_v40  ;;  %v2841_v31 = vadd.f32 %v2837_v34, %v2817_v3  ;;  %v2794_v15 = vadd.f32 %v2790_v56, %v2770_v35  ;;  %v2857_v63 = vpop.permute.xlu0 %2856 }
 0x56d   :  { %4264 = vmatmul.msk.f32.vlgmr.msrb.gmra.mxu2 %vm1469_vm1, %v6728_v21  ;;  %2975 = vmatpush.msra.mxu1 %v2958_v46  ;;  %v2833_v0 = vpop.permute.xlu2 %2832  ;;  %v2862_v32 = vmul.f32 %v5811_v52, %v2857_v63  ;;  %v3145_v52 = vld [vmem:[#allocation2 + $0x78] sm:$0xff] }
 0x56e   :  { %2500 = vmatpush.msra.mxu3 %v7689_v55  ;;  %v2865_v45 = vadd.f32 %v2861_v29, %v2841_v31  ;;  %v2818_v27 = vadd.f32 %v2814_v48, %v2794_v15  ;;  %v2838_v7 = vmul.f32 %v5799_v36, %v2833_v0  ;;  %3129 = vmatpush.msrb.mxu2 %v3114_v19  ;;  %v3207_v19 = vld [vmem:[%s7396_s4 + $0x8] sm:$0xff] }
 0x56f   :  { %3067 = vmatpush.msrb.mxu1 %v3052_v5 }
 0x570   :  { %2501 = vmatpush.msra.mxu3 %v7690_v39  ;;  %v2889_v58 = vadd.f32 %v2885_v1, %v2865_v45  ;;  %v2842_v24 = vadd.f32 %v2838_v7, %v2818_v27  ;;  %3130 = vmatpush.msrb.mxu2 %v3113_v30  ;;  %v3206_v7 = vld [vmem:[%s7396_s4] sm:$0xff]  ;;  %v3316_v30 = vld [vmem:[%s7398_s6 + $0x78] sm:$0xff] }
 0x571   :  { %3068 = vmatpush.msrb.mxu1 %v3051_v41 }
 0x572   :  { %4268 = vmatmul.msk.f32.vlgmr.msra.gmra.mxu1 %vm1469_vm1, %v6728_v21  ;;  %2502 = vmatpush.msra.mxu3 %v7691_v4  ;;  %v2866_v36 = vadd.f32 %v2862_v32, %v2842_v24  ;;  %v3213_v32 = vld [vmem:[%s7397_s5 + $0x8] sm:$0xff] }
 0x573   :  { %2503 = vmatmul.f32.vlgmr.msra.gmra.mxu3 %v2436_v22  ;;  %v2913_v22 = vadd.f32 %v2909_v33, %v2889_v58  ;;  %3160 = vmatpush.msra.mxu1 %v3145_v52  ;;  %v3211_v52 = vld [vmem:[%s7396_s4 + $0x28] sm:$0xff] }
 0x574   :  { %3005 = vmatpush.msrb.mxu3 %v2990_v25  ;;  %v2890_v20 = vadd.f32 %v2886_v18, %v2866_v36  ;;  %3221 = vperm.xlu1 %4492, %v3213_v32   ;;  %v3313_v18 = vld [vmem:[%s7398_s6 + $0x60] sm:$0xff]  ;;  %v3311_v36 = vld [vmem:[%s7398_s6 + $0x50] sm:$0xff] }
 0x575   :  { %4265 = vmatmul.msk.f32.gmra.mxu2 %vm1469_vm1, %v6755_v42  ;;  %v2905_v28 = vpop.permute.xlu2 %2904 }
 0x576   :  { %3006 = vmatpush.msrb.mxu3 %v2989_v51  ;;  %v2910_v23 = vmul.f32 %v7681_v57, %v2905_v28  ;;  %v3144_v57 = vld [vmem:[#allocation2 + $0x70] sm:$0xff] }
 0x577   :  { %3161 = vmatpush.msra.mxu1 %v3144_v57  ;;  %v3314_v57 = vld [vmem:[%s7398_s6 + $0x68] sm:$0xff] }
 0x578   :  { %3098 = vmatpush.msra.mxu3 %v3083_v14  ;;  %v2914_v37 = vadd.f32 %v2910_v23, %v2890_v20  ;;  %v3208_v20 = vld [vmem:[%s7396_s4 + $0x10] sm:$0xff] }
 0x579   :  { %v4320_v23 = vld [vmem:[%s7398_s6 + $0xf0] sm:$0xff] }
 0x57a   :  { %4269 = vmatmul.msk.f32.gmra.mxu1 %vm1469_vm1, %v6755_v42  ;;  %3099 = vmatpush.msra.mxu3 %v3082_v60  ;;  %v3212_v60 = vld [vmem:[%s7397_s5] sm:$0xff] }
 0x57b   :  { %4272 = vmatmul.msk.f32.vlgmr.msrb.gmra.mxu3 %vm1469_vm1, %v6728_v21  ;;  %3216 = vperm.xlu0 %4491, %v3212_v60  }
 0x57c   :  { %3191 = vmatpush.msrb.mxu3 %v3176_v16  ;;  %3870 = vperm.xlu1 %4492, %v6740_v8   ;;  %v4318_v8 = vld [vmem:[%s7398_s6 + $0xe0] sm:$0xff]  ;;  %v3312_v16 = vld [vmem:[%s7398_s6 + $0x58] sm:$0xff] }
 0x57d   :  { %4266 = vmatmul.msk.f32.gmra.mxu2 %vm1469_vm1, %v2913_v22 }
 0x57e   :  { %3192 = vmatpush.msrb.mxu3 %v3175_v9  ;;  %v3210_v9 = vld [vmem:[%s7396_s4 + $0x20] sm:$0xff] }
 0x582   :  { %4270 = vmatmul.msk.f32.gmra.mxu1 %vm1469_vm1, %v2913_v22 }
 0x583   :  { %4273 = vmatmul.msk.f32.gmra.mxu3 %vm1469_vm1, %v6755_v42 }
 0x585   :  { %4267 = vmatmul.msk.f32.gmra.mxu2 %vm1469_vm1, %v2914_v37 }
 0x58a   :  { %4271 = vmatmul.msk.f32.gmra.mxu1 %vm1469_vm1, %v2914_v37 }
 0x58b   :  { %4274 = vmatmul.msk.f32.gmra.mxu3 %vm1469_vm1, %v2913_v22 }
 0x58d   :  { %4276 = vmatmul.msk.f32.vlgmr.msra.gmra.mxu2 %vm1469_vm1, %v6728_v21 }
 0x592   :  { %4280 = vmatmul.msk.f32.vlgmr.msrb.gmra.mxu1 %vm1469_vm1, %v6728_v21 }
 0x593   :  { %4275 = vmatmul.msk.f32.gmra.mxu3 %vm1469_vm1, %v2914_v37 }
 0x595   :  { %4277 = vmatmul.msk.f32.gmra.mxu2 %vm1469_vm1, %v6755_v42 }
 0x59a   :  { %4281 = vmatmul.msk.f32.gmra.mxu1 %vm1469_vm1, %v6755_v42 }
 0x59b   :  { %4284 = vmatmul.msk.f32.vlgmr.msra.gmra.mxu3 %vm1469_vm1, %v6728_v21 }
 0x59d   :  { %4278 = vmatmul.msk.f32.gmra.mxu2 %vm1469_vm1, %v2913_v22 }
 0x5a2   :  { %4282 = vmatmul.msk.f32.gmra.mxu1 %vm1469_vm1, %v2913_v22 }
 0x5a3   :  { %4285 = vmatmul.msk.f32.gmra.mxu3 %vm1469_vm1, %v6755_v42 }
 0x5a5   :  { %4279 = vmatmul.msk.f32.gmra.mxu2 %vm1469_vm1, %v2914_v37 }
 0x5aa   :  { %4283 = vmatmul.msk.f32.gmra.mxu1 %vm1469_vm1, %v2914_v37 }
 0x5ab   :  { %4286 = vmatmul.msk.f32.gmra.mxu3 %vm1469_vm1, %v2913_v22 }
 0x5ad   :  { %4288 = vmatmul.msk.f32.vlgmr.msrb.gmra.mxu2 %vm1469_vm1, %v6728_v21 }
 0x5b2   :  { %4292 = vmatmul.msk.f32.vlgmr.msra.gmra.mxu1 %vm1469_vm1, %v6728_v21 }
 0x5b3   :  { %4287 = vmatmul.msk.f32.gmra.mxu3 %vm1469_vm1, %v2914_v37 }
 0x5b5   :  { %4289 = vmatmul.msk.f32.gmra.mxu2 %vm1469_vm1, %v6755_v42  ;;  %v2442_v2 = vpop.permute.xlu2 %2441 }
 0x5ba   :  { %4293 = vmatmul.msk.f32.gmra.mxu1 %vm1469_vm1, %v6755_v42 }
 0x5bb   :  { %4296 = vmatmul.msk.f32.vlgmr.msrb.gmra.mxu3 %vm1469_vm1, %v6728_v21 }
 0x5bd   :  { %4290 = vmatmul.msk.f32.gmra.mxu2 %vm1469_vm1, %v2913_v22 }
 0x5c2   :  { %4294 = vmatmul.msk.f32.gmra.mxu1 %vm1469_vm1, %v2913_v22 }
 0x5c3   :  { %4297 = vmatmul.msk.f32.gmra.mxu3 %vm1469_vm1, %v6755_v42 }
 0x5c5   :  { %4291 = vmatmul.msk.f32.gmra.mxu2 %vm1469_vm1, %v2914_v37 }
 0x5ca   :  { %4295 = vmatmul.msk.f32.gmra.mxu1 %vm1469_vm1, %v2914_v37 }
 0x5cb   :  { %4298 = vmatmul.msk.f32.gmra.mxu3 %vm1469_vm1, %v2913_v22  ;;  %v3315_v22 = vld [vmem:[%s7398_s6 + $0x70] sm:$0xff] }
 0x5d3   :  { %4299 = vmatmul.msk.f32.gmra.mxu3 %vm1469_vm1, %v2914_v37  ;;  %v4316_v37 = vld [vmem:[%s7398_s6 + $0xd0] sm:$0xff] }
 0x5e0   :  { %v2484_v44 = vpop.f32.mrf.mxu2 }
 0x5e7   :  { %v2464_v11 = vpop.f32.mrf.mxu1 }
 0x5e8   :  { %v2524_v6 = vpop.f32.mrf.mxu2  ;;  %v2465_v21 = vadd.f32 %v2464_v11, %v2442_v2  ;;  %v4314_v11 = vld [vmem:[%s7398_s6 + $0xc0] sm:$0xff] }
 0x5ea   :  { %v2485_v47 = vadd.f32 %v2484_v44, %v2465_v21  ;;  %v3309_v44 = vld [vmem:[%s7398_s6 + $0x40] sm:$0xff]  ;;  %v3308_v21 = vld [vmem:[%s7398_s6 + $0x38] sm:$0xff] }
 0x5ec   :  { %v2527_v46 = vmax.f32 %v2485_v47, 0.0  ;;  %v4312_v47 = vld [vmem:[%s7398_s6 + $0xb0] sm:$0xff] }
 0x5ee   :  { %2529 = vst [vmem:[#allocation5] sm:$0xff] %v2527_v46  ;;  %v3305_v46 = vld [vmem:[%s7398_s6 + $0x20] sm:$0xff] }
 0x5ef   :  { %v2977_v62 = vpop.f32.mrf.mxu1 }
 0x5f0   :  { %v2946_v50 = vpop.f32.mrf.mxu2 }
 0x5f6   :  { %v2504_v59 = vpop.f32.mrf.mxu3 }
 0x5f7   :  { %v2505_v17 = vadd.f32 %v2504_v59, %v2442_v2  ;;  %v2980_v5 = vpop.f32.mrf.mxu1  ;;  %v3310_v2 = vld [vmem:[%s7398_s6 + $0x48] sm:$0xff]  ;;  %v3303_v59 = vld [vmem:[%s7398_s6 + $0x10] sm:$0xff] }
 0x5f8   :  { %v2949_v61 = vpop.f32.mrf.mxu2 }
 0x5f9   :  { %v2525_v54 = vadd.f32 %v2524_v6, %v2505_v17  ;;  %v3307_v6 = vld [vmem:[%s7398_s6 + $0x30] sm:$0xff]  ;;  %v3304_v17 = vld [vmem:[%s7398_s6 + $0x18] sm:$0xff] }
 0x5fb   :  { %v2528_v13 = vmax.f32 %v2525_v54, 0.0  ;;  %v3302_v54 = vld [vmem:[%s7398_s6 + $0x8] sm:$0xff] }
 0x5fd   :  { %2530 = vst [vmem:[#allocation5 + $0x8] sm:$0xff] %v2528_v13  ;;  %v4306_v13 = vld [vmem:[%s7398_s6 + $0x80] sm:$0xff] }
 0x5fe   :  { %v3008_v49 = vpop.f32.mrf.mxu3 }
 0x5ff   :  { %v2983_v40 = vpop.f32.mrf.mxu1 }
 0x600   :  { %v2952_v38 = vpop.f32.mrf.mxu2 }
 0x606   :  { %v3011_v34 = vpop.f32.mrf.mxu3 }
 0x607   :  { %v2986_v56 = vpop.f32.mrf.mxu1 }
 0x608   :  { %v2955_v41 = vpop.f32.mrf.mxu2 }
 0x60e   :  { %v3014_v10 = vpop.f32.mrf.mxu3 }
 0x60f   :  { %v6816_v53 = vpop.f32.mrf.mxu1 }
 0x610   :  { %v3039_v55 = vpop.f32.mrf.mxu2 }
 0x616   :  { %v3017_v12 = vpop.f32.mrf.mxu3 }
 0x617   :  { %v6818_v3 = vpop.f32.mrf.mxu1 }
 0x618   :  { %v3042_v35 = vpop.f32.mrf.mxu2 }
 0x61e   :  { %v6820_v39 = vpop.f32.mrf.mxu3 }
 0x61f   :  { %v6822_v43 = vpop.f32.mrf.mxu1 }
 0x620   :  { %v3045_v31 = vpop.f32.mrf.mxu2 }
 0x626   :  { %v3104_v15 = vpop.f32.mrf.mxu3 }
 0x627   :  { %v6824_v25 = vpop.f32.mrf.mxu1 }
 0x628   :  { %v3048_v4 = vpop.f32.mrf.mxu2 }
 0x629   :  { %3230 = vmatpush.msra.mxu2 %v3048_v4  ;;  %v4331_v4 = vld [vmem:[%s7398_s6 + $0x128] sm:$0xff] }
 0x62b   :  { %3231 = vmatpush.msra.mxu2 %v3045_v31  ;;  %v4333_v31 = vld [vmem:[%s7398_s6 + $0x138] sm:$0xff] }
 0x62d   :  { %3232 = vmatpush.msra.mxu2 %v3042_v35  ;;  %v4335_v35 = vld [vmem:[%s7398_s6 + $0x148] sm:$0xff] }
 0x62e   :  { %v3107_v42 = vpop.f32.mrf.mxu3 }
 0x62f   :  { %v3163_v29 = vpop.f32.mrf.mxu1  ;;  %3233 = vmatpush.msra.mxu2 %v3039_v55  ;;  %v4337_v55 = vld [vmem:[%s7398_s6 + $0x158] sm:$0xff] }
 0x630   :  { %v3132_v48 = vpop.f32.mrf.mxu2 }
 0x631   :  { %3234 = vmatpush.msra.mxu2 %v3017_v12  ;;  %v4315_v12 = vld [vmem:[%s7398_s6 + $0xc8] sm:$0xff] }
 0x633   :  { %3235 = vmatpush.msra.mxu2 %v3014_v10  ;;  %v4317_v10 = vld [vmem:[%s7398_s6 + $0xd8] sm:$0xff] }
 0x635   :  { %3236 = vmatpush.msra.mxu2 %v3011_v34  ;;  %v4319_v34 = vld [vmem:[%s7398_s6 + $0xe8] sm:$0xff] }
 0x636   :  { %v3110_v51 = vpop.f32.mrf.mxu3 }
 0x637   :  { %v3166_v0 = vpop.f32.mrf.mxu1  ;;  %3237 = vmatpush.msra.mxu2 %v3008_v49  ;;  %v4321_v49 = vld [vmem:[%s7398_s6 + $0xf8] sm:$0xff] }
 0x638   :  { %v3135_v14 = vpop.f32.mrf.mxu2 }
 0x639   :  { %3238 = vmatpush.msra.mxu2 %v2986_v56  ;;  %v4338_v56 = vld [vmem:[%s7398_s6 + $0x160] sm:$0xff] }
 0x63b   :  { %3239 = vmatpush.msra.mxu2 %v2983_v40  ;;  %v4340_v40 = vld [vmem:[%s7398_s6 + $0x170] sm:$0xff] }
 0x63d   :  { %3240 = vmatpush.msra.mxu2 %v2980_v5  ;;  %v4308_v5 = vld [vmem:[%s7398_s6 + $0x90] sm:$0xff] }
 0x63e   :  { %v3194_v45 = vpop.f32.mrf.mxu3 }
 0x63f   :  { %v3169_v27 = vpop.f32.mrf.mxu1  ;;  %3241 = vmatpush.msra.mxu2 %v2977_v62  ;;  %v3306_v62 = vld [vmem:[%s7398_s6 + $0x28] sm:$0xff] }
 0x640   :  { %v3138_v1 = vpop.f32.mrf.mxu2 }
 0x641   :  { %3242 = vmatpush.msra.mxu2 %v2955_v41  ;;  %v4339_v41 = vld [vmem:[%s7398_s6 + $0x168] sm:$0xff] }
 0x643   :  { %3243 = vmatpush.msra.mxu2 %v2952_v38  ;;  %v4341_v38 = vld [vmem:[%s7398_s6 + $0x178] sm:$0xff] }
 0x645   :  { %3244 = vmatpush.msra.mxu2 %v2949_v61  ;;  %v3301_v61 = vld [vmem:[%s7398_s6] sm:$0xff] }
 0x646   :  { %v3197_v33 = vpop.f32.mrf.mxu3 }
 0x647   :  { %v3172_v63 = vpop.f32.mrf.mxu1  ;;  %3245 = vmatpush.msra.mxu2 %v2946_v50  ;;  %v4310_v50 = vld [vmem:[%s7398_s6 + $0xa0] sm:$0xff] }
 0x648   :  { %3253 = vmatpush.msrb.mxu1 %v3172_v63  ;;  %3246 = vmatmul.f32.vlgmr.msra.gmra.mxu2 %v3206_v7  ;;  %v3141_v24 = vpop.f32.mrf.mxu2 }
 0x649   :  { %3331 = vmatpush.msrb.mxu2 %v3315_v22  ;;  %v4360_v22 = vld [vmem:[%s7398_s6 + $0x1f0] sm:$0xff] }
 0x64a   :  { %3254 = vmatpush.msrb.mxu1 %v3169_v27  ;;  %v3217_v27 = vpop.permute.xlu0 %3216 }
 0x64b   :  { %3332 = vmatpush.msrb.mxu2 %v3313_v18  ;;  %v4361_v18 = vld [vmem:[%s7398_s6 + $0x1f8] sm:$0xff] }
 0x64c   :  { %3255 = vmatpush.msrb.mxu1 %v3166_v0  ;;  %v4326_v0 = vld [vmem:[%s7398_s6 + $0x100] sm:$0xff] }
 0x64d   :  { %3333 = vmatpush.msrb.mxu2 %v3311_v36  ;;  %v4380_v36 = vld [vmem:[%s7398_s6 + $0x270] sm:$0xff] }
 0x64e   :  { %3256 = vmatpush.msrb.mxu1 %v3163_v29  ;;  %v3200_v58 = vpop.f32.mrf.mxu3  ;;  %v4328_v29 = vld [vmem:[%s7398_s6 + $0x110] sm:$0xff] }
 0x64f   :  { %3334 = vmatpush.msrb.mxu2 %v3309_v44 }
 0x650   :  { %3257 = vmatpush.msrb.mxu1 %v3141_v24  ;;  %3249 = vmatmul.f32.gmra.mxu2 %v3209_v26  ;;  %v3222_v24 = vpop.permute.xlu1 %3221 }
 0x651   :  { %3335 = vmatpush.msrb.mxu2 %v3307_v6  ;;  %v4352_v6 = vld [vmem:[%s7398_s6 + $0x1b0] sm:$0xff] }
 0x652   :  { %3258 = vmatpush.msrb.mxu1 %v3138_v1 }
 0x653   :  { %3336 = vmatpush.msrb.mxu2 %v3305_v46  ;;  %v4350_v46 = vld [vmem:[%s7398_s6 + $0x1a0] sm:$0xff] }
 0x654   :  { %3259 = vmatpush.msrb.mxu1 %v3135_v14  ;;  %v4327_v14 = vld [vmem:[%s7398_s6 + $0x108] sm:$0xff] }
 0x655   :  { %3337 = vmatpush.msrb.mxu2 %v3303_v59  ;;  %v4348_v59 = vld [vmem:[%s7398_s6 + $0x190] sm:$0xff] }
 0x656   :  { %3260 = vmatpush.msrb.mxu1 %v3132_v48  ;;  %v3203_v28 = vpop.f32.mrf.mxu3  ;;  %v4329_v48 = vld [vmem:[%s7398_s6 + $0x118] sm:$0xff] }
 0x657   :  { %3288 = vmatpush.msra.mxu3 %v3203_v28  ;;  %3338 = vmatpush.msrb.mxu2 %v3301_v61  ;;  %v4358_v28 = vld [vmem:[%s7398_s6 + $0x1e0] sm:$0xff]  ;;  %v4368_v61 = vld [vmem:[%s7398_s6 + $0x210] sm:$0xff] }
 0x658   :  { %3261 = vmatpush.msrb.mxu1 %v3110_v51  ;;  %v4307_v51 = vld [vmem:[%s7398_s6 + $0x88] sm:$0xff] }
 0x659   :  { %3289 = vmatpush.msra.mxu3 %v3200_v58  ;;  %3416 = vmatpush.msra.mxu2 %v4321_v49  ;;  %v4400_v49 = vld [vmem:[%s7398_s6 + $0x2f0] sm:$0xff] }
 0x65a   :  { %3262 = vmatpush.msrb.mxu1 %v3107_v42  ;;  %v4309_v42 = vld [vmem:[%s7398_s6 + $0x98] sm:$0xff] }
 0x65b   :  { %3290 = vmatpush.msra.mxu3 %v3197_v33  ;;  %3417 = vmatpush.msra.mxu2 %v4319_v34  ;;  %v4379_v34 = vld [vmem:[%s7398_s6 + $0x268] sm:$0xff] }
 0x65c   :  { %3263 = vmatpush.msrb.mxu1 %v3104_v15  ;;  %v4311_v15 = vld [vmem:[%s7398_s6 + $0xa8] sm:$0xff] }
 0x65d   :  { %3291 = vmatpush.msra.mxu3 %v3194_v45  ;;  %3418 = vmatpush.msra.mxu2 %v4317_v10  ;;  %v4377_v10 = vld [vmem:[%s7398_s6 + $0x258] sm:$0xff] }
 0x65e   :  { %3264 = vmatpush.msrb.mxu1 %v6820_v39  ;;  %4300 = vmatmul.msk.f32.vlgmr.msra.gmra.mxu3 %vm1785_vm2, %v3208_v20  ;;  %v4313_v39 = vld [vmem:[%s7398_s6 + $0xb8] sm:$0xff] }
 0x65f   :  { %3393 = vmatpush.msrb.mxu3 %v4320_v23  ;;  %3419 = vmatpush.msra.mxu2 %v4315_v12  ;;  %v4375_v12 = vld [vmem:[%s7398_s6 + $0x248] sm:$0xff] }
 0x660   :  { %3265 = vmatpush.msrb.mxu1 %v6824_v25  ;;  %v4330_v25 = vld [vmem:[%s7398_s6 + $0x120] sm:$0xff] }
 0x661   :  { %3394 = vmatpush.msrb.mxu3 %v4318_v8  ;;  %3420 = vmatpush.msra.mxu2 %v4313_v39  ;;  %v4359_v8 = vld [vmem:[%s7398_s6 + $0x1e8] sm:$0xff]  ;;  %v4373_v39 = vld [vmem:[%s7398_s6 + $0x238] sm:$0xff] }
 0x662   :  { %3266 = vmatpush.msrb.mxu1 %v6822_v43  ;;  %v4332_v43 = vld [vmem:[%s7398_s6 + $0x130] sm:$0xff] }
 0x663   :  { %3395 = vmatpush.msrb.mxu3 %v4316_v37  ;;  %3421 = vmatpush.msra.mxu2 %v4311_v15  ;;  %v4378_v37 = vld [vmem:[%s7398_s6 + $0x260] sm:$0xff]  ;;  %v4371_v15 = vld [vmem:[%s7398_s6 + $0x228] sm:$0xff] }
 0x664   :  { %3267 = vmatpush.msrb.mxu1 %v6818_v3  ;;  %v4334_v3 = vld [vmem:[%s7398_s6 + $0x140] sm:$0xff] }
 0x665   :  { %3396 = vmatpush.msrb.mxu3 %v4314_v11  ;;  %3422 = vmatpush.msra.mxu2 %v4309_v42  ;;  %v4374_v11 = vld [vmem:[%s7398_s6 + $0x240] sm:$0xff]  ;;  %v4391_v42 = vld [vmem:[%s7398_s6 + $0x2a8] sm:$0xff] }
 0x666   :  { %3268 = vmatpush.msrb.mxu1 %v6816_v53  ;;  %4301 = vmatmul.msk.f32.gmra.mxu3 %vm1785_vm2, %v3211_v52  ;;  %v4336_v53 = vld [vmem:[%s7398_s6 + $0x150] sm:$0xff] }
 0x667   :  { %3269 = vmatmul.f32.vlgmr.msrb.gmra.mxu1 %v3207_v19  ;;  %3397 = vmatpush.msrb.mxu3 %v4312_v47  ;;  %v4356_v19 = vld [vmem:[%s7398_s6 + $0x1d0] sm:$0xff] }
 0x668   :  { %3354 = vmatpush.msra.mxu1 %v3316_v30  ;;  %3423 = vmatpush.msra.mxu2 %v4307_v51  ;;  %v4357_v30 = vld [vmem:[%s7398_s6 + $0x1d8] sm:$0xff]  ;;  %v4372_v47 = vld [vmem:[%s7398_s6 + $0x230] sm:$0xff] }
 0x669   :  { %3398 = vmatpush.msrb.mxu3 %v4310_v50  ;;  %v4370_v50 = vld [vmem:[%s7398_s6 + $0x220] sm:$0xff]  ;;  %v4389_v51 = vld [vmem:[%s7398_s6 + $0x298] sm:$0xff] }
 0x66a   :  { %3355 = vmatpush.msra.mxu1 %v3314_v57  ;;  %v4376_v57 = vld [vmem:[%s7398_s6 + $0x250] sm:$0xff] }
 0x66b   :  { %3399 = vmatpush.msrb.mxu3 %v4308_v5  ;;  %v4346_v5 = vld [vmem:[%s7398_s6 + $0x180] sm:$0xff] }
 0x66c   :  { %3356 = vmatpush.msra.mxu1 %v3312_v16 }
 0x66d   :  { %3400 = vmatpush.msrb.mxu3 %v4306_v13  ;;  %v4381_v13 = vld [vmem:[%s7398_s6 + $0x278] sm:$0xff] }
 0x66e   :  { %3357 = vmatpush.msra.mxu1 %v3310_v2  ;;  %v4355_v2 = vld [vmem:[%s7398_s6 + $0x1c8] sm:$0xff] }
 0x66f   :  { %3272 = vmatmul.f32.gmra.mxu1 %v3210_v9  ;;  %3478 = vmatpush.msra.mxu3 %v4341_v38  ;;  %v4354_v9 = vld [vmem:[%s7398_s6 + $0x1c0] sm:$0xff]  ;;  %v4401_v38 = vld [vmem:[%s7398_s6 + $0x2f8] sm:$0xff] }
 0x670   :  { %3358 = vmatpush.msra.mxu1 %v3308_v21  ;;  %v4353_v21 = vld [vmem:[%s7398_s6 + $0x1b8] sm:$0xff] }
 0x671   :  { %3479 = vmatpush.msra.mxu3 %v4339_v41  ;;  %v4399_v41 = vld [vmem:[%s7398_s6 + $0x2e8] sm:$0xff] }
 0x672   :  { %3359 = vmatpush.msra.mxu1 %v3306_v62  ;;  %v4351_v62 = vld [vmem:[%s7398_s6 + $0x1a8] sm:$0xff] }
 0x673   :  { %3480 = vmatpush.msra.mxu3 %v4337_v55  ;;  %v4397_v55 = vld [vmem:[%s7398_s6 + $0x2d8] sm:$0xff] }
 0x674   :  { %3360 = vmatpush.msra.mxu1 %v3304_v17  ;;  %v4349_v17 = vld [vmem:[%s7398_s6 + $0x198] sm:$0xff] }
 0x675   :  { %3481 = vmatpush.msra.mxu3 %v4335_v35  ;;  %v4395_v35 = vld [vmem:[%s7398_s6 + $0x2c8] sm:$0xff] }
 0x676   :  { %3361 = vmatpush.msra.mxu1 %v3302_v54  ;;  %v4347_v54 = vld [vmem:[%s7398_s6 + $0x188] sm:$0xff] }
 0x677   :  { %3482 = vmatpush.msra.mxu3 %v4333_v31  ;;  %v4393_v31 = vld [vmem:[%s7398_s6 + $0x2b8] sm:$0xff] }
 0x678   :  { %3455 = vmatpush.msrb.mxu1 %v4340_v40  ;;  %v4366_v40 = vld [vmem:[%s7398_s6 + $0x200] sm:$0xff] }
 0x679   :  { %3483 = vmatpush.msra.mxu3 %v4331_v4  ;;  %v4369_v4 = vld [vmem:[%s7398_s6 + $0x218] sm:$0xff] }
 0x67a   :  { %3456 = vmatpush.msrb.mxu1 %v4338_v56  ;;  %v4398_v56 = vld [vmem:[%s7398_s6 + $0x2e0] sm:$0xff] }
 0x67b   :  { %3484 = vmatpush.msra.mxu3 %v4329_v48  ;;  %v4367_v48 = vld [vmem:[%s7398_s6 + $0x208] sm:$0xff] }
 0x67c   :  { %3457 = vmatpush.msrb.mxu1 %v4336_v53  ;;  %v4396_v53 = vld [vmem:[%s7398_s6 + $0x2d0] sm:$0xff] }
 0x67d   :  { %3485 = vmatpush.msra.mxu3 %v4327_v14  ;;  %v4420_v14 = vld [vmem:[%s7398_s6 + $0x370] sm:$0xff] }
 0x67e   :  { %3458 = vmatpush.msrb.mxu1 %v4334_v3  ;;  %v4394_v3 = vld [vmem:[%s7398_s6 + $0x2c0] sm:$0xff] }
 0x680   :  { %3459 = vmatpush.msrb.mxu1 %v4332_v43  ;;  %v4392_v43 = vld [vmem:[%s7398_s6 + $0x2b0] sm:$0xff] }
 0x682   :  { %3460 = vmatpush.msrb.mxu1 %v4330_v25  ;;  %v4390_v25 = vld [vmem:[%s7398_s6 + $0x2a0] sm:$0xff] }
 0x684   :  { %3461 = vmatpush.msrb.mxu1 %v4328_v29  ;;  %v4388_v29 = vld [vmem:[%s7398_s6 + $0x290] sm:$0xff] }
 0x686   :  { %3462 = vmatpush.msrb.mxu1 %v4326_v0  ;;  %v4386_v0 = vld [vmem:[%s7398_s6 + $0x280] sm:$0xff] }
 0x6cb   :  { %v3247_v45 = vpop.f32.mrf.mxu2 }
 0x6cc   :  { %v3248_v1 = vadd.f32 %v3247_v45, %v3217_v27  ;;  %v4421_v45 = vld [vmem:[%s7398_s6 + $0x378] sm:$0xff]  ;;  %v4387_v27 = vld [vmem:[%s7398_s6 + $0x288] sm:$0xff] }
 0x6d3   :  { %v3250_v26 = vpop.f32.mrf.mxu2 }
 0x6d4   :  { %v3251_v32 = vadd.f32 %v3250_v26, %v3222_v24  ;;  %v4416_v26 = vld [vmem:[%s7398_s6 + $0x350] sm:$0xff] }
 0x6d5   :  { %v4436_v24 = vld [vmem:[%s7398_s6 + $0x3d0] sm:$0xff] }
 0x6e1   :  { %v3293_v7 = vpop.f32.mrf.mxu3 }
 0x6e4   :  { %v3270_v33 = vpop.f32.mrf.mxu1 }
 0x6e5   :  { %v3271_v63 = vadd.f32 %v3270_v33, %v3248_v1  ;;  %v4440_v1 = vld [vmem:[%s7398_s6 + $0x3f0] sm:$0xff]  ;;  %v4419_v33 = vld [vmem:[%s7398_s6 + $0x368] sm:$0xff] }
 0x6e7   :  { %v3294_v58 = vadd.f32 %v3293_v7, %v3271_v63  ;;  %v4418_v7 = vld [vmem:[%s7398_s6 + $0x360] sm:$0xff] }
 0x6e8   :  { %v4438_v63 = vld [vmem:[%s7398_s6 + $0x3e0] sm:$0xff] }
 0x6e9   :  { %v7002_v60 = vmax.f32 %v3294_v58, 0.0  ;;  %v3296_v23 = vpop.f32.mrf.mxu3  ;;  %v4417_v58 = vld [vmem:[%s7398_s6 + $0x358] sm:$0xff] }
 0x6eb   :  { %4302 = vmatmul.msk.f32.vlgmr.msrb.gmra.mxu2 %vm1879_vm3, %v7002_v60  ;;  %4304 = vmatmul.msk.f32.vlgmr.msra.gmra.mxu1 %vm1879_vm3, %v7002_v60 }
 0x6ec   :  { %4322 = vmatmul.msk.f32.vlgmr.msrb.gmra.mxu3 %vm1879_vm3, %v7002_v60  ;;  %v3273_v20 = vpop.f32.mrf.mxu1  ;;  %3517 = vmatpush.msrb.mxu2 %v4360_v22  ;;  %v4415_v22 = vld [vmem:[%s7398_s6 + $0x348] sm:$0xff] }
 0x6ed   :  { %v3274_v52 = vadd.f32 %v3273_v20, %v3251_v32  ;;  %3540 = vmatpush.msra.mxu1 %v4361_v18  ;;  %3579 = vmatpush.msrb.mxu3 %v4380_v36  ;;  %v4414_v32 = vld [vmem:[%s7398_s6 + $0x340] sm:$0xff]  ;;  %v4412_v36 = vld [vmem:[%s7398_s6 + $0x330] sm:$0xff] }
 0x6ee   :  { %3518 = vmatpush.msrb.mxu2 %v4358_v28  ;;  %v4434_v18 = vld [vmem:[%s7398_s6 + $0x3c0] sm:$0xff]  ;;  %v4413_v28 = vld [vmem:[%s7398_s6 + $0x338] sm:$0xff] }
 0x6ef   :  { %v3297_v16 = vadd.f32 %v3296_v23, %v3274_v52  ;;  %3541 = vmatpush.msra.mxu1 %v4359_v8  ;;  %3580 = vmatpush.msrb.mxu3 %v4378_v37  ;;  %v4410_v20 = vld [vmem:[%s7398_s6 + $0x320] sm:$0xff]  ;;  %v4432_v23 = vld [vmem:[%s7398_s6 + $0x3b0] sm:$0xff]  ;;  %v4411_v8 = vld [vmem:[%s7398_s6 + $0x328] sm:$0xff] }
 0x6f0   :  { %3519 = vmatpush.msrb.mxu2 %v4356_v19  ;;  %v4408_v37 = vld [vmem:[%s7398_s6 + $0x310] sm:$0xff]  ;;  %v4430_v52 = vld [vmem:[%s7398_s6 + $0x3a0] sm:$0xff]  ;;  %v4409_v19 = vld [vmem:[%s7398_s6 + $0x318] sm:$0xff] }
 0x6f1   :  { %v7040_v44 = vmax.f32 %v3297_v16, 0.0  ;;  %3542 = vmatpush.msra.mxu1 %v4357_v30  ;;  %3581 = vmatpush.msrb.mxu3 %v4376_v57  ;;  %v4406_v30 = vld [vmem:[%s7398_s6 + $0x300] sm:$0xff]  ;;  %v4428_v57 = vld [vmem:[%s7398_s6 + $0x390] sm:$0xff]  ;;  %v4407_v16 = vld [vmem:[%s7398_s6 + $0x308] sm:$0xff] }
 0x6f2   :  { %3520 = vmatpush.msrb.mxu2 %v4354_v9  ;;  %v4441_v9 = vld [vmem:[%s7398_s6 + $0x3f8] sm:$0xff] }
 0x6f3   :  { %4303 = vmatmul.msk.f32.gmra.mxu2 %vm1879_vm3, %v7040_v44  ;;  %4305 = vmatmul.msk.f32.gmra.mxu1 %vm1879_vm3, %v7040_v44 }
 0x6f4   :  { %4323 = vmatmul.msk.f32.gmra.mxu3 %vm1879_vm3, %v7040_v44  ;;  %3543 = vmatpush.msra.mxu1 %v4355_v2  ;;  %v4460_v2 = vld [vmem:[%s7398_s6 + $0x470] sm:$0xff] }
 0x6f5   :  { %3582 = vmatpush.msrb.mxu3 %v4374_v11  ;;  %3521 = vmatpush.msrb.mxu2 %v4352_v6  ;;  %v4439_v11 = vld [vmem:[%s7398_s6 + $0x3e8] sm:$0xff]  ;;  %v4426_v6 = vld [vmem:[%s7398_s6 + $0x380] sm:$0xff] }
 0x6f6   :  { %3544 = vmatpush.msra.mxu1 %v4353_v21  ;;  %v4458_v21 = vld [vmem:[%s7398_s6 + $0x460] sm:$0xff] }
 0x6f7   :  { %3583 = vmatpush.msrb.mxu3 %v4372_v47  ;;  %3522 = vmatpush.msrb.mxu2 %v4350_v46  ;;  %v4461_v47 = vld [vmem:[%s7398_s6 + $0x478] sm:$0xff] }
 0x6f8   :  { %3545 = vmatpush.msra.mxu1 %v4351_v62  ;;  %v4437_v46 = vld [vmem:[%s7398_s6 + $0x3d8] sm:$0xff]  ;;  %v4456_v62 = vld [vmem:[%s7398_s6 + $0x450] sm:$0xff] }
 0x6f9   :  { %3584 = vmatpush.msrb.mxu3 %v4370_v50  ;;  %3523 = vmatpush.msrb.mxu2 %v4348_v59  ;;  %v4459_v50 = vld [vmem:[%s7398_s6 + $0x468] sm:$0xff] }
 0x6fa   :  { %3546 = vmatpush.msra.mxu1 %v4349_v17  ;;  %v4435_v59 = vld [vmem:[%s7398_s6 + $0x3c8] sm:$0xff]  ;;  %v4454_v17 = vld [vmem:[%s7398_s6 + $0x440] sm:$0xff] }
 0x6fb   :  { %4324 = vmatmul.msk.f32.vlgmr.msra.gmra.mxu2 %vm1879_vm3, %v7002_v60  ;;  %4342 = vmatmul.msk.f32.vlgmr.msrb.gmra.mxu1 %vm1879_vm3, %v7002_v60 }
 0x6fc   :  { %4344 = vmatmul.msk.f32.vlgmr.msra.gmra.mxu3 %vm1879_vm3, %v7002_v60  ;;  %3524 = vmatpush.msrb.mxu2 %v4346_v5  ;;  %v4457_v5 = vld [vmem:[%s7398_s6 + $0x458] sm:$0xff] }
 0x6fd   :  { %3585 = vmatpush.msrb.mxu3 %v4368_v61  ;;  %3547 = vmatpush.msra.mxu1 %v4347_v54  ;;  %v4433_v61 = vld [vmem:[%s7398_s6 + $0x3b8] sm:$0xff]  ;;  %v4452_v54 = vld [vmem:[%s7398_s6 + $0x430] sm:$0xff] }
 0x6fe   :  { %3602 = vmatpush.msra.mxu2 %v4381_v13  ;;  %v4455_v13 = vld [vmem:[%s7398_s6 + $0x448] sm:$0xff] }
 0x6ff   :  { %3641 = vmatpush.msrb.mxu1 %v4400_v49  ;;  %3586 = vmatpush.msrb.mxu3 %v4366_v40  ;;  %v4431_v49 = vld [vmem:[%s7398_s6 + $0x3a8] sm:$0xff]  ;;  %v4450_v40 = vld [vmem:[%s7398_s6 + $0x420] sm:$0xff] }
 0x700   :  { %3603 = vmatpush.msra.mxu2 %v4379_v34  ;;  %v4429_v34 = vld [vmem:[%s7398_s6 + $0x398] sm:$0xff] }
 0x701   :  { %3664 = vmatpush.msra.mxu3 %v4401_v38  ;;  %3642 = vmatpush.msrb.mxu1 %v4398_v56  ;;  %v4453_v38 = vld [vmem:[%s7398_s6 + $0x438] sm:$0xff]  ;;  %v4448_v56 = vld [vmem:[%s7398_s6 + $0x410] sm:$0xff] }
 0x702   :  { %3604 = vmatpush.msra.mxu2 %v4377_v10  ;;  %v4427_v10 = vld [vmem:[%s7398_s6 + $0x388] sm:$0xff] }
 0x703   :  { %3665 = vmatpush.msra.mxu3 %v4399_v41  ;;  %4325 = vmatmul.msk.f32.gmra.mxu2 %vm1879_vm3, %v7040_v44  ;;  %v4451_v41 = vld [vmem:[%s7398_s6 + $0x428] sm:$0xff] }
 0x704   :  { %4343 = vmatmul.msk.f32.gmra.mxu1 %vm1879_vm3, %v7040_v44  ;;  %4345 = vmatmul.msk.f32.gmra.mxu3 %vm1879_vm3, %v7040_v44 }
 0x705   :  { %3643 = vmatpush.msrb.mxu1 %v4396_v53  ;;  %3666 = vmatpush.msra.mxu3 %v4397_v55  ;;  %v4446_v53 = vld [vmem:[%s7398_s6 + $0x400] sm:$0xff]  ;;  %v4449_v55 = vld [vmem:[%s7398_s6 + $0x418] sm:$0xff] }
 0x706   :  { %3605 = vmatpush.msra.mxu2 %v4375_v12  ;;  %v4447_v12 = vld [vmem:[%s7398_s6 + $0x408] sm:$0xff] }
 0x707   :  { %3644 = vmatpush.msrb.mxu1 %v4394_v3  ;;  %3667 = vmatpush.msra.mxu3 %v4395_v35 }
 0x708   :  { %3606 = vmatpush.msra.mxu2 %v4373_v39 }
 0x709   :  { %3645 = vmatpush.msrb.mxu1 %v4392_v43  ;;  %3668 = vmatpush.msra.mxu3 %v4393_v31 }
 0x70a   :  { %3607 = vmatpush.msra.mxu2 %v4371_v15 }
 0x70b   :  { %3646 = vmatpush.msrb.mxu1 %v4390_v25  ;;  %4362 = vmatmul.msk.f32.vlgmr.msrb.gmra.mxu2 %vm1879_vm3, %v7002_v60 }
 0x70c   :  { %4364 = vmatmul.msk.f32.vlgmr.msra.gmra.mxu1 %vm1879_vm3, %v7002_v60  ;;  %4382 = vmatmul.msk.f32.vlgmr.msrb.gmra.mxu3 %vm1879_vm3, %v7002_v60 }
 0x70d   :  { %3608 = vmatpush.msra.mxu2 %v4369_v4  ;;  %3669 = vmatpush.msra.mxu3 %v4391_v42 }
 0x70e   :  { %3647 = vmatpush.msrb.mxu1 %v4388_v29 }
 0x70f   :  { %3609 = vmatpush.msra.mxu2 %v4367_v48  ;;  %3670 = vmatpush.msra.mxu3 %v4389_v51 }
 0x710   :  { %3648 = vmatpush.msrb.mxu1 %v4386_v0 }
 0x711   :  { %3703 = vmatpush.msrb.mxu2 %v4420_v14  ;;  %3671 = vmatpush.msra.mxu3 %v4387_v27 }
 0x712   :  { %3726 = vmatpush.msra.mxu1 %v4421_v45 }
 0x713   :  { %3765 = vmatpush.msrb.mxu3 %v4440_v1  ;;  %3704 = vmatpush.msrb.mxu2 %v4418_v7 }
 0x714   :  { %4363 = vmatmul.msk.f32.gmra.mxu2 %vm1879_vm3, %v7040_v44  ;;  %4365 = vmatmul.msk.f32.gmra.mxu1 %vm1879_vm3, %v7040_v44 }
 0x715   :  { %4383 = vmatmul.msk.f32.gmra.mxu3 %vm1879_vm3, %v7040_v44  ;;  %3727 = vmatpush.msra.mxu1 %v4419_v33 }
 0x716   :  { %3766 = vmatpush.msrb.mxu3 %v4438_v63  ;;  %3705 = vmatpush.msrb.mxu2 %v4416_v26 }
 0x717   :  { %3728 = vmatpush.msra.mxu1 %v4417_v58 }
 0x718   :  { %3767 = vmatpush.msrb.mxu3 %v4436_v24  ;;  %3706 = vmatpush.msrb.mxu2 %v4414_v32 }
 0x719   :  { %3729 = vmatpush.msra.mxu1 %v4415_v22 }
 0x71a   :  { %3768 = vmatpush.msrb.mxu3 %v4434_v18  ;;  %3707 = vmatpush.msrb.mxu2 %v4412_v36 }
 0x71b   :  { %3730 = vmatpush.msra.mxu1 %v4413_v28 }
 0x71c   :  { %4384 = vmatmul.msk.f32.vlgmr.msra.gmra.mxu2 %vm1879_vm3, %v7002_v60  ;;  %4402 = vmatmul.msk.f32.vlgmr.msrb.gmra.mxu1 %vm1879_vm3, %v7002_v60 }
 0x71d   :  { %4404 = vmatmul.msk.f32.vlgmr.msra.gmra.mxu3 %vm1879_vm3, %v7002_v60  ;;  %3708 = vmatpush.msrb.mxu2 %v4410_v20 }
 0x71e   :  { %3769 = vmatpush.msrb.mxu3 %v4432_v23  ;;  %3731 = vmatpush.msra.mxu1 %v4411_v8 }
 0x71f   :  { %3709 = vmatpush.msrb.mxu2 %v4408_v37 }
 0x720   :  { %3770 = vmatpush.msrb.mxu3 %v4430_v52  ;;  %3732 = vmatpush.msra.mxu1 %v4409_v19  ;;  %v3866_v52 = vld [vmem:[%s7399_s7 + $0x8] sm:$0xff] }
 0x721   :  { %3710 = vmatpush.msrb.mxu2 %v4406_v30 }
 0x722   :  { %3771 = vmatpush.msrb.mxu3 %v4428_v57  ;;  %3733 = vmatpush.msra.mxu1 %v4407_v16  ;;  %v3865_v57 = vld [vmem:[%s7399_s7] sm:$0xff]  ;;  %v3871_v16 = vpop.permute.xlu1 %3870  ;;  %s4552_s7 = smov [#allocation5]  }
 0x723   :  { %3788 = vmatpush.msra.mxu2 %v4441_v9  ;;  %s3965_s8 = sshll.u32 %s4552_s7, 4  ;;  %s3966_s8 = int_to_ptr.vmem [resolvable:$true] %s3965_s8 }
 0x724   :  { %3827 = vmatpush.msrb.mxu1 %v4460_v2  ;;  %4385 = vmatmul.msk.f32.gmra.mxu2 %vm1879_vm3, %v7040_v44 }
 0x725   :  { %4403 = vmatmul.msk.f32.gmra.mxu1 %vm1879_vm3, %v7040_v44  ;;  %4405 = vmatmul.msk.f32.gmra.mxu3 %vm1879_vm3, %v7040_v44 }
 0x726   :  { %3789 = vmatpush.msra.mxu2 %v4439_v11  ;;  %3772 = vmatpush.msrb.mxu3 %v4426_v6 }
 0x727   :  { %3828 = vmatpush.msrb.mxu1 %v4458_v21 }
 0x728   :  { %3850 = vmatpush.msra.mxu3 %v4461_v47  ;;  %3790 = vmatpush.msra.mxu2 %v4437_v46 }
 0x729   :  { %3829 = vmatpush.msrb.mxu1 %v4456_v62 }
 0x72a   :  { %3851 = vmatpush.msra.mxu3 %v4459_v50  ;;  %3791 = vmatpush.msra.mxu2 %v4435_v59 }
 0x72b   :  { %3830 = vmatpush.msrb.mxu1 %v4454_v17 }
 0x72c   :  { %3852 = vmatpush.msra.mxu3 %v4457_v5  ;;  %3792 = vmatpush.msra.mxu2 %v4433_v61 }
 0x72d   :  { %4422 = vmatmul.msk.f32.vlgmr.msrb.gmra.mxu2 %vm1879_vm3, %v7002_v60  ;;  %4424 = vmatmul.msk.f32.vlgmr.msra.gmra.mxu1 %vm1879_vm3, %v7002_v60 }
 0x72e   :  { %4442 = vmatmul.msk.f32.vlgmr.msrb.gmra.mxu3 %vm1879_vm3, %v7002_v60  ;;  %3831 = vmatpush.msrb.mxu1 %v4452_v54 }
 0x72f   :  { %3853 = vmatpush.msra.mxu3 %v4455_v13  ;;  %3793 = vmatpush.msra.mxu2 %v4431_v49 }
 0x730   :  { %3832 = vmatpush.msrb.mxu1 %v4450_v40 }
 0x731   :  { %3854 = vmatpush.msra.mxu3 %v4453_v38  ;;  %3794 = vmatpush.msra.mxu2 %v4429_v34 }
 0x732   :  { %3833 = vmatpush.msrb.mxu1 %v4448_v56 }
 0x733   :  { %3855 = vmatpush.msra.mxu3 %v4451_v41  ;;  %3795 = vmatpush.msra.mxu2 %v4427_v10 }
 0x734   :  { %3834 = vmatpush.msrb.mxu1 %v4446_v53 }
 0x735   :  { %4423 = vmatmul.msk.f32.gmra.mxu2 %vm1879_vm3, %v7040_v44  ;;  %4425 = vmatmul.msk.f32.gmra.mxu1 %vm1879_vm3, %v7040_v44 }
 0x736   :  { %4443 = vmatmul.msk.f32.gmra.mxu3 %vm1879_vm3, %v7040_v44 }
 0x737   :  { %3856 = vmatpush.msra.mxu3 %v4449_v55 }
 0x739   :  { %3857 = vmatpush.msra.mxu3 %v4447_v12 }
 0x73d   :  { %4444 = vmatmul.msk.f32.vlgmr.msra.gmra.mxu2 %vm1879_vm3, %v7002_v60  ;;  %4462 = vmatmul.msk.f32.vlgmr.msrb.gmra.mxu1 %vm1879_vm3, %v7002_v60 }
 0x73e   :  { %4464 = vmatmul.msk.f32.vlgmr.msra.gmra.mxu3 %vm1879_vm3, %v7002_v60 }
 0x745   :  { %4445 = vmatmul.msk.f32.gmra.mxu2 %vm1879_vm3, %v7040_v44  ;;  %4463 = vmatmul.msk.f32.gmra.mxu1 %vm1879_vm3, %v7040_v44 }
 0x746   :  { %4465 = vmatmul.msk.f32.gmra.mxu3 %vm1879_vm3, %v7040_v44 }
 0x768   :  { %v7366_v3 = vpop.f32.mrf.mxu1 }
 0x76e   :  { %v7368_v35 = vpop.f32.mrf.mxu2 }
 0x76f   :  { %v3402_v39 = vpop.f32.mrf.mxu3 }
 0x770   :  { %v7370_v43 = vpop.f32.mrf.mxu1 }
 0x776   :  { %v3343_v31 = vpop.f32.mrf.mxu2 }
 0x777   :  { %v3405_v15 = vpop.f32.mrf.mxu3 }
 0x778   :  { %v3464_v25 = vpop.f32.mrf.mxu1 }
 0x77e   :  { %v7372_v60 = vpop.f32.mrf.mxu2 }
 0x77f   :  { %v7374_v4 = vpop.f32.mrf.mxu3 }
 0x781   :  { %v3467_v42 = vpop.f32.mrf.mxu1 }
 0x786   :  { %v3428_v29 = vpop.f32.mrf.mxu2 }
 0x787   :  { %v3490_v48 = vpop.f32.mrf.mxu3 }
 0x789   :  { %v3549_v51 = vpop.f32.mrf.mxu1 }
 0x78e   :  { %v3526_v0 = vpop.f32.mrf.mxu2 }
 0x78f   :  { %v3588_v44 = vpop.f32.mrf.mxu3 }
 0x791   :  { %v3552_v14 = vpop.f32.mrf.mxu1 }
 0x797   :  { %v3529_v45 = vpop.f32.mrf.mxu2 }
 0x798   :  { %v3591_v27 = vpop.f32.mrf.mxu3 }
 0x799   :  { %v3650_v1 = vpop.f32.mrf.mxu1 }
 0x79f   :  { %v3611_v7 = vpop.f32.mrf.mxu2 }
 0x7a0   :  { %v3673_v33 = vpop.f32.mrf.mxu3 }
 0x7a2   :  { %v3653_v63 = vpop.f32.mrf.mxu1 }
 0x7a7   :  { %v3614_v26 = vpop.f32.mrf.mxu2 }
 0x7a8   :  { %v3676_v58 = vpop.f32.mrf.mxu3 }
 0x7aa   :  { %v3735_v24 = vpop.f32.mrf.mxu1 }
 0x7b0   :  { %v3712_v32 = vpop.f32.mrf.mxu2 }
 0x7b1   :  { %v3774_v22 = vpop.f32.mrf.mxu3 }
 0x7b2   :  { %v3738_v18 = vpop.f32.mrf.mxu1 }
 0x7b8   :  { %v3715_v36 = vpop.f32.mrf.mxu2 }
 0x7b9   :  { %v3777_v28 = vpop.f32.mrf.mxu3 }
 0x7ba   :  { %3876 = vmatpush.msrb.mxu2 %v3777_v28  ;;  %v3836_v20 = vpop.f32.mrf.mxu1 }
 0x7bc   :  { %3877 = vmatpush.msrb.mxu2 %v3774_v22 }
 0x7be   :  { %3878 = vmatpush.msrb.mxu2 %v3715_v36 }
 0x7c0   :  { %3879 = vmatpush.msrb.mxu2 %v3712_v32  ;;  %v3797_v23 = vpop.f32.mrf.mxu2 }
 0x7c1   :  { %v3859_v8 = vpop.f32.mrf.mxu3 }
 0x7c2   :  { %3880 = vmatpush.msrb.mxu2 %v3653_v63  ;;  %v3839_v37 = vpop.f32.mrf.mxu1 }
 0x7c3   :  { %3910 = vmatpush.msra.mxu1 %v3839_v37 }
 0x7c4   :  { %3881 = vmatpush.msrb.mxu2 %v3650_v1 }
 0x7c5   :  { %3911 = vmatpush.msra.mxu1 %v3836_v20 }
 0x7c6   :  { %3882 = vmatpush.msrb.mxu2 %v3591_v27  ;;  %4466 = vmatmul.msk.f32.vlgmr.msra.gmra.mxu1 %vm1469_vm1, %v3866_v52 }
 0x7c8   :  { %3883 = vmatpush.msrb.mxu2 %v3588_v44  ;;  %v3800_v19 = vpop.f32.mrf.mxu2 }
 0x7c9   :  { %v3862_v30 = vpop.f32.mrf.mxu3  ;;  %3916 = vmatpush.msrb.mxu3 %v3800_v19 }
 0x7ca   :  { %3884 = vmatpush.msrb.mxu2 %v3529_v45  ;;  %3950 = vmatpush.msrb.mxu1 %v3862_v30 }
 0x7cb   :  { %3917 = vmatpush.msrb.mxu3 %v3797_v23 }
 0x7cc   :  { %3885 = vmatpush.msrb.mxu2 %v3526_v0  ;;  %3951 = vmatpush.msrb.mxu1 %v3859_v8 }
 0x7cd   :  { %3918 = vmatpush.msrb.mxu3 %v3738_v18 }
 0x7ce   :  { %3886 = vmatpush.msrb.mxu2 %v3467_v42  ;;  %4467 = vmatmul.msk.f32.vlgmr.msrb.gmra.mxu1 %vm1469_vm1, %v3866_v52 }
 0x7cf   :  { %3919 = vmatpush.msrb.mxu3 %v3735_v24 }
 0x7d0   :  { %3887 = vmatpush.msrb.mxu2 %v3464_v25 }
 0x7d1   :  { %3920 = vmatpush.msrb.mxu3 %v3676_v58 }
 0x7d2   :  { %3888 = vmatpush.msrb.mxu2 %v3405_v15 }
 0x7d3   :  { %3921 = vmatpush.msrb.mxu3 %v3673_v33 }
 0x7d4   :  { %3889 = vmatpush.msrb.mxu2 %v3402_v39 }
 0x7d5   :  { %3922 = vmatpush.msrb.mxu3 %v3614_v26 }
 0x7d6   :  { %3890 = vmatpush.msrb.mxu2 %v3343_v31 }
 0x7d7   :  { %3923 = vmatpush.msrb.mxu3 %v3611_v7 }
 0x7d8   :  { %3891 = vmatpush.msrb.mxu2 %v7368_v35 }
 0x7d9   :  { %3892 = vmatmul.f32.vlgmr.msrb.gmra.mxu2 %v3865_v57  ;;  %3924 = vmatpush.msrb.mxu3 %v3552_v14 }
 0x7db   :  { %3925 = vmatpush.msrb.mxu3 %v3549_v51 }
 0x7dd   :  { %3926 = vmatpush.msrb.mxu3 %v3490_v48 }
 0x7df   :  { %3927 = vmatpush.msrb.mxu3 %v7374_v4 }
 0x7e1   :  { %3928 = vmatpush.msrb.mxu3 %v3428_v29 }
 0x7e3   :  { %3929 = vmatpush.msrb.mxu3 %v7372_v60 }
 0x7e5   :  { %3930 = vmatpush.msrb.mxu3 %v7370_v43 }
 0x7e7   :  { %3931 = vmatpush.msrb.mxu3 %v7366_v3 }
 0x7e8   :  { %3932 = vmatmul.f32.vlgmr.msrb.gmra.mxu3 %v3865_v57 }
 0x843   :  { %v3913_v2 = vpop.f32.mrf.mxu1 }
 0x84b   :  { %v3953_v46 = vpop.f32.mrf.mxu1 }
 0x85c   :  { %v3893_v9 = vpop.f32.mrf.mxu2 }
 0x85d   :  { %v3894_v11 = vadd.f32 %v3893_v9, %v3871_v16 }
 0x85f   :  { %v3914_v6 = vadd.f32 %v3913_v2, %v3894_v11 }
 0x861   :  { %v3956_v21 = vmax.f32 %v3914_v6, 0.0 }
 0x863   :  { %3959 = vst [vmem:[#allocation5 + $0x10] sm:$0xff] %v3956_v21 }
 0x86b   :  { %v3933_v47 = vpop.f32.mrf.mxu3 }
 0x86c   :  { %v3934_v62 = vadd.f32 %v3933_v47, %v3871_v16 }
 0x86e   :  { %v3954_v50 = vadd.f32 %v3953_v46, %v3934_v62 }
 0x870   :  { %v3957_v59 = vmax.f32 %v3954_v50, 0.0 }
 0x872   :  { %3960 = vst [vmem:[#allocation5 + $0x18] sm:$0xff] %v3957_v59 }
 0x873   :  { %3973 = dma.vmem_to_hbm [thread:$0]  %s3966_s8, 512, %s3968_s16, [#allocation4], %s4553_s17, %s4553_s17, %s4554_s3  }
 0x874   :  { %4544 = dma.done.wait [#allocation4], 512  }
 0x875   :  { %4545 = vsyncadd [#allocation4], 4294966784 }
 0x876   :  { %3978 = vsyncpa [#allocation3], 1 }
 0x877   :  { %3979 = vsyncpa [#allocation4], 1 }

</bundles_post_ra>
